<compile_context>
chip_gen: v6e
topology: v6e:2x2x1
jax: 0.10.0
libtpu: 0.0.40
codegen_flags: <defaults>
</compile_context>

<pallas_src>
import jax
import jax.numpy as jnp
from jax.experimental import pallas as pl
from jax.experimental.pallas import tpu as pltpu

LANE = 128


def _cdiv(a, b):
    return (a + b - 1) // b


def _round_up(n, m):
    return _cdiv(n, m) * m


def mlp_kernel(x_ref, w1_ref, b1_ref, w2_ref, b2_ref, w3_ref, b3_ref,
               w4_ref, b4_ref, o_ref):
    f32, bf16 = jnp.float32, jnp.bfloat16

    # x arrives with its true (unpadded) feature dim; cast to bf16 for the MXU.
    # K is padded to the MXU K-tile internally, so no explicit pad is needed.
    x = x_ref[...].astype(bf16)                                      # (TB, d_in)

    # fc1..fc3: MXU matmul, f32 accumulate, fused bias + ReLU + bf16 downcast.
    h = jnp.maximum(jnp.dot(x, w1_ref[...], preferred_element_type=f32)
                    + b1_ref[...], 0.0).astype(bf16)                 # (TB, 256)
    h = jnp.maximum(jnp.dot(h, w2_ref[...], preferred_element_type=f32)
                    + b2_ref[...], 0.0).astype(bf16)                 # (TB, 256)
    h = jnp.maximum(jnp.dot(h, w3_ref[...], preferred_element_type=f32)
                    + b3_ref[...], 0.0).astype(bf16)                 # (TB, 128)

    # fc4 (128 -> 1): VPU multiply + lane (XLU) reduction in f32.  Avoids both
    # a potential (TB,128) transpose and a degenerate N=1 MXU matmul; output
    # traffic is only 4 B/row so the (TB, 1) masked stores are negligible.
    w4 = w4_ref[...].astype(f32)                                     # (1, 128)
    h4 = jnp.sum(h.astype(f32) * w4, axis=-1, keepdims=True) + b4_ref[0, 0]
    o_ref[...] = jnp.maximum(h4, 0.0)                                # (TB, 1)


def your_model_forward(x, params, *, tile_b=2048, min_pallas_batch=512):
    """x: (B, input_layers) f32. params: weights stored (in, out), biases (1, out)."""
    B, d_in = x.shape
    f32, bf16 = jnp.float32, jnp.bfloat16

    # Tiny batches: launch + DMA-setup overhead dwarfs the math -> plain XLA.
    if B < min_pallas_batch:
        return ref_forward(x, params)

    # Batch tile: large enough to amortize per-step pipeline overhead, small
    # enough to keep >= 2 grid steps (v7x megacore) and fit scoped VMEM.
    tile_b = max(LANE, min(tile_b, _round_up(B, LANE)))
    if B >= 2 * LANE and _cdiv(B, tile_b) < 2:
        tile_b = _round_up(_cdiv(B, 2), LANE)
    B_pad = _round_up(B, tile_b)
    grid = (B_pad // tile_b,)

    x_p = x.astype(f32)
    if B_pad != B:                      # pad only the batch dim, only if needed
        x_p = jnp.pad(x_p, ((0, B_pad - B), (0, 0)))

    w1 = params["w1"].astype(bf16)                    # (d_in, 256)
    w2 = params["w2"].astype(bf16)                    # (256, 256)
    w3 = params["w3"].astype(bf16)                    # (256, 128)
    w4 = params["w4"].reshape(1, -1).astype(bf16)     # (1, 128)
    b1 = params["b1"].astype(f32)
    b2 = params["b2"].astype(f32)
    b3 = params["b3"].astype(f32)
    b4 = params["b4"].reshape(1, 1).astype(f32)       # scalar -> SMEM

    def resident(a):   # full array, constant block index -> fetched once, VMEM-resident
        return pl.BlockSpec(a.shape, lambda i: (0, 0))

    out = pl.pallas_call(
        mlp_kernel,
        out_shape=jax.ShapeDtypeStruct((B_pad, 1), f32),
        grid=grid,
        in_specs=[
            pl.BlockSpec((tile_b, d_in), lambda i: (i, 0)),      # x: batch-tiled, unpadded K
            resident(w1), resident(b1),
            resident(w2), resident(b2),
            resident(w3), resident(b3),
            resident(w4),
            pl.BlockSpec(memory_space=pltpu.MemorySpace.SMEM),   # b4 scalar
        ],
        out_specs=pl.BlockSpec((tile_b, 1), lambda i: (i, 0)),
        compiler_params=pltpu.CompilerParams(
            dimension_semantics=("parallel",)),
    )(x_p, w1, b1, w2, b2, w3, b3, w4, b4)

    return out[:B]


def init_params(key, input_layers):
    """Matches YourModel.init_weights(): Linear weights ~ U(-1e-4, 1e-4), biases zero."""
    k1, k2, k3, k4 = jax.random.split(key, 4)
    lo, hi = -0.0001, 0.0001

    def w(k, fan_in, fan_out):
        # PyTorch weight is (out, in); we store (in, out) so the kernel does x @ W.
        return jax.random.uniform(k, (fan_in, fan_out), jnp.float32, lo, hi)

    return {
        "w1": w(k1, input_layers, 256), "b1": jnp.zeros((1, 256), jnp.float32),
        "w2": w(k2, 256, 256),          "b2": jnp.zeros((1, 256), jnp.float32),
        "w3": w(k3, 256, 128),          "b3": jnp.zeros((1, 128), jnp.float32),
        "w4": w(k4, 128, 1),            "b4": jnp.zeros((1, 1), jnp.float32),
    }


def ref_forward(x, params):
    """Pure-JAX reference (and small-batch fallback) with the same
    bf16-operand / f32-accumulate numerics as the kernel."""
    f32, bf16 = jnp.float32, jnp.bfloat16

    def layer(h, w, b):
        return jnp.maximum(
            jnp.dot(h.astype(bf16), w.astype(bf16),
                    preferred_element_type=f32) + b, 0.0)

    h = layer(x, params["w1"], params["b1"])
    h = layer(h, params["w2"], params["b2"])
    h = layer(h, params["w3"], params["b3"])
    return layer(h, params["w4"], params["b4"])


if __name__ == "__main__":
    key = jax.random.PRNGKey(0)
    kx, kp = jax.random.split(key)

    input_layers = 32
    batch = 1000    # > fallback threshold, not a tile multiple -> pad + 2-step grid
    x = jax.random.normal(kx, (batch, input_layers), jnp.float32)
    params = init_params(kp, input_layers)

    out = jax.block_until_ready(your_model_forward(x, params))
    assert out.shape == (batch, 1), out.shape

    expected = ref_forward(x, params)
    err = float(jnp.max(jnp.abs(out - expected)))
    scale = float(jnp.max(jnp.abs(expected))) + 1e-30
    assert err <= 2e-3 * scale, (err, scale)

    print("KERNEL_OK")
</pallas_src>

<mosaic_0001>
module attributes {stable_mosaic.version = 11 : i64} {
  func.func @mlp_kernel(%arg0: i32, %arg1: memref<512x32xf32, #tpu.memory_space<vmem>>, %arg2: memref<32x256xbf16, #tpu.memory_space<vmem>>, %arg3: memref<1x256xf32, #tpu.memory_space<vmem>>, %arg4: memref<256x256xbf16, #tpu.memory_space<vmem>>, %arg5: memref<1x256xf32, #tpu.memory_space<vmem>>, %arg6: memref<256x128xbf16, #tpu.memory_space<vmem>>, %arg7: memref<1x128xf32, #tpu.memory_space<vmem>>, %arg8: memref<1x128xbf16, #tpu.memory_space<vmem>>, %arg9: memref<1x1xf32, #tpu.memory_space<smem>>, %arg10: memref<512x1xf32, #tpu.memory_space<vmem>>) attributes {dimension_semantics = [#tpu.dimension_semantics<parallel>], iteration_bounds = array<i64: 2>, scalar_prefetch = 0 : i64, scratch_operands = 0 : i64, tpu.core_type = #tpu.core_type<tc>, window_params = [{transform_indices = @transform_0, window_bounds = array<i64: 512, 32>}, {pipeline_mode = #tpu.pipeline_mode<synchronous>, transform_indices = @transform_1, window_bounds = array<i64: 32, 256>}, {pipeline_mode = #tpu.pipeline_mode<synchronous>, transform_indices = @transform_2, window_bounds = array<i64: 1, 256>}, {pipeline_mode = #tpu.pipeline_mode<synchronous>, transform_indices = @transform_3, window_bounds = array<i64: 256, 256>}, {pipeline_mode = #tpu.pipeline_mode<synchronous>, transform_indices = @transform_4, window_bounds = array<i64: 1, 256>}, {pipeline_mode = #tpu.pipeline_mode<synchronous>, transform_indices = @transform_5, window_bounds = array<i64: 256, 128>}, {pipeline_mode = #tpu.pipeline_mode<synchronous>, transform_indices = @transform_6, window_bounds = array<i64: 1, 128>}, {pipeline_mode = #tpu.pipeline_mode<synchronous>, transform_indices = @transform_7, window_bounds = array<i64: 1, 128>}, {transform_indices = @transform_8, window_bounds = array<i64: 1, 1>}, {transform_indices = @transform_9, window_bounds = array<i64: 512, 1>}]} {
    %c0 = arith.constant 0 : index
    %c0_0 = arith.constant 0 : index
    %0 = vector.load %arg1[%c0, %c0_0] : memref<512x32xf32, #tpu.memory_space<vmem>>, vector<512x32xf32>
    %1 = arith.truncf %0 : vector<512x32xf32> to vector<512x32xbf16>
    %c0_1 = arith.constant 0 : index
    %c0_2 = arith.constant 0 : index
    %2 = vector.load %arg2[%c0_1, %c0_2] : memref<32x256xbf16, #tpu.memory_space<vmem>>, vector<32x256xbf16>
    %cst = arith.constant dense<0.000000e+00> : vector<512x256xf32>
    %3 = tpu.matmul %1, %2, %cst {dimension_numbers = #tpu.dot_dimension_numbers<[1], [0], [0], [1], [0, 0, 1, 1], [], []>} : vector<512x32xbf16>, vector<32x256xbf16>, vector<512x256xf32> -> vector<512x256xf32>
    %c0_3 = arith.constant 0 : index
    %c0_4 = arith.constant 0 : index
    %4 = vector.load %arg3[%c0_3, %c0_4] : memref<1x256xf32, #tpu.memory_space<vmem>>, vector<1x256xf32>
    %5 = vector.broadcast %4 : vector<1x256xf32> to vector<512x256xf32>
    %6 = arith.addf %3, %5 : vector<512x256xf32>
    %cst_5 = arith.constant 0.000000e+00 : f32
    %7 = vector.broadcast %cst_5 : f32 to vector<512x256xf32>
    %8 = arith.maximumf %6, %7 : vector<512x256xf32>
    %9 = arith.truncf %8 : vector<512x256xf32> to vector<512x256xbf16>
    %c0_6 = arith.constant 0 : index
    %c0_7 = arith.constant 0 : index
    %10 = vector.load %arg4[%c0_6, %c0_7] : memref<256x256xbf16, #tpu.memory_space<vmem>>, vector<256x256xbf16>
    %cst_8 = arith.constant dense<0.000000e+00> : vector<512x256xf32>
    %11 = tpu.matmul %9, %10, %cst_8 {dimension_numbers = #tpu.dot_dimension_numbers<[1], [0], [0], [1], [0, 0, 1, 1], [], []>} : vector<512x256xbf16>, vector<256x256xbf16>, vector<512x256xf32> -> vector<512x256xf32>
    %c0_9 = arith.constant 0 : index
    %c0_10 = arith.constant 0 : index
    %12 = vector.load %arg5[%c0_9, %c0_10] : memref<1x256xf32, #tpu.memory_space<vmem>>, vector<1x256xf32>
    %13 = vector.broadcast %12 : vector<1x256xf32> to vector<512x256xf32>
    %14 = arith.addf %11, %13 : vector<512x256xf32>
    %cst_11 = arith.constant 0.000000e+00 : f32
    %15 = vector.broadcast %cst_11 : f32 to vector<512x256xf32>
    %16 = arith.maximumf %14, %15 : vector<512x256xf32>
    %17 = arith.truncf %16 : vector<512x256xf32> to vector<512x256xbf16>
    %c0_12 = arith.constant 0 : index
    %c0_13 = arith.constant 0 : index
    %18 = vector.load %arg6[%c0_12, %c0_13] : memref<256x128xbf16, #tpu.memory_space<vmem>>, vector<256x128xbf16>
    %cst_14 = arith.constant dense<0.000000e+00> : vector<512x128xf32>
    %19 = tpu.matmul %17, %18, %cst_14 {dimension_numbers = #tpu.dot_dimension_numbers<[1], [0], [0], [1], [0, 0, 1, 1], [], []>} : vector<512x256xbf16>, vector<256x128xbf16>, vector<512x128xf32> -> vector<512x128xf32>
    %c0_15 = arith.constant 0 : index
    %c0_16 = arith.constant 0 : index
    %20 = vector.load %arg7[%c0_15, %c0_16] : memref<1x128xf32, #tpu.memory_space<vmem>>, vector<1x128xf32>
    %21 = vector.broadcast %20 : vector<1x128xf32> to vector<512x128xf32>
    %22 = arith.addf %19, %21 : vector<512x128xf32>
    %cst_17 = arith.constant 0.000000e+00 : f32
    %23 = vector.broadcast %cst_17 : f32 to vector<512x128xf32>
    %24 = arith.maximumf %22, %23 : vector<512x128xf32>
    %25 = arith.truncf %24 : vector<512x128xf32> to vector<512x128xbf16>
    %c0_18 = arith.constant 0 : index
    %c0_19 = arith.constant 0 : index
    %26 = vector.load %arg8[%c0_18, %c0_19] : memref<1x128xbf16, #tpu.memory_space<vmem>>, vector<1x128xbf16>
    %27 = arith.extf %26 : vector<1x128xbf16> to vector<1x128xf32>
    %28 = arith.extf %25 : vector<512x128xbf16> to vector<512x128xf32>
    %29 = vector.broadcast %27 : vector<1x128xf32> to vector<512x128xf32>
    %30 = arith.mulf %28, %29 : vector<512x128xf32>
    %cst_20 = arith.constant dense<0.000000e+00> : vector<512xf32>
    %31 = vector.multi_reduction <add>, %30, %cst_20 [1] : vector<512x128xf32> to vector<512xf32>
    %32 = vector.shape_cast %31 : vector<512xf32> to vector<512x1xf32>
    %c0_21 = arith.constant 0 : index
    %c0_22 = arith.constant 0 : index
    %33 = memref.load %arg9[%c0_21, %c0_22] : memref<1x1xf32, #tpu.memory_space<smem>>
    %34 = vector.broadcast %33 : f32 to vector<512x1xf32>
    %35 = arith.addf %32, %34 : vector<512x1xf32>
    %cst_23 = arith.constant 0.000000e+00 : f32
    %36 = vector.broadcast %cst_23 : f32 to vector<512x1xf32>
    %37 = arith.maximumf %35, %36 : vector<512x1xf32>
    %c0_24 = arith.constant 0 : index
    %c0_25 = arith.constant 0 : index
    %38 = vector.load %arg10[%c0_24, %c0_25] : memref<512x1xf32, #tpu.memory_space<vmem>>, vector<512x1xf32>
    tpu.vector_store %arg10[%c0_24, %c0_25], %37 {strides = array<i32>} : memref<512x1xf32, #tpu.memory_space<vmem>>, vector<512x1xf32>,
    return
  }
  func.func @transform_0(%arg0: i32) -> (i32, i32) {
    %c0_i32 = arith.constant 0 : i32
    %c0_i32_0 = arith.constant 0 : i32
    return %arg0, %c0_i32 : i32, i32
  }
  func.func @transform_1(%arg0: i32) -> (i32, i32) {
    %c0_i32 = arith.constant 0 : i32
    %c0_i32_0 = arith.constant 0 : i32
    %c0_i32_1 = arith.constant 0 : i32
    return %c0_i32, %c0_i32_0 : i32, i32
  }
  func.func @transform_2(%arg0: i32) -> (i32, i32) {
    %c0_i32 = arith.constant 0 : i32
    %c0_i32_0 = arith.constant 0 : i32
    %c0_i32_1 = arith.constant 0 : i32
    return %c0_i32, %c0_i32_0 : i32, i32
  }
  func.func @transform_3(%arg0: i32) -> (i32, i32) {
    %c0_i32 = arith.constant 0 : i32
    %c0_i32_0 = arith.constant 0 : i32
    %c0_i32_1 = arith.constant 0 : i32
    return %c0_i32, %c0_i32_0 : i32, i32
  }
  func.func @transform_4(%arg0: i32) -> (i32, i32) {
    %c0_i32 = arith.constant 0 : i32
    %c0_i32_0 = arith.constant 0 : i32
    %c0_i32_1 = arith.constant 0 : i32
    return %c0_i32, %c0_i32_0 : i32, i32
  }
  func.func @transform_5(%arg0: i32) -> (i32, i32) {
    %c0_i32 = arith.constant 0 : i32
    %c0_i32_0 = arith.constant 0 : i32
    %c0_i32_1 = arith.constant 0 : i32
    return %c0_i32, %c0_i32_0 : i32, i32
  }
  func.func @transform_6(%arg0: i32) -> (i32, i32) {
    %c0_i32 = arith.constant 0 : i32
    %c0_i32_0 = arith.constant 0 : i32
    %c0_i32_1 = arith.constant 0 : i32
    return %c0_i32, %c0_i32_0 : i32, i32
  }
  func.func @transform_7(%arg0: i32) -> (i32, i32) {
    %c0_i32 = arith.constant 0 : i32
    %c0_i32_0 = arith.constant 0 : i32
    %c0_i32_1 = arith.constant 0 : i32
    return %c0_i32, %c0_i32_0 : i32, i32
  }
  func.func @transform_8(%arg0: i32) -> (i32, i32) {
    %c0_i32 = arith.constant 0 : i32
    %c0_i32_0 = arith.constant 0 : i32
    %c0_i32_1 = arith.constant 0 : i32
    return %c0_i32, %c0_i32_0 : i32, i32
  }
  func.func @transform_9(%arg0: i32) -> (i32, i32) {
    %c0_i32 = arith.constant 0 : i32
    %c0_i32_0 = arith.constant 0 : i32
    return %arg0, %c0_i32 : i32, i32
  }
}

</mosaic_0001>

<bundles_post_ra>
// kernel: tpu_custom_call.1
= control target key start
LH: loop header
LB: loop body
LE: loop exit
PB: predicated region body
PF: predicated region fallthrough
CT: control target
= control target key end

     0   :  { %s3136_s11 = smov 0   ;;  %s4276_s0 = inlined_call_operand.vmem [shape: f32[1024,32], index: 0, kind: input, shape index: {}]   ;;  %s4277_s1 = inlined_call_operand.vmem [shape: bf16[32,256], index: 1, kind: input, shape index: {}]   ;;  %s4278_s2 = inlined_call_operand.vmem [shape: f32[1,256], index: 2, kind: input, shape index: {}]   ;;  %s4279_s3 = inlined_call_operand.vmem [shape: bf16[256,256], index: 3, kind: input, shape index: {}]   ;;  %s4280_s4 = inlined_call_operand.vmem [shape: f32[1,256], index: 4, kind: input, shape index: {}]   ;;  %s4281_s5 = inlined_call_operand.vmem [shape: bf16[256,128], index: 5, kind: input, shape index: {}]   ;;  %s4282_s6 = inlined_call_operand.vmem [shape: f32[1,128], index: 6, kind: input, shape index: {}]   ;;  %s4283_s7 = inlined_call_operand.vmem [shape: bf16[1,128], index: 7, kind: input, shape index: {}]   ;;  %s4284_s8 = inlined_call_operand.<no memory space> [shape: f32[1,1], index: 8, kind: input, shape index: {}]   ;;  %s4285_s9 = inlined_call_operand.vmem [shape: f32[1024,1], index: 9, kind: output, shape index: {}]  }
   0x1   :  { %14 = sst [smem:[#allocation2]] %s4284_s8 }
   0x2 LB: > { %s2894_s12 = sadd.s32 4294967295, %s3080_s11   ;;  %p2898_p0 = scmp.ge.s32.totalorder %s3080_s11, 1  ;;  %s3080_s11 = sphi %s3136_s11, %s20_s11  }
   0x3   : > { %p289_p1 = scmp.lt.s32.totalorder %s3080_s11, 3 }
   0x5   : > { %p290_p2 = pnand %p2898_p0, %p289_p1 }
   0x7   : > { %293 = sbr.rel (%p290_p2) target bundleno = 1033 (0x409), region = 56 }
   0xc   : > { %v3003_v0 = vld [vmem:[%s4277_s1 + $0x14] ss:$8 sps:$4 sm:$0xff]   ;;  %s2899_s8 = sshll.u32 %s2894_s12, 6  ;;  %v3005_v1 = vld [vmem:[%s4277_s1 + $0x10] ss:$8 sps:$4 sm:$0xff]   ;;  %v3082_v2 = vmov 0  }
   0xd   : > { %599 = vmatprep.mubr.bf16.mxu0 %v3082_v2  ;;  %p326_p3 = scmp.lt.s32.totalorder %s2899_s8, 127  ;;  %759 = vmatprep.mubr.bf16.mxu1 %v3082_v2  ;;  %v3006_v3 = vld [vmem:[%s4277_s1 + $0x4] ss:$8 sps:$4 sm:$0xff]   ;;  %v3008_v4 = vld [vmem:[%s4277_s1] ss:$8 sps:$4 sm:$0xff]   ;;  %vm470_vm0 = vcmask 261120  }
   0xe   : > { %579 = vmatprep.subr.bf16.mxu0 %v3003_v0  ;;  %2990 = vmatprep.subr.bf16.mxu1 %v3003_v0  ;;  %v3011_v5 = vld [vmem:[%s4279_s3 + $0x74] ss:$8 sps:$4 sm:$0xff]   ;;  %v3009_v14 = vld [vmem:[%s4279_s3 + $0x70] ss:$8 sps:$4 sm:$0xff]   ;;  %v3014_v16 = vld [vmem:[%s4279_s3 + $0x64] ss:$8 sps:$4 sm:$0xff]  }
   0xf   : > { %580 = vmatpush1.bf16.msra.mxu0 %v3005_v1  ;;  %s4295_s8 = smov (!%p326_p3, %s2899_s8), 127  ;;  %2992 = vmatpush1.bf16.msra.mxu1 %v3005_v1  ;;  %v3012_v17 = vld [vmem:[%s4279_s3 + $0x60] ss:$8 sps:$4 sm:$0xff]   ;;  %v3017_v22 = vld [vmem:[%s4279_s3 + $0x54] ss:$8 sps:$4 sm:$0xff]   ;;  %s2643_s17 = sld [smem:[#allocation2]] }
  0x10   : > { %581 = vmatprep.subr.bf16.mxu0 %v3006_v3  ;;  %2991 = vmatprep.subr.bf16.mxu1 %v3006_v3  ;;  %s2900_s23 = sshll.u32 %s4295_s8, 3  ;;  %v3015_v25 = vld [vmem:[%s4279_s3 + $0x50] ss:$8 sps:$4 sm:$0xff]   ;;  %v3020_v26 = vld [vmem:[%s4279_s3 + $0x44] ss:$8 sps:$4 sm:$0xff]   ;;  %vm2773_vm1 = vcmask 7168  }
  0x11   : > { %s3169_s26 = scalar_lea.vmem %s4276_s0, %s2900_s23  ;;  %v3018_v31 = vld [vmem:[%s4279_s3 + $0x40] ss:$8 sps:$4 sm:$0xff]   ;;  %v3023_v32 = vld [vmem:[%s4279_s3 + $0x34] ss:$8 sps:$4 sm:$0xff]   ;;  %v3021_v35 = vld [vmem:[%s4279_s3 + $0x30] ss:$8 sps:$4 sm:$0xff]   ;;  %s4022_s20 = scalar_lea.vmem %s4285_s9, %s2900_s23 }
  0x12   : > { %v338_v6 = vld [vmem:[%s3169_s26] sm:$0xff]  ;;  %v339_v7 = vld [vmem:[%s3169_s26 + $0x8] sm:$0xff]  ;;  %v340_v9 = vld [vmem:[%s3169_s26 + $0x10] sm:$0xff] }
  0x13   : > { %582 = vmatpush1.bf16.msra.mxu0 %v3008_v4  ;;  %2993 = vmatpush1.bf16.msra.mxu1 %v3008_v4  ;;  %v402_v8 = vpack.c.bf16 %v339_v7, %v338_v6  ;;  %v341_v10 = vld [vmem:[%s3169_s26 + $0x18] sm:$0xff]  ;;  %v370_v11 = vld [vmem:[%s3169_s26 + $0x100] sm:$0xff]  ;;  %v371_v13 = vld [vmem:[%s3169_s26 + $0x108] sm:$0xff] }
  0x14   : > { %1316 = vmatprep.subr.bf16.mxu1 %v3011_v5  ;;  %1996 = vmatprep.subr.bf16.mxu0 %v3082_v2  ;;  %v403_v12 = vpack.c.bf16 %v341_v10, %v340_v9  ;;  %v418_v15 = vpack.c.bf16 %v371_v13, %v370_v11  ;;  %v372_v18 = vld [vmem:[%s3169_s26 + $0x110] sm:$0xff]  ;;  %v373_v19 = vld [vmem:[%s3169_s26 + $0x118] sm:$0xff]  ;;  %v342_v20 = vld [vmem:[%s3169_s26 + $0x20] sm:$0xff] }
  0x15   : > { %v343_v21 = vld [vmem:[%s3169_s26 + $0x28] sm:$0xff]  ;;  %v419_v23 = vpack.c.bf16 %v373_v19, %v372_v18  ;;  %v374_v27 = vld [vmem:[%s3169_s26 + $0x120] sm:$0xff]  ;;  %v344_v29 = vld [vmem:[%s3169_s26 + $0x30] sm:$0xff] }
  0x16   : > { %2907 = vmatmul.mubr.msk.bf16.vlgmr.msra.gmra.mxu0 %vm470_vm0, %v402_v8  ;;  %2923 = vmatmul.mubr.msk.bf16.vlgmr.msra.gmra.mxu1 %vm470_vm0, %v418_v15  ;;  %v404_v24 = vpack.c.bf16 %v343_v21, %v342_v20  ;;  %v375_v28 = vld [vmem:[%s3169_s26 + $0x128] sm:$0xff]  ;;  %v345_v30 = vld [vmem:[%s3169_s26 + $0x38] sm:$0xff]  ;;  %v376_v37 = vld [vmem:[%s3169_s26 + $0x130] sm:$0xff] }
  0x17   : > { %609 = vmatprep.mubr.bf16.mxu0 %v3082_v2  ;;  %1317 = vmatpush1.bf16.msra.mxu1 %v3009_v14  ;;  %v420_v33 = vpack.c.bf16 %v375_v28, %v374_v27  ;;  %v405_v34 = vpack.c.bf16 %v345_v30, %v344_v29  ;;  %v3026_v36 = vld [vmem:[%s4279_s3 + $0x24] ss:$8 sps:$4 sm:$0xff]   ;;  %v377_v38 = vld [vmem:[%s3169_s26 + $0x138] sm:$0xff]  ;;  %v3024_v41 = vld [vmem:[%s4279_s3 + $0x20] ss:$8 sps:$4 sm:$0xff]  }
  0x18   : > { %769 = vmatprep.mubr.bf16.mxu1 %v3082_v2  ;;  %1318 = vmatprep.subr.bf16.mxu1 %v3014_v16  ;;  %v346_v39 = vld [vmem:[%s3169_s26 + $0x40] sm:$0xff]  ;;  %v347_v40 = vld [vmem:[%s3169_s26 + $0x48] sm:$0xff]  ;;  %v3029_v42 = vld [vmem:[%s4279_s3 + $0x14] ss:$8 sps:$4 sm:$0xff]   ;;  %v421_v43 = vpack.c.bf16 %v377_v38, %v376_v37 }
  0x19   : > { %v406_v44 = vpack.c.bf16 %v347_v40, %v346_v39  ;;  %v3027_v45 = vld [vmem:[%s4279_s3 + $0x10] ss:$8 sps:$4 sm:$0xff]   ;;  %v3032_v46 = vld [vmem:[%s4279_s3 + $0x4] ss:$8 sps:$4 sm:$0xff]   ;;  %v3030_v51 = vld [vmem:[%s4279_s3] ss:$8 sps:$4 sm:$0xff]  }
  0x1a   : > { %v348_v47 = vld [vmem:[%s3169_s26 + $0x50] sm:$0xff]  ;;  %v349_v48 = vld [vmem:[%s3169_s26 + $0x58] sm:$0xff]  ;;  %v378_v49 = vld [vmem:[%s3169_s26 + $0x140] sm:$0xff] }
  0x1b   : > { %1319 = vmatpush1.bf16.msra.mxu1 %v3012_v17  ;;  %v379_v50 = vld [vmem:[%s3169_s26 + $0x148] sm:$0xff]  ;;  %v3035_v52 = vld [vmem:[%s4279_s3 + $0xf4] ss:$8 sps:$4 sm:$0xff]   ;;  %v3033_v54 = vld [vmem:[%s4279_s3 + $0xf0] ss:$8 sps:$4 sm:$0xff]   ;;  %v407_v55 = vpack.c.bf16 %v349_v48, %v348_v47 }
  0x1c   : > { %1320 = vmatprep.subr.bf16.mxu1 %v3017_v22  ;;  %v422_v53 = vpack.c.bf16 %v379_v50, %v378_v49  ;;  %v3038_v56 = vld [vmem:[%s4279_s3 + $0xe4] ss:$8 sps:$4 sm:$0xff]   ;;  %v380_v57 = vld [vmem:[%s3169_s26 + $0x150] sm:$0xff]  ;;  %v381_v58 = vld [vmem:[%s3169_s26 + $0x158] sm:$0xff] }
  0x1d   : > { %v350_v59 = vld [vmem:[%s3169_s26 + $0x60] sm:$0xff]  ;;  %v351_v60 = vld [vmem:[%s3169_s26 + $0x68] sm:$0xff]  ;;  %v3041_v62 = vld [vmem:[%s4279_s3 + $0xd4] ss:$8 sps:$4 sm:$0xff]   ;;  %v423_v63 = vpack.c.bf16 %v381_v58, %v380_v57 }
  0x1e   : > { %2908 = vmatmul.mubr.msk.bf16.gmra.mxu0 %vm470_vm0, %v403_v12  ;;  %2924 = vmatmul.mubr.msk.bf16.gmra.mxu1 %vm470_vm0, %v419_v23  ;;  %v3036_v61 = vld [vmem:[%s4279_s3 + $0xe0] ss:$8 sps:$4 sm:$0xff]   ;;  %v408_v0 = vpack.c.bf16 %v351_v60, %v350_v59  ;;  %v3039_v1 = vld [vmem:[%s4279_s3 + $0xd0] ss:$8 sps:$4 sm:$0xff]   ;;  %v3044_v3 = vld [vmem:[%s4279_s3 + $0xc4] ss:$8 sps:$4 sm:$0xff]  }
  0x1f   : > { %619 = vmatprep.mubr.bf16.mxu0 %v3082_v2  ;;  %779 = vmatprep.mubr.bf16.mxu1 %v3082_v2  ;;  %v382_v4 = vld [vmem:[%s3169_s26 + $0x160] sm:$0xff]  ;;  %v383_v5 = vld [vmem:[%s3169_s26 + $0x168] sm:$0xff]  ;;  %v352_v6 = vld [vmem:[%s3169_s26 + $0x70] sm:$0xff] }
  0x20   : > { %1321 = vmatpush1.bf16.msra.mxu1 %v3015_v25  ;;  %v353_v7 = vld [vmem:[%s3169_s26 + $0x78] sm:$0xff]  ;;  %v3042_v8 = vld [vmem:[%s4279_s3 + $0xc0] ss:$8 sps:$4 sm:$0xff]   ;;  %v424_v10 = vpack.c.bf16 %v383_v5, %v382_v4  ;;  %v3050_v13 = vld [vmem:[%s4279_s3 + $0xa4] ss:$8 sps:$4 sm:$0xff]  }
  0x21   : > { %1322 = vmatprep.subr.bf16.mxu1 %v3020_v26  ;;  %v3047_v9 = vld [vmem:[%s4279_s3 + $0xb4] ss:$8 sps:$4 sm:$0xff]   ;;  %v409_v11 = vpack.c.bf16 %v353_v7, %v352_v6  ;;  %v3045_v12 = vld [vmem:[%s4279_s3 + $0xb0] ss:$8 sps:$4 sm:$0xff]   ;;  %v354_v16 = vld [vmem:[%s3169_s26 + $0x80] sm:$0xff] }
  0x22   : > { %v384_v14 = vld [vmem:[%s3169_s26 + $0x170] sm:$0xff]  ;;  %v385_v15 = vld [vmem:[%s3169_s26 + $0x178] sm:$0xff]  ;;  %v355_v17 = vld [vmem:[%s3169_s26 + $0x88] sm:$0xff] }
  0x23   : > { %v3048_v18 = vld [vmem:[%s4279_s3 + $0xa0] ss:$8 sps:$4 sm:$0xff]   ;;  %v3053_v19 = vld [vmem:[%s4279_s3 + $0x94] ss:$8 sps:$4 sm:$0xff]   ;;  %v425_v20 = vpack.c.bf16 %v385_v15, %v384_v14  ;;  %v410_v21 = vpack.c.bf16 %v355_v17, %v354_v16  ;;  %v3051_v22 = vld [vmem:[%s4279_s3 + $0x90] ss:$8 sps:$4 sm:$0xff]  }
  0x24   : > { %1323 = vmatpush1.bf16.msra.mxu1 %v3018_v31  ;;  %v386_v23 = vld [vmem:[%s3169_s26 + $0x180] sm:$0xff]  ;;  %v356_v25 = vld [vmem:[%s3169_s26 + $0x90] sm:$0xff]  ;;  %v357_v26 = vld [vmem:[%s3169_s26 + $0x98] sm:$0xff] }
  0x25   : > { %1324 = vmatprep.subr.bf16.mxu1 %v3023_v32  ;;  %v411_v28 = vpack.c.bf16 %v357_v26, %v356_v25  ;;  %v388_v29 = vld [vmem:[%s3169_s26 + $0x190] sm:$0xff]  ;;  %v389_v30 = vld [vmem:[%s3169_s26 + $0x198] sm:$0xff]  ;;  %v3056_v31 = vld [vmem:[%s4279_s3 + $0x84] ss:$8 sps:$4 sm:$0xff]  }
  0x26   : > { %2909 = vmatmul.mubr.msk.bf16.gmra.mxu0 %vm470_vm0, %v404_v24  ;;  %2925 = vmatmul.mubr.msk.bf16.gmra.mxu1 %vm470_vm0, %v420_v33  ;;  %v387_v24 = vld [vmem:[%s3169_s26 + $0x188] sm:$0xff]  ;;  %v358_v32 = vld [vmem:[%s3169_s26 + $0xa0] sm:$0xff]  ;;  %v360_v39 = vld [vmem:[%s3169_s26 + $0xb0] sm:$0xff] }
  0x27   : > { %629 = vmatprep.mubr.bf16.mxu0 %v3082_v2  ;;  %789 = vmatprep.mubr.bf16.mxu1 %v3082_v2  ;;  %v426_v27 = vpack.c.bf16 %v387_v24, %v386_v23  ;;  %v359_v33 = vld [vmem:[%s3169_s26 + $0xa8] sm:$0xff]  ;;  %v390_v37 = vld [vmem:[%s3169_s26 + $0x1a0] sm:$0xff]  ;;  %v361_v40 = vld [vmem:[%s3169_s26 + $0xb8] sm:$0xff] }
  0x28   : > { %1325 = vmatpush1.bf16.msra.mxu1 %v3021_v35  ;;  %v427_v35 = vpack.c.bf16 %v389_v30, %v388_v29  ;;  %v391_v38 = vld [vmem:[%s3169_s26 + $0x1a8] sm:$0xff]  ;;  %v394_v49 = vld [vmem:[%s3169_s26 + $0x1c0] sm:$0xff]  ;;  %v400_v4 = vld [vmem:[%s3169_s26 + $0x1f0] sm:$0xff] }
  0x29   : > { %1326 = vmatprep.subr.bf16.mxu1 %v3026_v36  ;;  %v412_v36 = vpack.c.bf16 %v359_v33, %v358_v32  ;;  %v395_v50 = vld [vmem:[%s3169_s26 + $0x1c8] sm:$0xff]  ;;  %v366_v57 = vld [vmem:[%s3169_s26 + $0xe0] sm:$0xff]  ;;  %v401_v5 = vld [vmem:[%s3169_s26 + $0x1f8] sm:$0xff] }
  0x2a   : > { %v367_v58 = vld [vmem:[%s3169_s26 + $0xe8] sm:$0xff]  ;;  %v433_v6 = vpack.c.bf16 %v401_v5, %v400_v4  ;;  %v3057_v7 = vld [vmem:[%s4281_s5 + $0x38] sm:$0xff]   ;;  %v438_v15 = vld [vmem:[%s4278_s2] sm:$0x3] }
  0x2b   : > { %v416_v60 = vpack.c.bf16 %v367_v58, %v366_v57  ;;  %1997 = vmatpush1.bf16.msra.mxu0 %v3057_v7  ;;  %v3063_v29 = vld [vmem:[%s4281_s5 + $0x8] sm:$0xff]   ;;  %v3065_v4 = vld [vmem:[%s4281_s5 + $0x78] sm:$0xff]  }
  0x2c   : > { %1327 = vmatpush1.bf16.msra.mxu1 %v3024_v41  ;;  %v428_v41 = vpack.c.bf16 %v391_v38, %v390_v37  ;;  %1998 = vmatprep.subr.bf16.mxu0 %v3082_v2 }
  0x2d   : > { %1328 = vmatprep.subr.bf16.mxu1 %v3029_v42  ;;  %v413_v42 = vpack.c.bf16 %v361_v40, %v360_v39 }
  0x2e   : > { %2910 = vmatmul.mubr.msk.bf16.gmra.mxu0 %vm470_vm0, %v405_v34  ;;  %2926 = vmatmul.mubr.msk.bf16.gmra.mxu1 %vm470_vm0, %v421_v43  ;;  %v3054_v34 = vld [vmem:[%s4279_s3 + $0x80] ss:$8 sps:$4 sm:$0xff]   ;;  %v392_v43 = vld [vmem:[%s3169_s26 + $0x1b0] sm:$0xff] }
  0x2f   : > { %639 = vmatprep.mubr.bf16.mxu0 %v3082_v2  ;;  %799 = vmatprep.mubr.bf16.mxu1 %v3082_v2 }
  0x30   : > { %1329 = vmatpush1.bf16.msra.mxu1 %v3027_v45  ;;  %v362_v45 = vld [vmem:[%s3169_s26 + $0xc0] sm:$0xff] }
  0x31   : > { %1330 = vmatprep.subr.bf16.mxu1 %v3032_v46  ;;  %v363_v46 = vld [vmem:[%s3169_s26 + $0xc8] sm:$0xff] }
  0x32   : > { %v414_v48 = vpack.c.bf16 %v363_v46, %v362_v45 }
  0x34   : > { %1331 = vmatpush1.bf16.msra.mxu1 %v3030_v51  ;;  %v364_v51 = vld [vmem:[%s3169_s26 + $0xd0] sm:$0xff] }
  0x35   : > { %1332 = vmatprep.subr.bf16.mxu1 %v3035_v52  ;;  %v365_v52 = vld [vmem:[%s3169_s26 + $0xd8] sm:$0xff] }
  0x36   : > { %2911 = vmatmul.mubr.msk.bf16.gmra.mxu0 %vm470_vm0, %v406_v44  ;;  %2927 = vmatmul.mubr.msk.bf16.gmra.mxu1 %vm470_vm0, %v422_v53  ;;  %v393_v44 = vld [vmem:[%s3169_s26 + $0x1b8] sm:$0xff]  ;;  %v430_v53 = vpack.c.bf16 %v395_v50, %v394_v49 }
  0x37   : > { %649 = vmatprep.mubr.bf16.mxu0 %v3082_v2  ;;  %809 = vmatprep.mubr.bf16.mxu1 %v3082_v2  ;;  %v429_v47 = vpack.c.bf16 %v393_v44, %v392_v43 }
  0x38   : > { %1333 = vmatpush2.bf16.msra.mxu1 %v3033_v54  ;;  %v415_v54 = vpack.c.bf16 %v365_v52, %v364_v51 }
  0x39   : > { %1334 = vmatprep.subr.bf16.mxu1 %v3038_v56  ;;  %v397_v56 = vld [vmem:[%s3169_s26 + $0x1d8] sm:$0xff] }
  0x3c   : > { %1335 = vmatpush2.bf16.msra.mxu1 %v3036_v61  ;;  %v398_v61 = vld [vmem:[%s3169_s26 + $0x1e0] sm:$0xff] }
  0x3d   : > { %1336 = vmatprep.subr.bf16.mxu1 %v3041_v62  ;;  %v399_v62 = vld [vmem:[%s3169_s26 + $0x1e8] sm:$0xff] }
  0x3e   : > { %2912 = vmatmul.mubr.msk.bf16.gmra.mxu0 %vm470_vm0, %v407_v55  ;;  %2928 = vmatmul.mubr.msk.bf16.gmra.mxu1 %vm470_vm0, %v423_v63  ;;  %v396_v55 = vld [vmem:[%s3169_s26 + $0x1d0] sm:$0xff] }
  0x3f   : > { %659 = vmatprep.mubr.bf16.mxu0 %v3082_v2  ;;  %819 = vmatprep.mubr.bf16.mxu1 %v3082_v2  ;;  %v431_v59 = vpack.c.bf16 %v397_v56, %v396_v55  ;;  %v368_v63 = vld [vmem:[%s3169_s26 + $0xf0] sm:$0xff] }
  0x40   : > { %1337 = vmatpush2.bf16.msra.mxu1 %v3039_v1  ;;  %v432_v1 = vpack.c.bf16 %v399_v62, %v398_v61 }
  0x41   : > { %1338 = vmatprep.subr.bf16.mxu1 %v3044_v3 }
  0x44   : > { %1339 = vmatpush2.bf16.msra.mxu1 %v3042_v8  ;;  %v3058_v8 = vld [vmem:[%s4281_s5 + $0x30] sm:$0xff]  }
  0x45   : > { %1340 = vmatprep.subr.bf16.mxu1 %v3047_v9  ;;  %1999 = vmatpush1.bf16.msra.mxu0 %v3058_v8  ;;  %v3059_v9 = vld [vmem:[%s4281_s5 + $0x28] sm:$0xff]  }
  0x46   : > { %2913 = vmatmul.mubr.msk.bf16.gmra.mxu0 %vm470_vm0, %v408_v0  ;;  %2929 = vmatmul.mubr.msk.bf16.gmra.mxu1 %vm470_vm0, %v424_v10  ;;  %v369_v0 = vld [vmem:[%s3169_s26 + $0xf8] sm:$0xff]  ;;  %v440_v10 = vlaneseq }
  0x47   : > { %669 = vmatprep.mubr.bf16.mxu0 %v3082_v2  ;;  %829 = vmatprep.mubr.bf16.mxu1 %v3082_v2  ;;  %v417_v3 = vpack.c.bf16 %v369_v0, %v368_v63 }
  0x48   : > { %1341 = vmatpush2.bf16.msra.mxu1 %v3045_v12  ;;  %2000 = vmatprep.subr.bf16.mxu0 %v3082_v2  ;;  %v3406_v12 = vshrl.u32 %v440_v10, 7 }
  0x49   : > { %1342 = vmatprep.subr.bf16.mxu1 %v3050_v13  ;;  %2001 = vmatpush1.bf16.msra.mxu0 %v3059_v9 }
  0x4a   : > { %2002 = vmatprep.subr.bf16.mxu0 %v3082_v2  ;;  %v4286_v13 = vsub.s32 1, %v3406_v12  ;;  %v3411_v14 = vsub.s32 0, %v3406_v12 }
  0x4c   : > { %1343 = vmatpush2.bf16.msra.mxu1 %v3048_v18  ;;  %4289 = vst [vmem:[#allocation3_spill] sm:$0xff] %v3411_v14  ;;  %v3418_v17 = vrot.slane %v438_v15, %v4286_v13  ;;  %v3061_v18 = vld [vmem:[%s4281_s5 + $0x18] sm:$0xff]  }
  0x4d   : > { %1344 = vmatprep.subr.bf16.mxu1 %v3053_v19  ;;  %v3424_v19 = vrot.slane %v438_v15, %v3411_v14 }
  0x4e   : > { %2914 = vmatmul.mubr.msk.bf16.gmra.mxu0 %vm470_vm0, %v409_v11  ;;  %2930 = vmatmul.mubr.msk.bf16.gmra.mxu1 %vm470_vm0, %v425_v20  ;;  %v3060_v11 = vld [vmem:[%s4281_s5 + $0x20] sm:$0xff]  }
  0x4f   : > { %679 = vmatprep.mubr.bf16.mxu0 %v3082_v2  ;;  %839 = vmatprep.mubr.bf16.mxu1 %v3082_v2 }
  0x50   : > { %1345 = vmatpush2.bf16.msra.mxu1 %v3051_v22  ;;  %2003 = vmatpush1.bf16.msra.mxu0 %v3060_v11 }
  0x51   : > { %1346 = vmatprep.subr.bf16.mxu1 %v3056_v31  ;;  %2004 = vmatprep.subr.bf16.mxu0 %v3082_v2 }
  0x54   : > { %1347 = vmatpush2.bf16.msra.mxu1 %v3054_v34  ;;  %2005 = vmatpush1.bf16.msra.mxu0 %v3061_v18 }
  0x55   : > { %2006 = vmatprep.subr.bf16.mxu0 %v3082_v2 }
  0x56   : > { %2915 = vmatmul.mubr.msk.bf16.gmra.mxu0 %vm470_vm0, %v410_v21  ;;  %2931 = vmatmul.mubr.msk.bf16.gmra.mxu1 %vm470_vm0, %v426_v27  ;;  %v3062_v21 = vld [vmem:[%s4281_s5 + $0x10] sm:$0xff]  }
  0x57   : > { %689 = vmatprep.mubr.bf16.mxu0 %v3082_v2  ;;  %849 = vmatprep.mubr.bf16.mxu1 %v3082_v2 }
  0x58   : > { %2007 = vmatpush1.bf16.msra.mxu0 %v3062_v21 }
  0x59   : > { %2008 = vmatprep.subr.bf16.mxu0 %v3082_v2 }
  0x5c   : > { %2009 = vmatpush1.bf16.msra.mxu0 %v3063_v29  ;;  %v3066_v29 = vld [vmem:[%s4281_s5 + $0x70] sm:$0xff]  }
  0x5d   : > { %2010 = vmatprep.subr.bf16.mxu0 %v3082_v2 }
  0x5e   : > { %2916 = vmatmul.mubr.msk.bf16.gmra.mxu0 %vm470_vm0, %v411_v28  ;;  %2932 = vmatmul.mubr.msk.bf16.gmra.mxu1 %vm470_vm0, %v427_v35 }
  0x5f   : > { %699 = vmatprep.mubr.bf16.mxu0 %v3082_v2  ;;  %859 = vmatprep.mubr.bf16.mxu1 %v3082_v2 }
  0x66   : > { %2917 = vmatmul.mubr.msk.bf16.gmra.mxu0 %vm470_vm0, %v412_v36  ;;  %2933 = vmatmul.mubr.msk.bf16.gmra.mxu1 %vm470_vm0, %v428_v41 }
  0x67   : > { %709 = vmatprep.mubr.bf16.mxu0 %v3082_v2  ;;  %869 = vmatprep.mubr.bf16.mxu1 %v3082_v2 }
  0x6e   : > { %2918 = vmatmul.mubr.msk.bf16.gmra.mxu0 %vm470_vm0, %v413_v42  ;;  %2934 = vmatmul.mubr.msk.bf16.gmra.mxu1 %vm470_vm0, %v429_v47 }
  0x6f   : > { %719 = vmatprep.mubr.bf16.mxu0 %v3082_v2  ;;  %879 = vmatprep.mubr.bf16.mxu1 %v3082_v2 }
  0x76   : > { %2919 = vmatmul.mubr.msk.bf16.gmra.mxu0 %vm470_vm0, %v414_v48  ;;  %2935 = vmatmul.mubr.msk.bf16.gmra.mxu1 %vm470_vm0, %v430_v53  ;;  %v3064_v48 = vld [vmem:[%s4281_s5] sm:$0xff]  }
  0x77   : > { %729 = vmatprep.mubr.bf16.mxu0 %v3082_v2  ;;  %889 = vmatprep.mubr.bf16.mxu1 %v3082_v2 }
  0x78   : > { %2011 = vmatpush1.bf16.msra.mxu0 %v3064_v48 }
  0x79   : > { %2012 = vmatprep.subr.bf16.mxu0 %v3082_v2 }
  0x7c   : > { %2013 = vmatpush2.bf16.msra.mxu0 %v3065_v4 }
  0x7d   : > { %2014 = vmatprep.subr.bf16.mxu0 %v3082_v2 }
  0x7e   : > { %2920 = vmatmul.mubr.msk.bf16.gmra.mxu0 %vm470_vm0, %v415_v54  ;;  %2936 = vmatmul.mubr.msk.bf16.gmra.mxu1 %vm470_vm0, %v431_v59 }
  0x7f   : > { %739 = vmatprep.mubr.bf16.mxu0 %v3082_v2  ;;  %899 = vmatprep.mubr.bf16.mxu1 %v3082_v2 }
  0x80   : > { %2015 = vmatpush2.bf16.msra.mxu0 %v3066_v29 }
  0x81   : > { %2016 = vmatprep.subr.bf16.mxu0 %v3082_v2 }
  0x86   : > { %2921 = vmatmul.mubr.msk.bf16.gmra.mxu0 %vm470_vm0, %v416_v60  ;;  %2937 = vmatmul.mubr.msk.bf16.gmra.mxu1 %vm470_vm0, %v432_v1 }
  0x87   : > { %749 = vmatprep.mubr.bf16.mxu0 %v3082_v2  ;;  %909 = vmatprep.mubr.bf16.mxu1 %v3082_v2 }
  0x8e   : > { %2922 = vmatmul.mubr.msk.bf16.gmra.mxu0 %vm470_vm0, %v417_v3  ;;  %2938 = vmatmul.mubr.msk.bf16.gmra.mxu1 %vm470_vm0, %v433_v6 }
  0xd6   : > { %v601_v16 = vpop.f32.mrf.mxu0  ;;  %v3434_v28 = vpop.f32.mrf.mxu1 }
  0xd7   : > { %v602_v25 = vadd.f32 %v601_v16, %v3424_v19 }
  0xd8   : > { %v603_v20 = vpop.f32.mrf.mxu0  ;;  %v3440_v34 = vpop.f32.mrf.mxu1 }
  0xd9   : > { %v604_v23 = vadd.f32 %v603_v20, %v3418_v17  ;;  %v920_v35 = vmax.f32 %v602_v25, 0.0 }
  0xda   : > { %v605_v22 = vpop.f32.mrf.mxu0  ;;  %v3442_v38 = vpop.f32.mrf.mxu1 }
  0xdb   : > { %v606_v24 = vadd.f32 %v605_v22, %v3424_v19  ;;  %v921_v32 = vmax.f32 %v604_v23, 0.0 }
  0xdc   : > { %v607_v26 = vpop.f32.mrf.mxu0  ;;  %v3447_v43 = vpop.f32.mrf.mxu1 }
  0xdd   : > { %v608_v27 = vadd.f32 %v607_v26, %v3418_v17  ;;  %v922_v30 = vmax.f32 %v606_v24, 0.0 }
  0xde   : > { %v611_v31 = vpop.f32.mrf.mxu0  ;;  %v3451_v47 = vpop.f32.mrf.mxu1 }
  0xdf   : > { %v923_v33 = vmax.f32 %v608_v27, 0.0  ;;  %v1048_v39 = vpack.c.bf16 %v922_v30, %v920_v35  ;;  %v612_v44 = vadd.f32 %v611_v31, %v3424_v19 }
  0xe0   : > { %v613_v36 = vpop.f32.mrf.mxu0  ;;  %v3456_v53 = vpop.f32.mrf.mxu1 }
  0xe1   : > { %v1049_v37 = vpack.c.bf16 %v923_v33, %v921_v32  ;;  %v614_v41 = vadd.f32 %v613_v36, %v3418_v17  ;;  %v924_v54 = vmax.f32 %v612_v44, 0.0 }
  0xe2   : > { %v615_v40 = vpop.f32.mrf.mxu0  ;;  %v3459_v57 = vpop.f32.mrf.mxu1 }
  0xe3   : > { %v616_v42 = vadd.f32 %v615_v40, %v3424_v19  ;;  %1348 = vmatprep.mubr.bf16.mxu1 %v1049_v37  ;;  %v925_v51 = vmax.f32 %v614_v41, 0.0 }
  0xe4   : > { %v617_v45 = vpop.f32.mrf.mxu0  ;;  %1349 = vmatmul.mubr.bf16.vlgmr.msra.gmra.mxu1 %v1048_v39  ;;  %v3463_v62 = vpop.f32.mrf.mxu1 }
  0xe5   : > { %v618_v46 = vadd.f32 %v617_v45, %v3418_v17  ;;  %v926_v49 = vmax.f32 %v616_v42, 0.0 }
  0xe6   : > { %v621_v50 = vpop.f32.mrf.mxu0  ;;  %v3467_v3 = vpop.f32.mrf.mxu1 }
  0xe7   : > { %v927_v52 = vmax.f32 %v618_v46, 0.0  ;;  %v1050_v58 = vpack.c.bf16 %v926_v49, %v924_v54  ;;  %v622_v63 = vadd.f32 %v621_v50, %v3424_v19 }
  0xe8   : > { %v623_v55 = vpop.f32.mrf.mxu0  ;;  %v3472_v9 = vpop.f32.mrf.mxu1 }
  0xe9   : > { %v1051_v56 = vpack.c.bf16 %v927_v52, %v925_v51  ;;  %v624_v60 = vadd.f32 %v623_v55, %v3418_v17  ;;  %v928_v10 = vmax.f32 %v622_v63, 0.0  ;;  %v3067_v52 = vld [vmem:[%s4281_s5 + $0x68] sm:$0xff]  }
  0xea   : > { %v625_v59 = vpop.f32.mrf.mxu0  ;;  %v3475_v16 = vpop.f32.mrf.mxu1  ;;  %2017 = vmatpush2.bf16.msra.mxu0 %v3067_v52 }
  0xeb   : > { %v626_v61 = vadd.f32 %v625_v59, %v3424_v19  ;;  %1358 = vmatprep.mubr.bf16.mxu1 %v1051_v56  ;;  %v929_v7 = vmax.f32 %v624_v60, 0.0  ;;  %2018 = vmatprep.subr.bf16.mxu0 %v3082_v2 }
  0xec   : > { %v627_v0 = vpop.f32.mrf.mxu0  ;;  %1359 = vmatmul.mubr.bf16.gmra.mxu1 %v1050_v58  ;;  %v3479_v23 = vpop.f32.mrf.mxu1 }
  0xed   : > { %v628_v1 = vadd.f32 %v627_v0, %v3418_v17  ;;  %v930_v5 = vmax.f32 %v626_v61, 0.0 }
  0xee   : > { %v631_v6 = vpop.f32.mrf.mxu0  ;;  %v3483_v27 = vpop.f32.mrf.mxu1 }
  0xef   : > { %v931_v8 = vmax.f32 %v628_v1, 0.0  ;;  %v1052_v18 = vpack.c.bf16 %v930_v5, %v928_v10  ;;  %v632_v24 = vadd.f32 %v631_v6, %v3424_v19 }
  0xf0   : > { %v633_v11 = vpop.f32.mrf.mxu0  ;;  %v3488_v35 = vpop.f32.mrf.mxu1 }
  0xf1   : > { %v1053_v15 = vpack.c.bf16 %v931_v8, %v929_v7  ;;  %v634_v21 = vadd.f32 %v633_v11, %v3418_v17  ;;  %v932_v36 = vmax.f32 %v632_v24, 0.0 }
  0xf2   : > { %v635_v20 = vpop.f32.mrf.mxu0  ;;  %v3491_v40 = vpop.f32.mrf.mxu1 }
  0xf3   : > { %v636_v22 = vadd.f32 %v635_v20, %v3424_v19  ;;  %1368 = vmatprep.mubr.bf16.mxu1 %v1053_v15  ;;  %v933_v32 = vmax.f32 %v634_v21, 0.0 }
  0xf4   : > { %v637_v25 = vpop.f32.mrf.mxu0  ;;  %1369 = vmatmul.mubr.bf16.gmra.mxu1 %v1052_v18  ;;  %v3495_v46 = vpop.f32.mrf.mxu1  ;;  %v3068_v18 = vld [vmem:[%s4281_s5 + $0x60] sm:$0xff]  }
  0xf5   : > { %v638_v26 = vadd.f32 %v637_v25, %v3418_v17  ;;  %v934_v30 = vmax.f32 %v636_v22, 0.0  ;;  %2019 = vmatpush2.bf16.msra.mxu0 %v3068_v18  ;;  %v3070_v18 = vld [vmem:[%s4281_s5 + $0x50] sm:$0xff]  }
  0xf6   : > { %v641_v31 = vpop.f32.mrf.mxu0  ;;  %v3499_v51 = vpop.f32.mrf.mxu1  ;;  %2020 = vmatprep.subr.bf16.mxu0 %v3082_v2 }
  0xf7   : > { %v935_v33 = vmax.f32 %v638_v26, 0.0  ;;  %v1054_v41 = vpack.c.bf16 %v934_v30, %v932_v36  ;;  %v642_v48 = vadd.f32 %v641_v31, %v3424_v19 }
  0xf8   : > { %v643_v37 = vpop.f32.mrf.mxu0  ;;  %v3504_v59 = vpop.f32.mrf.mxu1 }
  0xf9   : > { %v1055_v39 = vpack.c.bf16 %v935_v33, %v933_v32  ;;  %v644_v44 = vadd.f32 %v643_v37, %v3418_v17  ;;  %v936_v60 = vmax.f32 %v642_v48, 0.0  ;;  %v3069_v48 = vld [vmem:[%s4281_s5 + $0x58] sm:$0xff]  }
  0xfa   : > { %v645_v42 = vpop.f32.mrf.mxu0  ;;  %v3507_v0 = vpop.f32.mrf.mxu1  ;;  %2021 = vmatpush2.bf16.msra.mxu0 %v3069_v48 }
  0xfb   : > { %v646_v45 = vadd.f32 %v645_v42, %v3424_v19  ;;  %1378 = vmatprep.mubr.bf16.mxu1 %v1055_v39  ;;  %v937_v56 = vmax.f32 %v644_v44, 0.0  ;;  %2022 = vmatprep.subr.bf16.mxu0 %v3082_v2 }
  0xfc   : > { %v647_v49 = vpop.f32.mrf.mxu0  ;;  %1379 = vmatmul.mubr.bf16.gmra.mxu1 %v1054_v41  ;;  %v3511_v7 = vpop.f32.mrf.mxu1 }
  0xfd   : > { %v648_v50 = vadd.f32 %v647_v49, %v3418_v17  ;;  %v938_v54 = vmax.f32 %v646_v45, 0.0 }
  0xfe   : > { %v651_v55 = vpop.f32.mrf.mxu0  ;;  %v3515_v15 = vpop.f32.mrf.mxu1  ;;  %2023 = vmatpush2.bf16.msra.mxu0 %v3070_v18 }
  0xff   : > { %v939_v58 = vmax.f32 %v648_v50, 0.0  ;;  %v1056_v1 = vpack.c.bf16 %v938_v54, %v936_v60  ;;  %v652_v8 = vadd.f32 %v651_v55, %v3424_v19  ;;  %2024 = vmatprep.subr.bf16.mxu0 %v3082_v2 }
 0x100   : > { %v653_v61 = vpop.f32.mrf.mxu0  ;;  %v3520_v25 = vpop.f32.mrf.mxu1 }
 0x101   : > { %v1057_v63 = vpack.c.bf16 %v939_v58, %v937_v56  ;;  %v654_v5 = vadd.f32 %v653_v61, %v3418_v17  ;;  %v940_v26 = vmax.f32 %v652_v8, 0.0 }
 0x102   : > { %v655_v4 = vpop.f32.mrf.mxu0  ;;  %v3523_v31 = vpop.f32.mrf.mxu1 }
 0x103   : > { %v656_v6 = vadd.f32 %v655_v4, %v3424_v19  ;;  %1388 = vmatprep.mubr.bf16.mxu1 %v1057_v63  ;;  %v941_v22 = vmax.f32 %v654_v5, 0.0 }
 0x104   : > { %v657_v10 = vpop.f32.mrf.mxu0  ;;  %1389 = vmatmul.mubr.bf16.gmra.mxu1 %v1056_v1  ;;  %v3527_v39 = vpop.f32.mrf.mxu1 }
 0x105   : > { %v658_v11 = vadd.f32 %v657_v10, %v3418_v17  ;;  %v942_v20 = vmax.f32 %v656_v6, 0.0 }
 0x106   : > { %v661_v21 = vpop.f32.mrf.mxu0  ;;  %v3531_v45 = vpop.f32.mrf.mxu1 }
 0x107   : > { %v943_v24 = vmax.f32 %v658_v11, 0.0  ;;  %v1058_v32 = vpack.c.bf16 %v942_v20, %v940_v26  ;;  %v662_v41 = vadd.f32 %v661_v21, %v3424_v19 }
 0x108   : > { %v663_v29 = vpop.f32.mrf.mxu0  ;;  %v3536_v55 = vpop.f32.mrf.mxu1 }
 0x109   : > { %v1059_v30 = vpack.c.bf16 %v943_v24, %v941_v22  ;;  %v664_v36 = vadd.f32 %v663_v29, %v3418_v17  ;;  %v944_v56 = vmax.f32 %v662_v41, 0.0 }
 0x10a   : > { %v665_v33 = vpop.f32.mrf.mxu0  ;;  %v3539_v61 = vpop.f32.mrf.mxu1 }
 0x10b   : > { %v666_v37 = vadd.f32 %v665_v33, %v3424_v19  ;;  %1398 = vmatprep.mubr.bf16.mxu1 %v1059_v30  ;;  %v945_v52 = vmax.f32 %v664_v36, 0.0 }
 0x10c   : > { %v667_v42 = vpop.f32.mrf.mxu0  ;;  %1399 = vmatmul.mubr.bf16.gmra.mxu1 %v1058_v32  ;;  %v3543_v6 = vpop.f32.mrf.mxu1 }
 0x10d   : > { %v668_v44 = vadd.f32 %v667_v42, %v3418_v17  ;;  %v946_v49 = vmax.f32 %v666_v37, 0.0 }
 0x10e   : > { %v671_v50 = vpop.f32.mrf.mxu0  ;;  %v3550_v22 = vpop.f32.mrf.mxu1 }
 0x10f   : > { %v947_v54 = vmax.f32 %v668_v44, 0.0  ;;  %v1060_v63 = vpack.c.bf16 %v946_v49, %v944_v56  ;;  %v672_v8 = vadd.f32 %v671_v50, %v3424_v19  ;;  %v3071_v50 = vld [vmem:[%s4281_s5 + $0x48] sm:$0xff]  }
 0x110   : > { %v673_v58 = vpop.f32.mrf.mxu0  ;;  %v3553_v37 = vpop.f32.mrf.mxu1  ;;  %2025 = vmatpush2.bf16.msra.mxu0 %v3071_v50 }
 0x111   : > { %v1061_v60 = vpack.c.bf16 %v947_v54, %v945_v52  ;;  %v674_v4 = vadd.f32 %v673_v58, %v3418_v17  ;;  %v948_v29 = vmax.f32 %v672_v8, 0.0  ;;  %2026 = vmatprep.subr.bf16.mxu0 %v3082_v2 }
 0x112   : > { %v675_v1 = vpop.f32.mrf.mxu0  ;;  %v3562_v56 = vpop.f32.mrf.mxu1 }
 0x113   : > { %v676_v5 = vadd.f32 %v675_v1, %v3424_v19  ;;  %1408 = vmatprep.mubr.bf16.mxu1 %v1061_v60  ;;  %v949_v24 = vmax.f32 %v674_v4, 0.0 }
 0x114   : > { %v677_v10 = vpop.f32.mrf.mxu0  ;;  %1409 = vmatmul.mubr.bf16.gmra.mxu1 %v1060_v63 }
 0x115   : > { %v678_v11 = vadd.f32 %v677_v10, %v3418_v17  ;;  %v950_v20 = vmax.f32 %v676_v5, 0.0  ;;  %v3565_v10 = vpop.f32.mrf.mxu1 }
 0x116   : > { %v681_v21 = vpop.f32.mrf.mxu0 }
 0x117   : > { %v951_v26 = vmax.f32 %v678_v11, 0.0  ;;  %v1062_v33 = vpack.c.bf16 %v950_v20, %v948_v29  ;;  %v682_v44 = vadd.f32 %v681_v21, %v3424_v19 }
 0x118   : > { %v683_v30 = vpop.f32.mrf.mxu0 }
 0x119   : > { %v1063_v32 = vpack.c.bf16 %v951_v26, %v949_v24  ;;  %v684_v41 = vadd.f32 %v683_v30, %v3418_v17  ;;  %v952_v63 = vmax.f32 %v682_v44, 0.0  ;;  %v3571_v30 = vpop.f32.mrf.mxu1 }
 0x11a   : > { %v685_v36 = vpop.f32.mrf.mxu0 }
 0x11b   : > { %v686_v42 = vadd.f32 %v685_v36, %v3424_v19  ;;  %1418 = vmatprep.mubr.bf16.mxu1 %v1063_v32  ;;  %v953_v58 = vmax.f32 %v684_v41, 0.0 }
 0x11c   : > { %v687_v48 = vpop.f32.mrf.mxu0  ;;  %1419 = vmatmul.mubr.bf16.gmra.mxu1 %v1062_v33 }
 0x11d   : > { %v688_v49 = vadd.f32 %v687_v48, %v3418_v17  ;;  %v954_v52 = vmax.f32 %v686_v42, 0.0  ;;  %v3573_v48 = vpop.f32.mrf.mxu1 }
 0x11e   : > { %v691_v54 = vpop.f32.mrf.mxu0 }
 0x11f   : > { %v955_v60 = vmax.f32 %v688_v49, 0.0  ;;  %v1064_v5 = vpack.c.bf16 %v954_v52, %v952_v63  ;;  %v692_v20 = vadd.f32 %v691_v54, %v3424_v19 }
 0x120   : > { %v693_v1 = vpop.f32.mrf.mxu0 }
 0x121   : > { %v1065_v4 = vpack.c.bf16 %v955_v60, %v953_v58  ;;  %v694_v11 = vadd.f32 %v693_v1, %v3418_v17  ;;  %v956_v33 = vmax.f32 %v692_v20, 0.0  ;;  %v3072_v60 = vld [vmem:[%s4281_s5 + $0x40] sm:$0xff]  }
 0x122   : > { %v695_v8 = vpop.f32.mrf.mxu0  ;;  %2027 = vmatpush2.bf16.msra.mxu0 %v3072_v60 }
 0x123   : > { %v696_v18 = vadd.f32 %v695_v8, %v3424_v19  ;;  %1428 = vmatprep.mubr.bf16.mxu1 %v1065_v4  ;;  %v957_v2 = vmax.f32 %v694_v11, 0.0  ;;  %v3582_v4 = vpop.f32.mrf.mxu1 }
 0x124   : > { %v697_v21 = vpop.f32.mrf.mxu0  ;;  %1429 = vmatmul.mubr.bf16.gmra.mxu1 %v1064_v5 }
 0x125   : > { %v698_v24 = vadd.f32 %v697_v21, %v3418_v17  ;;  %v958_v26 = vmax.f32 %v696_v18, 0.0 }
 0x126   : > { %v701_v29 = vpop.f32.mrf.mxu0 }
 0x127   : > { %v959_v32 = vmax.f32 %v698_v24, 0.0  ;;  %v1066_v42 = vpack.c.bf16 %v958_v26, %v956_v33  ;;  %v702_v52 = vadd.f32 %v701_v29, %v3424_v19  ;;  %v3584_v26 = vpop.f32.mrf.mxu1 }
 0x128   : > { %v703_v36 = vpop.f32.mrf.mxu0 }
 0x129   : > { %v1067_v41 = vpack.c.bf16 %v959_v32, %v957_v2  ;;  %v704_v49 = vadd.f32 %v703_v36, %v3418_v17  ;;  %v960_v11 = vmax.f32 %v702_v52, 0.0 }
 0x12a   : > { %v705_v44 = vpop.f32.mrf.mxu0 }
 0x12b   : > { %v706_v50 = vadd.f32 %v705_v44, %v3424_v19  ;;  %1438 = vmatprep.mubr.bf16.mxu1 %v1067_v41  ;;  %v961_v5 = vmax.f32 %v704_v49, 0.0  ;;  %v3590_v44 = vpop.f32.mrf.mxu1 }
 0x12c   : > { %v707_v54 = vpop.f32.mrf.mxu0  ;;  %1439 = vmatmul.mubr.bf16.gmra.mxu1 %v1066_v42 }
 0x12d   : > { %v708_v58 = vadd.f32 %v707_v54, %v3418_v17  ;;  %v962_v63 = vmax.f32 %v706_v50, 0.0 }
 0x12e   : > { %v711_v1 = vpop.f32.mrf.mxu0 }
 0x12f   : > { %v963_v8 = vmax.f32 %v708_v58, 0.0  ;;  %v1068_v21 = vpack.c.bf16 %v962_v63, %v960_v11  ;;  %v712_v32 = vadd.f32 %v711_v1, %v3424_v19 }
 0x130   : > { %v713_v18 = vpop.f32.mrf.mxu0 }
 0x131   : > { %v1069_v20 = vpack.c.bf16 %v963_v8, %v961_v5  ;;  %v714_v29 = vadd.f32 %v713_v18, %v3418_v17  ;;  %v964_v52 = vmax.f32 %v712_v32, 0.0  ;;  %v3592_v5 = vpop.f32.mrf.mxu1 }
 0x132   : > { %v715_v24 = vpop.f32.mrf.mxu0 }
 0x133   : > { %v716_v2 = vadd.f32 %v715_v24, %v3424_v19  ;;  %1448 = vmatprep.mubr.bf16.mxu1 %v1069_v20  ;;  %v965_v49 = vmax.f32 %v714_v29, 0.0  ;;  %v3598_v29 = vpop.f32.mrf.mxu1 }
 0x134   : > { %v717_v33 = vpop.f32.mrf.mxu0  ;;  %1449 = vmatmul.mubr.bf16.gmra.mxu1 %v1068_v21 }
 0x135   : > { %v718_v36 = vadd.f32 %v717_v33, %v3418_v17  ;;  %v966_v41 = vmax.f32 %v716_v2, 0.0 }
 0x136   : > { %v721_v42 = vpop.f32.mrf.mxu0 }
 0x137   : > { %v967_v50 = vmax.f32 %v718_v36, 0.0  ;;  %v1070_v60 = vpack.c.bf16 %v966_v41, %v964_v52  ;;  %v722_v11 = vadd.f32 %v721_v42, %v3424_v19  ;;  %v3600_v52 = vpop.f32.mrf.mxu1 }
 0x138   : > { %v723_v54 = vpop.f32.mrf.mxu0 }
 0x139   : > { %v1071_v58 = vpack.c.bf16 %v967_v50, %v965_v49  ;;  %v724_v8 = vadd.f32 %v723_v54, %v3418_v17  ;;  %v968_v33 = vmax.f32 %v722_v11, 0.0  ;;  %v3606_v11 = vpop.f32.mrf.mxu1 }
 0x13a   : > { %v725_v63 = vpop.f32.mrf.mxu0  ;;  %4290 = vst [vmem:[#allocation4_spill] sm:$0xff] %v3606_v11 }
 0x13b   : > { %v726_v1 = vadd.f32 %v725_v63, %v3424_v19  ;;  %1458 = vmatprep.mubr.bf16.mxu1 %v1071_v58  ;;  %v969_v2 = vmax.f32 %v724_v8, 0.0  ;;  %v3608_v13 = vpop.f32.mrf.mxu1 }
 0x13c   : > { %v727_v18 = vpop.f32.mrf.mxu0  ;;  %1459 = vmatmul.mubr.bf16.gmra.mxu1 %v1070_v60 }
 0x13d   : > { %v728_v20 = vadd.f32 %v727_v18, %v3418_v17  ;;  %v970_v21 = vmax.f32 %v726_v1, 0.0 }
 0x13e   : > { %v731_v24 = vpop.f32.mrf.mxu0 }
 0x13f   : > { %v971_v32 = vmax.f32 %v728_v20, 0.0  ;;  %v1072_v49 = vpack.c.bf16 %v970_v21, %v968_v33  ;;  %v732_v58 = vadd.f32 %v731_v24, %v3424_v19 }
 0x140   : > { %v733_v36 = vpop.f32.mrf.mxu0 }
 0x141   : > { %v1073_v41 = vpack.c.bf16 %v971_v32, %v969_v2  ;;  %v734_v54 = vadd.f32 %v733_v36, %v3418_v17  ;;  %v972_v21 = vmax.f32 %v732_v58, 0.0  ;;  %v3614_v58 = vpop.f32.mrf.mxu1 }
 0x142   : > { %v735_v50 = vpop.f32.mrf.mxu0 }
 0x143   : > { %v736_v42 = vadd.f32 %v735_v50, %v3424_v19  ;;  %1468 = vmatprep.mubr.bf16.mxu1 %v1073_v41  ;;  %v973_v18 = vmax.f32 %v734_v54, 0.0  ;;  %v3616_v14 = vpop.f32.mrf.mxu1 }
 0x144   : > { %v737_v60 = vpop.f32.mrf.mxu0  ;;  %1469 = vmatmul.mubr.bf16.gmra.mxu1 %v1072_v49 }
 0x145   : > { %v738_v63 = vadd.f32 %v737_v60, %v3418_v17  ;;  %v974_v8 = vmax.f32 %v736_v42, 0.0 }
 0x146   : > { %v741_v1 = vpop.f32.mrf.mxu0 }
 0x147   : > { %v975_v20 = vmax.f32 %v738_v63, 0.0  ;;  %v1074_v33 = vpack.c.bf16 %v974_v8, %v972_v21  ;;  %v742_v49 = vadd.f32 %v741_v1, %v3424_v19  ;;  %v764_v1 = vadd.f32 %v3440_v34, %v3418_v17 }
 0x148   : > { %v743_v2 = vpop.f32.mrf.mxu0 }
 0x149   : > { %v1075_v32 = vpack.c.bf16 %v975_v20, %v973_v18  ;;  %v744_v41 = vadd.f32 %v743_v2, %v3418_v17  ;;  %v976_v18 = vmax.f32 %v742_v49, 0.0 }
 0x14a   : > { %v745_v36 = vpop.f32.mrf.mxu0 }
 0x14b   : > { %v746_v24 = vadd.f32 %v745_v36, %v3424_v19  ;;  %1478 = vmatprep.mubr.bf16.mxu1 %v1075_v32  ;;  %v977_v63 = vmax.f32 %v744_v41, 0.0  ;;  %v768_v32 = vadd.f32 %v3447_v43, %v3418_v17 }
 0x14c   : > { %v747_v50 = vpop.f32.mrf.mxu0  ;;  %1479 = vmatmul.mubr.bf16.gmra.mxu1 %v1074_v33 }
 0x14d   : > { %v748_v42 = vadd.f32 %v747_v50, %v3418_v17  ;;  %v978_v54 = vmax.f32 %v746_v24, 0.0 }
 0x14e   : > { %v751_v60 = vpop.f32.mrf.mxu0 }
 0x14f   : > { %v979_v8 = vmax.f32 %v748_v42, 0.0  ;;  %v1076_v11 = vpack.c.bf16 %v978_v54, %v976_v18  ;;  %v752_v41 = vadd.f32 %v751_v60, %v3424_v19  ;;  %v3626_v42 = vpop.f32.mrf.mxu1  ;;  %v985_v54 = vmax.f32 %v764_v1, 0.0 }
 0x150   : > { %v753_v20 = vpop.f32.mrf.mxu0  ;;  %v778_v1 = vadd.f32 %v3463_v62, %v3418_v17  ;;  %v784_v62 = vadd.f32 %v3472_v9, %v3418_v17 }
 0x151   : > { %v1077_v21 = vpack.c.bf16 %v979_v8, %v977_v63  ;;  %v754_v33 = vadd.f32 %v753_v20, %v3418_v17  ;;  %v987_v63 = vmax.f32 %v768_v32, 0.0  ;;  %v980_v18 = vmax.f32 %v752_v41, 0.0 }
 0x152   : > { %v755_v2 = vpop.f32.mrf.mxu0  ;;  %v762_v20 = vadd.f32 %v3434_v28, %v3424_v19 }
 0x153   : > { %v756_v36 = vadd.f32 %v755_v2, %v3424_v19  ;;  %1488 = vmatprep.mubr.bf16.mxu1 %v1077_v21  ;;  %v981_v34 = vmax.f32 %v754_v33, 0.0  ;;  %v766_v21 = vadd.f32 %v3442_v38, %v3424_v19  ;;  %v3632_v2 = vpop.f32.mrf.mxu1  ;;  %v1081_v32 = vpack.c.bf16 %v987_v63, %v985_v54 }
 0x154   : > { %v757_v24 = vpop.f32.mrf.mxu0  ;;  %1489 = vmatmul.mubr.bf16.gmra.mxu1 %v1076_v11  ;;  %v774_v11 = vadd.f32 %v3456_v53, %v3418_v17  ;;  %v984_v33 = vmax.f32 %v762_v20, 0.0  ;;  %v776_v53 = vadd.f32 %v3459_v57, %v3424_v19  ;;  %v788_v54 = vadd.f32 %v3479_v23, %v3418_v17 }
 0x155   : > { %v758_v49 = vadd.f32 %v757_v24, %v3418_v17  ;;  %v982_v50 = vmax.f32 %v756_v36, 0.0  ;;  %v986_v36 = vmax.f32 %v766_v21, 0.0  ;;  %v3638_v41 = vpop.f32.mrf.mxu1  ;;  %v991_v24 = vmax.f32 %v778_v1, 0.0 }
 0x156   : > { %v989_v28 = vmax.f32 %v774_v11, 0.0  ;;  %v782_v57 = vadd.f32 %v3467_v3, %v3424_v19  ;;  %v786_v21 = vadd.f32 %v3475_v16, %v3424_v19  ;;  %v794_v23 = vadd.f32 %v3488_v35, %v3418_v17 }
 0x157   : > { %v983_v8 = vmax.f32 %v758_v49, 0.0  ;;  %v1078_v60 = vpack.c.bf16 %v982_v50, %v980_v18  ;;  %v1080_v38 = vpack.c.bf16 %v986_v36, %v984_v33  ;;  %v772_v49 = vadd.f32 %v3451_v47, %v3424_v19  ;;  %v3644_v50 = vpop.f32.mrf.mxu1 }
 0x158   : > { %v1083_v63 = vpack.c.bf16 %v991_v24, %v989_v28  ;;  %v995_v47 = vmax.f32 %v788_v54, 0.0  ;;  %v992_v1 = vmax.f32 %v782_v57, 0.0  ;;  %v997_v36 = vmax.f32 %v794_v23, 0.0 }
 0x159   : > { %v1079_v43 = vpack.c.bf16 %v983_v8, %v981_v34  ;;  %v988_v34 = vmax.f32 %v772_v49, 0.0  ;;  %v990_v8 = vmax.f32 %v776_v53, 0.0  ;;  %v3650_v18 = vpop.f32.mrf.mxu1  ;;  %v792_v16 = vadd.f32 %v3483_v27, %v3424_v19 }
 0x15a   : > { %v796_v24 = vadd.f32 %v3491_v40, %v3424_v19  ;;  %v802_v40 = vadd.f32 %v3499_v51, %v3424_v19 }
 0x15b   : > { %1498 = vmatprep.mubr.bf16.mxu1 %v1079_v43  ;;  %v993_v43 = vmax.f32 %v784_v62, 0.0  ;;  %v1082_v20 = vpack.c.bf16 %v990_v8, %v988_v34  ;;  %v3656_v9 = vpop.f32.mrf.mxu1  ;;  %v996_v53 = vmax.f32 %v792_v16, 0.0  ;;  %v806_v8 = vadd.f32 %v3507_v0, %v3424_v19 }
 0x15c   : > { %1499 = vmatmul.mubr.bf16.gmra.mxu1 %v1078_v60  ;;  %v798_v60 = vadd.f32 %v3495_v46, %v3418_v17  ;;  %v804_v46 = vadd.f32 %v3504_v59, %v3418_v17  ;;  %v998_v62 = vmax.f32 %v796_v24, 0.0  ;;  %v812_v0 = vadd.f32 %v3515_v15, %v3424_v19 }
 0x15d   : > { %1508 = vmatprep.mubr.bf16.mxu1 %v1081_v32  ;;  %v1085_v11 = vpack.c.bf16 %v995_v47, %v993_v43  ;;  %v994_v32 = vmax.f32 %v786_v21, 0.0  ;;  %v3662_v33 = vpop.f32.mrf.mxu1  ;;  %v818_v43 = vadd.f32 %v3527_v39, %v3418_v17  ;;  %v1002_v57 = vmax.f32 %v806_v8, 0.0 }
 0x15e   : > { %v999_v3 = vmax.f32 %v798_v60, 0.0  ;;  %v1086_v34 = vpack.c.bf16 %v998_v62, %v996_v53  ;;  %v824_v39 = vadd.f32 %v3536_v55, %v3418_v17  ;;  %v848_v8 = vadd.f32 %v3584_v26, %v3418_v17 }
 0x15f   : > { %v1084_v28 = vpack.c.bf16 %v994_v32, %v992_v1  ;;  %v3668_v35 = vpop.f32.mrf.mxu1  ;;  %v1007_v51 = vmax.f32 %v818_v43, 0.0  ;;  %v828_v1 = vadd.f32 %v3543_v6, %v3418_v17  ;;  %v834_v6 = vadd.f32 %v3553_v37, %v3418_v17 }
 0x160   : > { %v1087_v49 = vpack.c.bf16 %v999_v3, %v997_v36  ;;  %v1004_v36 = vmax.f32 %v812_v0, 0.0  ;;  %v1009_v16 = vmax.f32 %v824_v39, 0.0  ;;  %v854_v26 = vadd.f32 %v3592_v5, %v3418_v17 }
 0x161   : > { %v3674_v54 = vpop.f32.mrf.mxu1  ;;  %v1011_v15 = vmax.f32 %v828_v1, 0.0 }
 0x163   : > { %v3680_v59 = vpop.f32.mrf.mxu1 }
 0x164   : > { %1509 = vmatmul.mubr.bf16.gmra.mxu1 %v1080_v38  ;;  %v808_v38 = vadd.f32 %v3511_v7, %v3418_v17  ;;  %v814_v7 = vadd.f32 %v3520_v25, %v3418_v17 }
 0x165   : > { %1518 = vmatprep.mubr.bf16.mxu1 %v1083_v63  ;;  %v1001_v63 = vmax.f32 %v804_v46, 0.0  ;;  %v3686_v21 = vpop.f32.mrf.mxu1  ;;  %v826_v46 = vadd.f32 %v3539_v61, %v3424_v19  ;;  %v832_v61 = vadd.f32 %v3550_v22, %v3424_v19  ;;  %v1019_v22 = vmax.f32 %v848_v8, 0.0 }
 0x166   : > { %v1003_v27 = vmax.f32 %v808_v38, 0.0  ;;  %v1005_v23 = vmax.f32 %v814_v7, 0.0  ;;  %v838_v38 = vadd.f32 %v3565_v10, %v3418_v17  ;;  %v844_v10 = vadd.f32 %v3573_v48, %v3418_v17 }
 0x167   : > { %v3692_v25 = vpop.f32.mrf.mxu1  ;;  %v1010_v62 = vmax.f32 %v826_v46, 0.0  ;;  %v1012_v43 = vmax.f32 %v832_v61, 0.0  ;;  %v4293_v61 = vld [vmem:[#allocation4_spill] sm:$0xff] }
 0x168   : > { %v1089_v47 = vpack.c.bf16 %v1003_v27, %v1001_v63  ;;  %v1091_v32 = vpack.c.bf16 %v1007_v51, %v1005_v23  ;;  %v1013_v27 = vmax.f32 %v834_v6, 0.0  ;;  %v846_v51 = vadd.f32 %v3582_v4, %v3424_v19 }
 0x169   : > { %v852_v4 = vadd.f32 %v3590_v44, %v3424_v19  ;;  %v4291_v44 = vsub.s32 1, %v3406_v12  ;;  %v866_v12 = vadd.f32 %v3614_v58, %v3424_v19 }
 0x16a   : > { %v1018_v39 = vmax.f32 %v846_v51, 0.0 }
 0x16b   : > { %v1026_v58 = vmax.f32 %v866_v12, 0.0 }
 0x16c   : > { %1519 = vmatmul.mubr.bf16.gmra.mxu1 %v1082_v20  ;;  %v1000_v20 = vmax.f32 %v802_v40, 0.0  ;;  %v836_v40 = vadd.f32 %v3562_v56, %v3424_v19  ;;  %v842_v56 = vadd.f32 %v3571_v30, %v3424_v19 }
 0x16d   : > { %1528 = vmatprep.mubr.bf16.mxu1 %v1085_v11  ;;  %v816_v11 = vadd.f32 %v3523_v31, %v3424_v19  ;;  %v822_v31 = vadd.f32 %v3531_v45, %v3424_v19  ;;  %v1015_v45 = vmax.f32 %v838_v38, 0.0  ;;  %v4292_v38 = vld [vmem:[#allocation3_spill] sm:$0xff] }
 0x16e   : > { %v1088_v60 = vpack.c.bf16 %v1002_v57, %v1000_v20  ;;  %v1017_v57 = vmax.f32 %v844_v10, 0.0 }
 0x16f   : > { %v1006_v3 = vmax.f32 %v816_v11, 0.0  ;;  %v1008_v53 = vmax.f32 %v822_v31, 0.0  ;;  %v1095_v7 = vpack.c.bf16 %v1015_v45, %v1013_v27  ;;  %v1016_v11 = vmax.f32 %v842_v56, 0.0 }
 0x170   : > { %v1097_v0 = vpack.c.bf16 %v1019_v22, %v1017_v57 }
 0x171   : > { %v1090_v24 = vpack.c.bf16 %v1006_v3, %v1004_v36  ;;  %v1096_v36 = vpack.c.bf16 %v1018_v39, %v1016_v11  ;;  %v856_v3 = vadd.f32 %v3598_v29, %v3424_v19  ;;  %v1020_v29 = vmax.f32 %v852_v4, 0.0 }
 0x173   : > { %v1022_v6 = vmax.f32 %v856_v3, 0.0  ;;  %v872_v3 = vadd.f32 %v3626_v42, %v3424_v19 }
 0x174   : > { %1529 = vmatmul.mubr.bf16.gmra.mxu1 %v1084_v28  ;;  %v3698_v28 = vpop.f32.mrf.mxu1 }
 0x175   : > { %1538 = vmatprep.mubr.bf16.mxu1 %v1087_v49  ;;  %v1093_v49 = vpack.c.bf16 %v1011_v15, %v1009_v16  ;;  %v868_v16 = vadd.f32 %v3616_v14, %v3418_v17  ;;  %v1144_v15 = vld [vmem:[%s4280_s4] sm:$0x3] }
 0x176   : > { %v3704_v55 = vpop.f32.mrf.mxu1  ;;  %v3751_v46 = vrot.slane %v1144_v15, %v4291_v44 }
 0x177   : > { %v1027_v14 = vmax.f32 %v868_v16, 0.0 }
 0x178   : > { %v3710_v63 = vpop.f32.mrf.mxu1 }
 0x17a   : > { %v3716_v37 = vpop.f32.mrf.mxu1 }
 0x17c   : > { %1539 = vmatmul.mubr.bf16.gmra.mxu1 %v1086_v34  ;;  %v1092_v34 = vpack.c.bf16 %v1010_v62, %v1008_v53  ;;  %v3722_v20 = vpop.f32.mrf.mxu1 }
 0x17d   : > { %1548 = vmatprep.mubr.bf16.mxu1 %v1089_v47  ;;  %v1014_v47 = vmax.f32 %v836_v40, 0.0  ;;  %v862_v40 = vadd.f32 %v4293_v61, %v3424_v19 }
 0x17e   : > { %v3728_v48 = vpop.f32.mrf.mxu1 }
 0x17f   : > { %v1094_v23 = vpack.c.bf16 %v1014_v47, %v1012_v43  ;;  %v878_v43 = vadd.f32 %v3644_v50, %v3418_v17 }
 0x180   : > { %v3734_v1 = vpop.f32.mrf.mxu1 }
 0x181   : > { %v1031_v39 = vmax.f32 %v878_v43, 0.0 }
 0x182   : > { %v3740_v5 = vpop.f32.mrf.mxu1 }
 0x184   : > { %1549 = vmatmul.mubr.bf16.gmra.mxu1 %v1088_v60  ;;  %v858_v60 = vadd.f32 %v3600_v52, %v3418_v17  ;;  %v864_v52 = vadd.f32 %v3608_v13, %v3418_v17 }
 0x185   : > { %1558 = vmatprep.mubr.bf16.mxu1 %v1091_v32  ;;  %v1021_v32 = vmax.f32 %v854_v26, 0.0  ;;  %v1024_v26 = vmax.f32 %v862_v40, 0.0 }
 0x186   : > { %v1023_v30 = vmax.f32 %v858_v60, 0.0  ;;  %v1025_v53 = vmax.f32 %v864_v52, 0.0  ;;  %v876_v52 = vadd.f32 %v3638_v41, %v3424_v19  ;;  %v1028_v41 = vmax.f32 %v872_v3, 0.0 }
 0x187   : > { %v1100_v4 = vpack.c.bf16 %v1026_v58, %v1024_v26  ;;  %v896_v3 = vadd.f32 %v3686_v21, %v3424_v19 }
 0x188   : > { %v1101_v57 = vpack.c.bf16 %v1027_v14, %v1025_v53  ;;  %v1030_v14 = vmax.f32 %v876_v52, 0.0 }
 0x18c   : > { %1559 = vmatmul.mubr.bf16.gmra.mxu1 %v1090_v24  ;;  %v1099_v24 = vpack.c.bf16 %v1023_v30, %v1021_v32 }
 0x18d   : > { %1568 = vmatprep.mubr.bf16.mxu1 %v1093_v49  ;;  %v3754_v49 = vrot.slane %v1144_v15, %v4292_v38 }
 0x194   : > { %1569 = vmatmul.mubr.bf16.gmra.mxu1 %v1092_v34  ;;  %v1098_v34 = vpack.c.bf16 %v1022_v6, %v1020_v29 }
 0x195   : > { %1578 = vmatprep.mubr.bf16.mxu1 %v1095_v7  ;;  %v874_v7 = vadd.f32 %v3632_v2, %v3418_v17 }
 0x197   : > { %v1029_v11 = vmax.f32 %v874_v7, 0.0  ;;  %v886_v7 = vadd.f32 %v3662_v33, %v3424_v19 }
 0x199   : > { %v1103_v29 = vpack.c.bf16 %v1031_v39, %v1029_v11 }
 0x19c   : > { %1579 = vmatmul.mubr.bf16.gmra.mxu1 %v1094_v23 }
 0x19d   : > { %1588 = vmatprep.mubr.bf16.mxu1 %v1097_v0 }
 0x1a4   : > { %v1350_v31 = vpop.f32.mrf.mxu1  ;;  %1589 = vmatmul.mubr.bf16.gmra.mxu1 %v1096_v36 }
 0x1a5   : > { %1598 = vmatprep.mubr.bf16.mxu1 %v1099_v24  ;;  %v1351_v10 = vadd.f32 %v1350_v31, %v3754_v49  ;;  %v884_v24 = vadd.f32 %v3656_v9, %v3418_v17  ;;  %v888_v31 = vadd.f32 %v3668_v35, %v3418_v17 }
 0x1a6   : > { %v1352_v13 = vpop.f32.mrf.mxu1 }
 0x1a7   : > { %v1353_v27 = vadd.f32 %v1352_v13, %v3751_v46  ;;  %v1669_v60 = vmax.f32 %v1351_v10, 0.0  ;;  %v1102_v10 = vpack.c.bf16 %v1030_v14, %v1028_v41 }
 0x1a8   : > { %v1354_v62 = vpop.f32.mrf.mxu1 }
 0x1a9   : > { %v1355_v45 = vadd.f32 %v1354_v62, %v3754_v49  ;;  %v1670_v56 = vmax.f32 %v1353_v27, 0.0 }
 0x1aa   : > { %v1356_v8 = vpop.f32.mrf.mxu1 }
 0x1ab   : > { %v1357_v47 = vadd.f32 %v1356_v8, %v3751_v46  ;;  %v1671_v22 = vmax.f32 %v1355_v45, 0.0  ;;  %v1033_v45 = vmax.f32 %v884_v24, 0.0  ;;  %v882_v8 = vadd.f32 %v3650_v18, %v3424_v19 }
 0x1ac   : > { %v1360_v23 = vpop.f32.mrf.mxu1  ;;  %1599 = vmatmul.mubr.bf16.gmra.mxu1 %v1098_v34  ;;  %v1035_v34 = vmax.f32 %v888_v31, 0.0  ;;  %v908_v24 = vadd.f32 %v3716_v37, %v3418_v17 }
 0x1ad   : > { %v1672_v51 = vmax.f32 %v1357_v47, 0.0  ;;  %1608 = vmatprep.mubr.bf16.mxu1 %v1101_v57  ;;  %v1797_v2 = vpack.c.bf16 %v1671_v22, %v1669_v60  ;;  %v1361_v16 = vadd.f32 %v1360_v23, %v3754_v49  ;;  %v894_v57 = vadd.f32 %v3680_v59, %v3418_v17 }
 0x1ae   : > { %v1362_v0 = vpop.f32.mrf.mxu1  ;;  %v898_v22 = vadd.f32 %v3692_v25, %v3418_v17  ;;  %v1032_v33 = vmax.f32 %v882_v8, 0.0  ;;  %v1034_v60 = vmax.f32 %v886_v7, 0.0  ;;  %v918_v8 = vadd.f32 %v3740_v5, %v3418_v17 }
 0x1af   : > { %v1798_v32 = vpack.c.bf16 %v1672_v51, %v1670_v56  ;;  %v1363_v50 = vadd.f32 %v1362_v0, %v3751_v46  ;;  %v1673_v62 = vmax.f32 %v1361_v16, 0.0  ;;  %v1105_v56 = vpack.c.bf16 %v1035_v34, %v1033_v45 }
 0x1b0   : > { %v1364_v30 = vpop.f32.mrf.mxu1  ;;  %v1037_v39 = vmax.f32 %v894_v57, 0.0 }
 0x1b1   : > { %v1365_v36 = vadd.f32 %v1364_v30, %v3754_v49  ;;  %2028 = vmatprep.mubr.bf16.mxu0 %v1798_v32  ;;  %v1674_v42 = vmax.f32 %v1363_v50, 0.0  ;;  %v1039_v32 = vmax.f32 %v898_v22, 0.0 }
 0x1b2   : > { %v1366_v15 = vpop.f32.mrf.mxu1  ;;  %2029 = vmatmul.mubr.bf16.vlgmr.msra.gmra.mxu0 %v1797_v2 }
 0x1b3   : > { %v1367_v44 = vadd.f32 %v1366_v15, %v3751_v46  ;;  %v1675_v6 = vmax.f32 %v1365_v36, 0.0  ;;  %v1104_v36 = vpack.c.bf16 %v1034_v60, %v1032_v33  ;;  %v904_v15 = vadd.f32 %v3704_v55, %v3418_v17 }
 0x1b4   : > { %v1370_v13 = vpop.f32.mrf.mxu1  ;;  %1609 = vmatmul.mubr.bf16.gmra.mxu1 %v1100_v4  ;;  %v892_v4 = vadd.f32 %v3674_v54, %v3424_v19 }
 0x1b5   : > { %v1676_v53 = vmax.f32 %v1367_v44, 0.0  ;;  %1618 = vmatprep.mubr.bf16.mxu1 %v1103_v29  ;;  %v1799_v9 = vpack.c.bf16 %v1675_v6, %v1673_v62  ;;  %v1371_v43 = vadd.f32 %v1370_v13, %v3754_v49  ;;  %v1107_v44 = vpack.c.bf16 %v1039_v32, %v1037_v39 }
 0x1b6   : > { %v1372_v27 = vpop.f32.mrf.mxu1  ;;  %v1036_v21 = vmax.f32 %v892_v4, 0.0  ;;  %v1041_v14 = vmax.f32 %v904_v15, 0.0  ;;  %v1043_v62 = vmax.f32 %v908_v24, 0.0 }
 0x1b7   : > { %v1800_v61 = vpack.c.bf16 %v1676_v53, %v1674_v42  ;;  %v1373_v35 = vadd.f32 %v1372_v27, %v3751_v46  ;;  %v1677_v0 = vmax.f32 %v1371_v43, 0.0  ;;  %v1038_v42 = vmax.f32 %v896_v3, 0.0 }
 0x1b8   : > { %v1374_v40 = vpop.f32.mrf.mxu1  ;;  %v1109_v43 = vpack.c.bf16 %v1043_v62, %v1041_v14 }
 0x1b9   : > { %v1375_v12 = vadd.f32 %v1374_v40, %v3754_v49  ;;  %2036 = vmatprep.mubr.bf16.mxu0 %v1800_v61  ;;  %v1678_v18 = vmax.f32 %v1373_v35, 0.0  ;;  %v1106_v61 = vpack.c.bf16 %v1038_v42, %v1036_v21  ;;  %v906_v40 = vadd.f32 %v3710_v63, %v3424_v19 }
 0x1ba   : > { %v1376_v47 = vpop.f32.mrf.mxu1  ;;  %2037 = vmatmul.mubr.bf16.gmra.mxu0 %v1799_v9  ;;  %v902_v9 = vadd.f32 %v3698_v28, %v3424_v19 }
 0x1bb   : > { %v1377_v23 = vadd.f32 %v1376_v47, %v3751_v46  ;;  %v1679_v51 = vmax.f32 %v1375_v12, 0.0 }
 0x1bc   : > { %v1380_v26 = vpop.f32.mrf.mxu1  ;;  %1619 = vmatmul.mubr.bf16.gmra.mxu1 %v1102_v10  ;;  %v914_v10 = vadd.f32 %v3728_v48, %v3418_v17  ;;  %v1040_v63 = vmax.f32 %v902_v9, 0.0 }
 0x1bd   : > { %v1680_v58 = vmax.f32 %v1377_v23, 0.0  ;;  %1628 = vmatprep.mubr.bf16.mxu1 %v1105_v56  ;;  %v1801_v59 = vpack.c.bf16 %v1679_v51, %v1677_v0  ;;  %v1381_v52 = vadd.f32 %v1380_v26, %v3754_v49  ;;  %v1042_v23 = vmax.f32 %v906_v40, 0.0 }
 0x1be   : > { %v1382_v11 = vpop.f32.mrf.mxu1  ;;  %v1045_v26 = vmax.f32 %v914_v10, 0.0  ;;  %v912_v0 = vadd.f32 %v3722_v20, %v3424_v19 }
 0x1bf   : > { %v1802_v2 = vpack.c.bf16 %v1680_v58, %v1678_v18  ;;  %v1383_v25 = vadd.f32 %v1382_v11, %v3751_v46  ;;  %v1681_v53 = vmax.f32 %v1381_v52, 0.0  ;;  %v1047_v18 = vmax.f32 %v918_v8, 0.0 }
 0x1c0   : > { %v1384_v30 = vpop.f32.mrf.mxu1  ;;  %v1108_v60 = vpack.c.bf16 %v1042_v23, %v1040_v63  ;;  %v916_v11 = vadd.f32 %v3734_v1, %v3424_v19  ;;  %v1044_v4 = vmax.f32 %v912_v0, 0.0 }
 0x1c1   : > { %v1385_v50 = vadd.f32 %v1384_v30, %v3754_v49  ;;  %2044 = vmatprep.mubr.bf16.mxu0 %v1802_v2  ;;  %v1682_v54 = vmax.f32 %v1383_v25, 0.0 }
 0x1c2   : > { %v1386_v16 = vpop.f32.mrf.mxu1  ;;  %2045 = vmatmul.mubr.bf16.gmra.mxu0 %v1801_v59  ;;  %v1111_v59 = vpack.c.bf16 %v1047_v18, %v1045_v26  ;;  %v1046_v3 = vmax.f32 %v916_v11, 0.0 }
 0x1c3   : > { %v1387_v31 = vadd.f32 %v1386_v16, %v3751_v46  ;;  %v1683_v29 = vmax.f32 %v1385_v50, 0.0 }
 0x1c4   : > { %v1390_v6 = vpop.f32.mrf.mxu1  ;;  %1629 = vmatmul.mubr.bf16.gmra.mxu1 %v1104_v36 }
 0x1c5   : > { %v1684_v13 = vmax.f32 %v1387_v31, 0.0  ;;  %1638 = vmatprep.mubr.bf16.mxu1 %v1107_v44  ;;  %v1803_v55 = vpack.c.bf16 %v1683_v29, %v1681_v53  ;;  %v1391_v35 = vadd.f32 %v1390_v6, %v3754_v49  ;;  %v1110_v31 = vpack.c.bf16 %v1046_v3, %v1044_v4 }
 0x1c6   : > { %v1392_v41 = vpop.f32.mrf.mxu1 }
 0x1c7   : > { %v1804_v27 = vpack.c.bf16 %v1684_v13, %v1682_v54  ;;  %v1393_v37 = vadd.f32 %v1392_v41, %v3751_v46  ;;  %v1685_v56 = vmax.f32 %v1391_v35, 0.0 }
 0x1c8   : > { %v1394_v45 = vpop.f32.mrf.mxu1 }
 0x1c9   : > { %v1395_v34 = vadd.f32 %v1394_v45, %v3754_v49  ;;  %2052 = vmatprep.mubr.bf16.mxu0 %v1804_v27  ;;  %v1686_v28 = vmax.f32 %v1393_v37, 0.0 }
 0x1ca   : > { %v1396_v12 = vpop.f32.mrf.mxu1  ;;  %2053 = vmatmul.mubr.bf16.gmra.mxu0 %v1803_v55 }
 0x1cb   : > { %v1397_v7 = vadd.f32 %v1396_v12, %v3751_v46  ;;  %v1687_v47 = vmax.f32 %v1395_v34, 0.0 }
 0x1cc   : > { %v1400_v57 = vpop.f32.mrf.mxu1  ;;  %1639 = vmatmul.mubr.bf16.gmra.mxu1 %v1106_v61 }
 0x1cd   : > { %v1688_v22 = vmax.f32 %v1397_v7, 0.0  ;;  %1648 = vmatprep.mubr.bf16.mxu1 %v1109_v43  ;;  %v1805_v48 = vpack.c.bf16 %v1687_v47, %v1685_v56  ;;  %v1401_v39 = vadd.f32 %v1400_v57, %v3754_v49 }
 0x1ce   : > { %v1402_v51 = vpop.f32.mrf.mxu1 }
 0x1cf   : > { %v1806_v58 = vpack.c.bf16 %v1688_v22, %v1686_v28  ;;  %v1403_v17 = vadd.f32 %v1402_v51, %v3751_v46  ;;  %v1689_v52 = vmax.f32 %v1401_v39, 0.0 }
 0x1d0   : > { %v1404_v33 = vpop.f32.mrf.mxu1 }
 0x1d1   : > { %v1405_v5 = vadd.f32 %v1404_v33, %v3754_v49  ;;  %2060 = vmatprep.mubr.bf16.mxu0 %v1806_v58  ;;  %v1690_v50 = vmax.f32 %v1403_v17, 0.0 }
 0x1d2   : > { %v1406_v32 = vpop.f32.mrf.mxu1  ;;  %2061 = vmatmul.mubr.bf16.gmra.mxu0 %v1805_v48 }
 0x1d3   : > { %v1407_v2 = vadd.f32 %v1406_v32, %v3751_v46  ;;  %v1691_v30 = vmax.f32 %v1405_v5, 0.0 }
 0x1d4   : > { %v1410_v25 = vpop.f32.mrf.mxu1  ;;  %1649 = vmatmul.mubr.bf16.gmra.mxu1 %v1108_v60 }
 0x1d5   : > { %v1692_v36 = vmax.f32 %v1407_v2, 0.0  ;;  %1658 = vmatprep.mubr.bf16.mxu1 %v1111_v59  ;;  %v1807_v15 = vpack.c.bf16 %v1691_v30, %v1689_v52  ;;  %v1411_v44 = vadd.f32 %v1410_v25, %v3754_v49 }
 0x1d6   : > { %v1412_v20 = vpop.f32.mrf.mxu1 }
 0x1d7   : > { %v1808_v16 = vpack.c.bf16 %v1692_v36, %v1690_v50  ;;  %v1413_v1 = vadd.f32 %v1412_v20, %v3751_v46  ;;  %v1693_v53 = vmax.f32 %v1411_v44, 0.0 }
 0x1d8   : > { %v1414_v19 = vpop.f32.mrf.mxu1 }
 0x1d9   : > { %v1415_v24 = vadd.f32 %v1414_v19, %v3754_v49  ;;  %2068 = vmatprep.mubr.bf16.mxu0 %v1808_v16  ;;  %v1694_v21 = vmax.f32 %v1413_v1, 0.0 }
 0x1da   : > { %v1416_v29 = vpop.f32.mrf.mxu1  ;;  %2069 = vmatmul.mubr.bf16.gmra.mxu0 %v1807_v15 }
 0x1db   : > { %v1417_v6 = vadd.f32 %v1416_v29, %v3751_v46  ;;  %v1695_v54 = vmax.f32 %v1415_v24, 0.0 }
 0x1dc   : > { %v1420_v13 = vpop.f32.mrf.mxu1  ;;  %1659 = vmatmul.mubr.bf16.gmra.mxu1 %v1110_v31 }
 0x1dd   : > { %v1696_v42 = vmax.f32 %v1417_v6, 0.0  ;;  %v1809_v62 = vpack.c.bf16 %v1695_v54, %v1693_v53  ;;  %v1421_v37 = vadd.f32 %v1420_v13, %v3754_v49 }
 0x1de   : > { %v1422_v41 = vpop.f32.mrf.mxu1 }
 0x1df   : > { %v1810_v14 = vpack.c.bf16 %v1696_v42, %v1694_v21  ;;  %v1423_v55 = vadd.f32 %v1422_v41, %v3751_v46  ;;  %v1697_v10 = vmax.f32 %v1421_v37, 0.0 }
 0x1e0   : > { %v1424_v27 = vpop.f32.mrf.mxu1 }
 0x1e1   : > { %v1425_v45 = vadd.f32 %v1424_v27, %v3754_v49  ;;  %2076 = vmatprep.mubr.bf16.mxu0 %v1810_v14  ;;  %v1698_v35 = vmax.f32 %v1423_v55, 0.0 }
 0x1e2   : > { %v1426_v34 = vpop.f32.mrf.mxu1  ;;  %2077 = vmatmul.mubr.bf16.gmra.mxu0 %v1809_v62 }
 0x1e3   : > { %v1427_v61 = vadd.f32 %v1426_v34, %v3751_v46  ;;  %v1699_v9 = vmax.f32 %v1425_v45, 0.0 }
 0x1e4   : > { %v1430_v40 = vpop.f32.mrf.mxu1 }
 0x1e5   : > { %v1700_v12 = vmax.f32 %v1427_v61, 0.0  ;;  %v1811_v43 = vpack.c.bf16 %v1699_v9, %v1697_v10  ;;  %v1431_v22 = vadd.f32 %v1430_v40, %v3754_v49 }
 0x1e6   : > { %v1432_v8 = vpop.f32.mrf.mxu1 }
 0x1e7   : > { %v1812_v7 = vpack.c.bf16 %v1700_v12, %v1698_v35  ;;  %v1433_v57 = vadd.f32 %v1432_v8, %v3751_v46  ;;  %v1701_v58 = vmax.f32 %v1431_v22, 0.0 }
 0x1e8   : > { %v1434_v47 = vpop.f32.mrf.mxu1 }
 0x1e9   : > { %v1435_v28 = vadd.f32 %v1434_v47, %v3754_v49  ;;  %2084 = vmatprep.mubr.bf16.mxu0 %v1812_v7  ;;  %v1702_v26 = vmax.f32 %v1433_v57, 0.0 }
 0x1ea   : > { %v1436_v63 = vpop.f32.mrf.mxu1  ;;  %2085 = vmatmul.mubr.bf16.gmra.mxu0 %v1811_v43 }
 0x1eb   : > { %v1437_v23 = vadd.f32 %v1436_v63, %v3751_v46  ;;  %v1703_v56 = vmax.f32 %v1435_v28, 0.0 }
 0x1ec   : > { %v1440_v51 = vpop.f32.mrf.mxu1 }
 0x1ed   : > { %v1704_v18 = vmax.f32 %v1437_v23, 0.0  ;;  %v1813_v17 = vpack.c.bf16 %v1703_v56, %v1701_v58  ;;  %v1441_v11 = vadd.f32 %v1440_v51, %v3754_v49 }
 0x1ee   : > { %v1442_v48 = vpop.f32.mrf.mxu1 }
 0x1ef   : > { %v1814_v33 = vpack.c.bf16 %v1704_v18, %v1702_v26  ;;  %v1443_v60 = vadd.f32 %v1442_v48, %v3751_v46  ;;  %v1705_v50 = vmax.f32 %v1441_v11, 0.0 }
 0x1f0   : > { %v1444_v5 = vpop.f32.mrf.mxu1 }
 0x1f1   : > { %v1445_v0 = vadd.f32 %v1444_v5, %v3754_v49  ;;  %2092 = vmatprep.mubr.bf16.mxu0 %v1814_v33  ;;  %v1706_v30 = vmax.f32 %v1443_v60, 0.0 }
 0x1f2   : > { %v1446_v39 = vpop.f32.mrf.mxu1  ;;  %2093 = vmatmul.mubr.bf16.gmra.mxu0 %v1813_v17 }
 0x1f3   : > { %v1447_v32 = vadd.f32 %v1446_v39, %v3751_v46  ;;  %v1707_v2 = vmax.f32 %v1445_v0, 0.0 }
 0x1f4   : > { %v1450_v59 = vpop.f32.mrf.mxu1 }
 0x1f5   : > { %v1708_v25 = vmax.f32 %v1447_v32, 0.0  ;;  %v1815_v3 = vpack.c.bf16 %v1707_v2, %v1705_v50  ;;  %v1451_v15 = vadd.f32 %v1450_v59, %v3754_v49 }
 0x1f6   : > { %v1452_v36 = vpop.f32.mrf.mxu1 }
 0x1f7   : > { %v1816_v4 = vpack.c.bf16 %v1708_v25, %v1706_v30  ;;  %v1453_v20 = vadd.f32 %v1452_v36, %v3751_v46  ;;  %v1709_v6 = vmax.f32 %v1451_v15, 0.0 }
 0x1f8   : > { %v1454_v52 = vpop.f32.mrf.mxu1 }
 0x1f9   : > { %v1455_v16 = vadd.f32 %v1454_v52, %v3754_v49  ;;  %2100 = vmatprep.mubr.bf16.mxu0 %v1816_v4  ;;  %v1710_v44 = vmax.f32 %v1453_v20, 0.0 }
 0x1fa   : > { %v1456_v19 = vpop.f32.mrf.mxu1  ;;  %2101 = vmatmul.mubr.bf16.gmra.mxu0 %v1815_v3 }
 0x1fb   : > { %v1457_v1 = vadd.f32 %v1456_v19, %v3751_v46  ;;  %v1711_v24 = vmax.f32 %v1455_v16, 0.0 }
 0x1fc   : > { %v1460_v31 = vpop.f32.mrf.mxu1 }
 0x1fd   : > { %v1712_v29 = vmax.f32 %v1457_v1, 0.0  ;;  %v1817_v21 = vpack.c.bf16 %v1711_v24, %v1709_v6  ;;  %v1461_v14 = vadd.f32 %v1460_v31, %v3754_v49 }
 0x1fe   : > { %v1462_v54 = vpop.f32.mrf.mxu1 }
 0x1ff   : > { %v1818_v13 = vpack.c.bf16 %v1712_v29, %v1710_v44  ;;  %v1463_v53 = vadd.f32 %v1462_v54, %v3751_v46  ;;  %v1713_v61 = vmax.f32 %v1461_v14, 0.0 }
 0x200   : > { %v1464_v42 = vpop.f32.mrf.mxu1 }
 0x201   : > { %v1465_v41 = vadd.f32 %v1464_v42, %v3754_v49  ;;  %2108 = vmatprep.mubr.bf16.mxu0 %v1818_v13  ;;  %v1714_v37 = vmax.f32 %v1463_v53, 0.0 }
 0x202   : > { %v1466_v62 = vpop.f32.mrf.mxu1  ;;  %2109 = vmatmul.mubr.bf16.gmra.mxu0 %v1817_v21 }
 0x203   : > { %v1467_v27 = vadd.f32 %v1466_v62, %v3751_v46  ;;  %v1715_v55 = vmax.f32 %v1465_v41, 0.0 }
 0x204   : > { %v1470_v45 = vpop.f32.mrf.mxu1 }
 0x205   : > { %v1716_v34 = vmax.f32 %v1467_v27, 0.0  ;;  %v1819_v35 = vpack.c.bf16 %v1715_v55, %v1713_v61  ;;  %v1471_v7 = vadd.f32 %v1470_v45, %v3754_v49 }
 0x206   : > { %v1472_v9 = vpop.f32.mrf.mxu1 }
 0x207   : > { %v1820_v40 = vpack.c.bf16 %v1716_v34, %v1714_v37  ;;  %v1473_v10 = vadd.f32 %v1472_v9, %v3751_v46  ;;  %v1717_v23 = vmax.f32 %v1471_v7, 0.0 }
 0x208   : > { %v1474_v12 = vpop.f32.mrf.mxu1 }
 0x209   : > { %v1475_v8 = vadd.f32 %v1474_v12, %v3754_v49  ;;  %2116 = vmatprep.mubr.bf16.mxu0 %v1820_v40  ;;  %v1718_v22 = vmax.f32 %v1473_v10, 0.0 }
 0x20a   : > { %v1476_v43 = vpop.f32.mrf.mxu1  ;;  %2117 = vmatmul.mubr.bf16.gmra.mxu0 %v1819_v35 }
 0x20b   : > { %v1477_v47 = vadd.f32 %v1476_v43, %v3751_v46  ;;  %v1719_v57 = vmax.f32 %v1475_v8, 0.0 }
 0x20c   : > { %v1480_v28 = vpop.f32.mrf.mxu1 }
 0x20d   : > { %v1720_v63 = vmax.f32 %v1477_v47, 0.0  ;;  %v1821_v26 = vpack.c.bf16 %v1719_v57, %v1717_v23  ;;  %v1481_v33 = vadd.f32 %v1480_v28, %v3754_v49 }
 0x20e   : > { %v1482_v56 = vpop.f32.mrf.mxu1 }
 0x20f   : > { %v1822_v51 = vpack.c.bf16 %v1720_v63, %v1718_v22  ;;  %v1483_v58 = vadd.f32 %v1482_v56, %v3751_v46  ;;  %v1721_v32 = vmax.f32 %v1481_v33, 0.0 }
 0x210   : > { %v1484_v18 = vpop.f32.mrf.mxu1 }
 0x211   : > { %v1485_v48 = vadd.f32 %v1484_v18, %v3754_v49  ;;  %2124 = vmatprep.mubr.bf16.mxu0 %v1822_v51  ;;  %v1722_v11 = vmax.f32 %v1483_v58, 0.0 }
 0x212   : > { %v1486_v17 = vpop.f32.mrf.mxu1  ;;  %2125 = vmatmul.mubr.bf16.gmra.mxu0 %v1821_v26 }
 0x213   : > { %v1487_v5 = vadd.f32 %v1486_v17, %v3751_v46  ;;  %v1723_v60 = vmax.f32 %v1485_v48, 0.0 }
 0x214   : > { %v1490_v0 = vpop.f32.mrf.mxu1 }
 0x215   : > { %v1724_v39 = vmax.f32 %v1487_v5, 0.0  ;;  %v1823_v30 = vpack.c.bf16 %v1723_v60, %v1721_v32  ;;  %v1491_v4 = vadd.f32 %v1490_v0, %v3754_v49 }
 0x216   : > { %v1492_v2 = vpop.f32.mrf.mxu1 }
 0x217   : > { %v1824_v59 = vpack.c.bf16 %v1724_v39, %v1722_v11  ;;  %v1493_v50 = vadd.f32 %v1492_v2, %v3751_v46  ;;  %v1725_v1 = vmax.f32 %v1491_v4, 0.0 }
 0x218   : > { %v1494_v25 = vpop.f32.mrf.mxu1 }
 0x219   : > { %v1495_v36 = vadd.f32 %v1494_v25, %v3754_v49  ;;  %2132 = vmatprep.mubr.bf16.mxu0 %v1824_v59  ;;  %v1726_v15 = vmax.f32 %v1493_v50, 0.0 }
 0x21a   : > { %v1496_v3 = vpop.f32.mrf.mxu1  ;;  %2133 = vmatmul.mubr.bf16.gmra.mxu0 %v1823_v30 }
 0x21b   : > { %v1497_v52 = vadd.f32 %v1496_v3, %v3751_v46  ;;  %v1727_v20 = vmax.f32 %v1495_v36, 0.0 }
 0x21c   : > { %v1500_v16 = vpop.f32.mrf.mxu1 }
 0x21d   : > { %v1728_v19 = vmax.f32 %v1497_v52, 0.0  ;;  %v1825_v44 = vpack.c.bf16 %v1727_v20, %v1725_v1  ;;  %v1501_v13 = vadd.f32 %v1500_v16, %v3754_v49 }
 0x21e   : > { %v1502_v24 = vpop.f32.mrf.mxu1 }
 0x21f   : > { %v1826_v31 = vpack.c.bf16 %v1728_v19, %v1726_v15  ;;  %v1503_v6 = vadd.f32 %v1502_v24, %v3751_v46  ;;  %v1729_v27 = vmax.f32 %v1501_v13, 0.0 }
 0x220   : > { %v1504_v29 = vpop.f32.mrf.mxu1 }
 0x221   : > { %v1505_v54 = vadd.f32 %v1504_v29, %v3754_v49  ;;  %2140 = vmatprep.mubr.bf16.mxu0 %v1826_v31  ;;  %v1730_v14 = vmax.f32 %v1503_v6, 0.0 }
 0x222   : > { %v1506_v21 = vpop.f32.mrf.mxu1  ;;  %2141 = vmatmul.mubr.bf16.gmra.mxu0 %v1825_v44 }
 0x223   : > { %v1507_v42 = vadd.f32 %v1506_v21, %v3751_v46  ;;  %v1731_v53 = vmax.f32 %v1505_v54, 0.0 }
 0x224   : > { %v1510_v41 = vpop.f32.mrf.mxu1 }
 0x225   : > { %v1732_v62 = vmax.f32 %v1507_v42, 0.0  ;;  %v1827_v37 = vpack.c.bf16 %v1731_v53, %v1729_v27  ;;  %v1511_v40 = vadd.f32 %v1510_v41, %v3754_v49 }
 0x226   : > { %v1512_v55 = vpop.f32.mrf.mxu1 }
 0x227   : > { %v1828_v45 = vpack.c.bf16 %v1732_v62, %v1730_v14  ;;  %v1513_v61 = vadd.f32 %v1512_v55, %v3751_v46  ;;  %v1733_v47 = vmax.f32 %v1511_v40, 0.0 }
 0x228   : > { %v1514_v34 = vpop.f32.mrf.mxu1 }
 0x229   : > { %v1515_v9 = vadd.f32 %v1514_v34, %v3754_v49  ;;  %2148 = vmatprep.mubr.bf16.mxu0 %v1828_v45  ;;  %v1734_v7 = vmax.f32 %v1513_v61, 0.0 }
 0x22a   : > { %v1516_v35 = vpop.f32.mrf.mxu1  ;;  %2149 = vmatmul.mubr.bf16.gmra.mxu0 %v1827_v37 }
 0x22b   : > { %v1517_v12 = vadd.f32 %v1516_v35, %v3751_v46  ;;  %v1735_v10 = vmax.f32 %v1515_v9, 0.0 }
 0x22c   : > { %v1520_v8 = vpop.f32.mrf.mxu1 }
 0x22d   : > { %v1736_v43 = vmax.f32 %v1517_v12, 0.0  ;;  %v1829_v22 = vpack.c.bf16 %v1735_v10, %v1733_v47  ;;  %v1521_v51 = vadd.f32 %v1520_v8, %v3754_v49 }
 0x22e   : > { %v1522_v57 = vpop.f32.mrf.mxu1 }
 0x22f   : > { %v1830_v28 = vpack.c.bf16 %v1736_v43, %v1734_v7  ;;  %v1523_v23 = vadd.f32 %v1522_v57, %v3751_v46  ;;  %v1737_v5 = vmax.f32 %v1521_v51, 0.0 }
 0x230   : > { %v1524_v63 = vpop.f32.mrf.mxu1 }
 0x231   : > { %v1525_v56 = vadd.f32 %v1524_v63, %v3754_v49  ;;  %2156 = vmatprep.mubr.bf16.mxu0 %v1830_v28  ;;  %v1738_v33 = vmax.f32 %v1523_v23, 0.0 }
 0x232   : > { %v1526_v26 = vpop.f32.mrf.mxu1  ;;  %2157 = vmatmul.mubr.bf16.gmra.mxu0 %v1829_v22 }
 0x233   : > { %v1527_v18 = vadd.f32 %v1526_v26, %v3751_v46  ;;  %v1739_v58 = vmax.f32 %v1525_v56, 0.0 }
 0x234   : > { %v1530_v48 = vpop.f32.mrf.mxu1 }
 0x235   : > { %v1740_v17 = vmax.f32 %v1527_v18, 0.0  ;;  %v1831_v11 = vpack.c.bf16 %v1739_v58, %v1737_v5  ;;  %v1531_v59 = vadd.f32 %v1530_v48, %v3754_v49 }
 0x236   : > { %v1532_v60 = vpop.f32.mrf.mxu1 }
 0x237   : > { %v1832_v0 = vpack.c.bf16 %v1740_v17, %v1738_v33  ;;  %v1533_v32 = vadd.f32 %v1532_v60, %v3751_v46  ;;  %v1741_v52 = vmax.f32 %v1531_v59, 0.0 }
 0x238   : > { %v1534_v39 = vpop.f32.mrf.mxu1 }
 0x239   : > { %v1535_v2 = vadd.f32 %v1534_v39, %v3754_v49  ;;  %2164 = vmatprep.mubr.bf16.mxu0 %v1832_v0  ;;  %v1742_v4 = vmax.f32 %v1533_v32, 0.0 }
 0x23a   : > { %v1536_v30 = vpop.f32.mrf.mxu1  ;;  %2165 = vmatmul.mubr.bf16.gmra.mxu0 %v1831_v11 }
 0x23b   : > { %v1537_v25 = vadd.f32 %v1536_v30, %v3751_v46  ;;  %v1743_v50 = vmax.f32 %v1535_v2, 0.0 }
 0x23c   : > { %v1540_v36 = vpop.f32.mrf.mxu1 }
 0x23d   : > { %v1744_v3 = vmax.f32 %v1537_v25, 0.0  ;;  %v1833_v15 = vpack.c.bf16 %v1743_v50, %v1741_v52  ;;  %v1541_v31 = vadd.f32 %v1540_v36, %v3754_v49 }
 0x23e   : > { %v1542_v20 = vpop.f32.mrf.mxu1 }
 0x23f   : > { %v1834_v16 = vpack.c.bf16 %v1744_v3, %v1742_v4  ;;  %v1543_v1 = vadd.f32 %v1542_v20, %v3751_v46  ;;  %v1745_v42 = vmax.f32 %v1541_v31, 0.0 }
 0x240   : > { %v1544_v19 = vpop.f32.mrf.mxu1 }
 0x241   : > { %v1545_v24 = vadd.f32 %v1544_v19, %v3754_v49  ;;  %2172 = vmatprep.mubr.bf16.mxu0 %v1834_v16  ;;  %v1746_v13 = vmax.f32 %v1543_v1, 0.0 }
 0x242   : > { %v1546_v44 = vpop.f32.mrf.mxu1  ;;  %2173 = vmatmul.mubr.bf16.gmra.mxu0 %v1833_v15 }
 0x243   : > { %v1547_v29 = vadd.f32 %v1546_v44, %v3751_v46  ;;  %v1747_v6 = vmax.f32 %v1545_v24, 0.0 }
 0x244   : > { %v1550_v54 = vpop.f32.mrf.mxu1 }
 0x245   : > { %v1748_v21 = vmax.f32 %v1547_v29, 0.0  ;;  %v1835_v14 = vpack.c.bf16 %v1747_v6, %v1745_v42  ;;  %v1551_v45 = vadd.f32 %v1550_v54, %v3754_v49 }
 0x246   : > { %v1552_v53 = vpop.f32.mrf.mxu1 }
 0x247   : > { %v1836_v41 = vpack.c.bf16 %v1748_v21, %v1746_v13  ;;  %v1553_v27 = vadd.f32 %v1552_v53, %v3751_v46  ;;  %v1749_v12 = vmax.f32 %v1551_v45, 0.0 }
 0x248   : > { %v1554_v62 = vpop.f32.mrf.mxu1 }
 0x249   : > { %v1555_v55 = vadd.f32 %v1554_v62, %v3754_v49  ;;  %2180 = vmatprep.mubr.bf16.mxu0 %v1836_v41  ;;  %v1750_v40 = vmax.f32 %v1553_v27, 0.0 }
 0x24a   : > { %v1556_v37 = vpop.f32.mrf.mxu1  ;;  %2181 = vmatmul.mubr.bf16.gmra.mxu0 %v1835_v14 }
 0x24b   : > { %v1557_v34 = vadd.f32 %v1556_v37, %v3751_v46  ;;  %v1751_v61 = vmax.f32 %v1555_v55, 0.0 }
 0x24c   : > { %v1560_v9 = vpop.f32.mrf.mxu1 }
 0x24d   : > { %v1752_v35 = vmax.f32 %v1557_v34, 0.0  ;;  %v1837_v7 = vpack.c.bf16 %v1751_v61, %v1749_v12  ;;  %v1561_v28 = vadd.f32 %v1560_v9, %v3754_v49 }
 0x24e   : > { %v1562_v10 = vpop.f32.mrf.mxu1 }
 0x24f   : > { %v1838_v8 = vpack.c.bf16 %v1752_v35, %v1750_v40  ;;  %v1563_v47 = vadd.f32 %v1562_v10, %v3751_v46  ;;  %v1753_v18 = vmax.f32 %v1561_v28, 0.0 }
 0x250   : > { %v1564_v43 = vpop.f32.mrf.mxu1 }
 0x251   : > { %v1565_v57 = vadd.f32 %v1564_v43, %v3754_v49  ;;  %2188 = vmatprep.mubr.bf16.mxu0 %v1838_v8  ;;  %v1754_v51 = vmax.f32 %v1563_v47, 0.0  ;;  %v3906_v43 = vld [vmem:[%s4282_s6] ss:$0 sm:$0xff] }
 0x252   : > { %v1566_v22 = vpop.f32.mrf.mxu1  ;;  %2189 = vmatmul.mubr.bf16.gmra.mxu0 %v1837_v7 }
 0x253   : > { %v1567_v63 = vadd.f32 %v1566_v22, %v3751_v46  ;;  %v1755_v23 = vmax.f32 %v1565_v57, 0.0 }
 0x254   : > { %v1570_v56 = vpop.f32.mrf.mxu1 }
 0x255   : > { %v1756_v26 = vmax.f32 %v1567_v63, 0.0  ;;  %v1839_v33 = vpack.c.bf16 %v1755_v23, %v1753_v18  ;;  %v1571_v0 = vadd.f32 %v1570_v56, %v3754_v49 }
 0x256   : > { %v1572_v58 = vpop.f32.mrf.mxu1 }
 0x257   : > { %v1840_v48 = vpack.c.bf16 %v1756_v26, %v1754_v51  ;;  %v1573_v5 = vadd.f32 %v1572_v58, %v3751_v46  ;;  %v1757_v25 = vmax.f32 %v1571_v0, 0.0  ;;  %v2381_v26 = vld [vmem:[%s4283_s7] sm:$0x1] }
 0x258   : > { %v1574_v17 = vpop.f32.mrf.mxu1 }
 0x259   : > { %v1575_v60 = vadd.f32 %v1574_v17, %v3754_v49  ;;  %2196 = vmatprep.mubr.bf16.mxu0 %v1840_v48  ;;  %v1758_v59 = vmax.f32 %v1573_v5, 0.0 }
 0x25a   : > { %v1576_v11 = vpop.f32.mrf.mxu1  ;;  %2197 = vmatmul.mubr.bf16.gmra.mxu0 %v1839_v33 }
 0x25b   : > { %v1577_v39 = vadd.f32 %v1576_v11, %v3751_v46  ;;  %v1759_v32 = vmax.f32 %v1575_v60, 0.0  ;;  %v2382_v11 = vunpack.c.l.bf16 %v2381_v26 }
 0x25c   : > { %v1580_v2 = vpop.f32.mrf.mxu1 }
 0x25d   : > { %v1760_v30 = vmax.f32 %v1577_v39, 0.0  ;;  %v1841_v4 = vpack.c.bf16 %v1759_v32, %v1757_v25  ;;  %v1581_v16 = vadd.f32 %v1580_v2, %v3754_v49 }
 0x25e   : > { %v1582_v50 = vpop.f32.mrf.mxu1 }
 0x25f   : > { %v1842_v36 = vpack.c.bf16 %v1760_v30, %v1758_v59  ;;  %v1583_v52 = vadd.f32 %v1582_v50, %v3751_v46  ;;  %v1761_v29 = vmax.f32 %v1581_v16, 0.0  ;;  %v3919_v16 = vrot.slane %v2382_v11, %v4292_v38 }
 0x260   : > { %v1584_v3 = vpop.f32.mrf.mxu1 }
 0x261   : > { %v1585_v20 = vadd.f32 %v1584_v3, %v3754_v49  ;;  %2204 = vmatprep.mubr.bf16.mxu0 %v1842_v36  ;;  %v1762_v31 = vmax.f32 %v1583_v52, 0.0 }
 0x262   : > { %v1586_v15 = vpop.f32.mrf.mxu1  ;;  %2205 = vmatmul.mubr.bf16.gmra.mxu0 %v1841_v4 }
 0x263   : > { %v1587_v19 = vadd.f32 %v1586_v15, %v3751_v46  ;;  %v1763_v1 = vmax.f32 %v1585_v20, 0.0 }
 0x264   : > { %v1590_v24 = vpop.f32.mrf.mxu1 }
 0x265   : > { %v1764_v44 = vmax.f32 %v1587_v19, 0.0  ;;  %v1843_v13 = vpack.c.bf16 %v1763_v1, %v1761_v29  ;;  %v1591_v41 = vadd.f32 %v1590_v24, %v3754_v49 }
 0x266   : > { %v1592_v6 = vpop.f32.mrf.mxu1 }
 0x267   : > { %v1844_v54 = vpack.c.bf16 %v1764_v44, %v1762_v31  ;;  %v1593_v42 = vadd.f32 %v1592_v6, %v3751_v46  ;;  %v1765_v34 = vmax.f32 %v1591_v41, 0.0 }
 0x268   : > { %v1594_v21 = vpop.f32.mrf.mxu1 }
 0x269   : > { %v1595_v53 = vadd.f32 %v1594_v21, %v3754_v49  ;;  %2212 = vmatprep.mubr.bf16.mxu0 %v1844_v54  ;;  %v1766_v45 = vmax.f32 %v1593_v42, 0.0 }
 0x26a   : > { %v1596_v14 = vpop.f32.mrf.mxu1  ;;  %2213 = vmatmul.mubr.bf16.gmra.mxu0 %v1843_v13 }
 0x26b   : > { %v1597_v62 = vadd.f32 %v1596_v14, %v3751_v46  ;;  %v1767_v27 = vmax.f32 %v1595_v53, 0.0 }
 0x26c   : > { %v1600_v55 = vpop.f32.mrf.mxu1 }
 0x26d   : > { %v1768_v37 = vmax.f32 %v1597_v62, 0.0  ;;  %v1845_v40 = vpack.c.bf16 %v1767_v27, %v1765_v34  ;;  %v1601_v8 = vadd.f32 %v1600_v55, %v3754_v49 }
 0x26e   : > { %v1602_v61 = vpop.f32.mrf.mxu1 }
 0x26f   : > { %v1846_v9 = vpack.c.bf16 %v1768_v37, %v1766_v45  ;;  %v1603_v12 = vadd.f32 %v1602_v61, %v3751_v46  ;;  %v1769_v18 = vmax.f32 %v1601_v8, 0.0 }
 0x270   : > { %v1604_v35 = vpop.f32.mrf.mxu1 }
 0x271   : > { %v1605_v10 = vadd.f32 %v1604_v35, %v3754_v49  ;;  %2220 = vmatprep.mubr.bf16.mxu0 %v1846_v9  ;;  %v1770_v23 = vmax.f32 %v1603_v12, 0.0 }
 0x272   : > { %v1606_v7 = vpop.f32.mrf.mxu1  ;;  %v2030_v47 = vpop.f32.mrf.mxu0  ;;  %2221 = vmatmul.mubr.bf16.gmra.mxu0 %v1845_v40 }
 0x273   : > { %v1607_v57 = vadd.f32 %v1606_v7, %v3751_v46  ;;  %v1771_v28 = vmax.f32 %v1605_v10, 0.0  ;;  %v2031_v51 = vadd.f32 %v3906_v43, %v2030_v47 }
 0x274   : > { %v1610_v22 = vpop.f32.mrf.mxu1  ;;  %v2032_v63 = vpop.f32.mrf.mxu0 }
 0x275   : > { %v1772_v56 = vmax.f32 %v1607_v57, 0.0  ;;  %v1847_v5 = vpack.c.bf16 %v1771_v28, %v1769_v18  ;;  %v2285_v39 = vmax.f32 %v2031_v51, 0.0  ;;  %v1611_v30 = vadd.f32 %v1610_v22, %v3754_v49 }
 0x276   : > { %v1612_v58 = vpop.f32.mrf.mxu1  ;;  %v2033_v48 = vpop.f32.mrf.mxu0 }
 0x277   : > { %v1848_v33 = vpack.c.bf16 %v1772_v56, %v1770_v23  ;;  %v2034_v17 = vadd.f32 %v3906_v43, %v2033_v48  ;;  %v1613_v32 = vadd.f32 %v1612_v58, %v3751_v46  ;;  %v1773_v24 = vmax.f32 %v1611_v30, 0.0 }
 0x278   : > { %v1614_v60 = vpop.f32.mrf.mxu1  ;;  %v2035_v0 = vpop.f32.mrf.mxu0 }
 0x279   : > { %v2286_v2 = vmax.f32 %v2034_v17, 0.0  ;;  %v1615_v59 = vadd.f32 %v1614_v60, %v3754_v49  ;;  %2228 = vmatprep.mubr.bf16.mxu0 %v1848_v33  ;;  %v1774_v15 = vmax.f32 %v1613_v32, 0.0 }
 0x27a   : > { %v1616_v25 = vpop.f32.mrf.mxu1  ;;  %v2038_v50 = vpop.f32.mrf.mxu0  ;;  %2229 = vmatmul.mubr.bf16.gmra.mxu0 %v1847_v5 }
 0x27b   : > { %v2349_v36 = vpack.c.bf16 %v2286_v2, %v2285_v39  ;;  %v1617_v4 = vadd.f32 %v1616_v25, %v3751_v46  ;;  %v1775_v3 = vmax.f32 %v1615_v59, 0.0  ;;  %v2039_v1 = vadd.f32 %v3906_v43, %v2038_v50 }
 0x27c   : > { %v1620_v52 = vpop.f32.mrf.mxu1  ;;  %v2040_v20 = vpop.f32.mrf.mxu0 }
 0x27d   : > { %v1776_v19 = vmax.f32 %v1617_v4, 0.0  ;;  %v2383_v29 = vunpack.c.l.bf16 %v2349_v36  ;;  %v1849_v13 = vpack.c.bf16 %v1775_v3, %v1773_v24  ;;  %v2384_v41 = vunpack.c.h.bf16 %v2349_v36 }
 0x27e   : > { %v1622_v31 = vpop.f32.mrf.mxu1  ;;  %v2041_v44 = vpop.f32.mrf.mxu0  ;;  %v2287_v14 = vmax.f32 %v2039_v1, 0.0  ;;  %v1621_v55 = vadd.f32 %v1620_v52, %v3754_v49 }
 0x27f   : > { %v1850_v6 = vpack.c.bf16 %v1776_v19, %v1774_v15  ;;  %v2042_v54 = vadd.f32 %v3906_v43, %v2041_v44  ;;  %v2451_v53 = vmul.f32 %v3919_v16, %v2383_v29  ;;  %v1623_v38 = vadd.f32 %v1622_v31, %v3751_v46 }
 0x280   : > { %v1624_v21 = vpop.f32.mrf.mxu1  ;;  %v2043_v42 = vpop.f32.mrf.mxu0  ;;  %v2452_v12 = vmul.f32 %v3919_v16, %v2384_v41  ;;  %v1777_v47 = vmax.f32 %v1621_v55, 0.0 }
 0x281   : > { %v2288_v62 = vmax.f32 %v2042_v54, 0.0  ;;  %v1625_v27 = vadd.f32 %v1624_v21, %v3754_v49  ;;  %2236 = vmatprep.mubr.bf16.mxu0 %v1850_v6  ;;  %2515 = vadd.xlane.f32.xlu0 %v2451_v53  ;;  %v1778_v10 = vmax.f32 %v1623_v38, 0.0 }
 0x282   : > { %v1626_v45 = vpop.f32.mrf.mxu1  ;;  %v2046_v37 = vpop.f32.mrf.mxu0  ;;  %2237 = vmatmul.mubr.bf16.gmra.mxu0 %v1849_v13 }
 0x283   : > { %v2350_v34 = vpack.c.bf16 %v2288_v62, %v2287_v14  ;;  %v1627_v61 = vadd.f32 %v1626_v45, %v3751_v46  ;;  %v1779_v9 = vmax.f32 %v1625_v27, 0.0  ;;  %v2047_v7 = vadd.f32 %v3906_v43, %v2046_v37 }
 0x284   : > { %v1630_v40 = vpop.f32.mrf.mxu1  ;;  %v2048_v35 = vpop.f32.mrf.mxu0 }
 0x285   : > { %v1780_v8 = vmax.f32 %v1627_v61, 0.0  ;;  %2517 = vadd.xlane.f32.xlu0 %v2452_v12  ;;  %v2385_v22 = vunpack.c.l.bf16 %v2350_v34  ;;  %v1851_v56 = vpack.c.bf16 %v1779_v9, %v1777_v47  ;;  %v2386_v58 = vunpack.c.h.bf16 %v2350_v34 }
 0x286   : > { %v1632_v57 = vpop.f32.mrf.mxu1  ;;  %v2049_v28 = vpop.f32.mrf.mxu0  ;;  %v2289_v48 = vmax.f32 %v2047_v7, 0.0  ;;  %v1631_v60 = vadd.f32 %v1630_v40, %v3754_v49 }
 0x287   : > { %v1852_v63 = vpack.c.bf16 %v1780_v8, %v1778_v10  ;;  %v2050_v23 = vadd.f32 %v3906_v43, %v2049_v28  ;;  %v2453_v18 = vmul.f32 %v3919_v16, %v2385_v22  ;;  %v1633_v33 = vadd.f32 %v1632_v57, %v3751_v46 }
 0x288   : > { %v1634_v51 = vpop.f32.mrf.mxu1  ;;  %v2051_v26 = vpop.f32.mrf.mxu0  ;;  %v2454_v25 = vmul.f32 %v3919_v16, %v2386_v58  ;;  %v1781_v3 = vmax.f32 %v1631_v60, 0.0 }
 0x289   : > { %v2290_v17 = vmax.f32 %v2050_v23, 0.0  ;;  %v1635_v5 = vadd.f32 %v1634_v51, %v3754_v49  ;;  %2244 = vmatprep.mubr.bf16.mxu0 %v1852_v63  ;;  %2519 = vadd.xlane.f32.xlu1 %v2453_v18  ;;  %v1782_v50 = vmax.f32 %v1633_v33, 0.0 }
 0x28a   : > { %v1636_v0 = vpop.f32.mrf.mxu1  ;;  %v2054_v11 = vpop.f32.mrf.mxu0  ;;  %2245 = vmatmul.mubr.bf16.gmra.mxu0 %v1851_v56 }
 0x28b   : > { %v2351_v39 = vpack.c.bf16 %v2290_v17, %v2289_v48  ;;  %v1637_v32 = vadd.f32 %v1636_v0, %v3751_v46  ;;  %v1783_v2 = vmax.f32 %v1635_v5, 0.0  ;;  %v2055_v4 = vadd.f32 %v3906_v43, %v2054_v11 }
 0x28c   : > { %v1640_v59 = vpop.f32.mrf.mxu1  ;;  %v2056_v30 = vpop.f32.mrf.mxu0 }
 0x28d   : > { %v1784_v36 = vmax.f32 %v1637_v32, 0.0  ;;  %2521 = vadd.xlane.f32.xlu1 %v2454_v25  ;;  %v2388_v15 = vunpack.c.h.bf16 %v2351_v39  ;;  %v2387_v19 = vunpack.c.l.bf16 %v2351_v39  ;;  %v1853_v31 = vpack.c.bf16 %v1783_v2, %v1781_v3 }
 0x28e   : > { %v1642_v52 = vpop.f32.mrf.mxu1  ;;  %v2057_v20 = vpop.f32.mrf.mxu0  ;;  %v2291_v13 = vmax.f32 %v2055_v4, 0.0  ;;  %v1641_v41 = vadd.f32 %v1640_v59, %v3754_v49 }
 0x28f   : > { %v1854_v1 = vpack.c.bf16 %v1784_v36, %v1782_v50  ;;  %v2058_v24 = vadd.f32 %v3906_v43, %v2057_v20  ;;  %v2456_v6 = vmul.f32 %v3919_v16, %v2388_v15  ;;  %v2455_v54 = vmul.f32 %v3919_v16, %v2387_v19 }
 0x290   : > { %v1644_v44 = vpop.f32.mrf.mxu1  ;;  %v2059_v29 = vpop.f32.mrf.mxu0  ;;  %v1643_v21 = vadd.f32 %v1642_v52, %v3751_v46  ;;  %v1785_v40 = vmax.f32 %v1641_v41, 0.0 }
 0x291   : > { %v2292_v42 = vmax.f32 %v2058_v24, 0.0  ;;  %v1645_v53 = vadd.f32 %v1644_v44, %v3754_v49  ;;  %2252 = vmatprep.mubr.bf16.mxu0 %v1854_v1  ;;  %2525 = vadd.xlane.f32.xlu1 %v2456_v6 }
 0x292   : > { %2523 = vadd.xlane.f32.xlu0 %v2455_v54  ;;  %v1646_v14 = vpop.f32.mrf.mxu1  ;;  %v2062_v38 = vpop.f32.mrf.mxu0  ;;  %2253 = vmatmul.mubr.bf16.gmra.mxu0 %v1853_v31  ;;  %v1786_v34 = vmax.f32 %v1643_v21, 0.0 }
 0x293   : > { %v2352_v62 = vpack.c.bf16 %v2292_v42, %v2291_v13  ;;  %v1647_v27 = vadd.f32 %v1646_v14, %v3751_v46  ;;  %v1787_v55 = vmax.f32 %v1645_v53, 0.0  ;;  %v2063_v9 = vadd.f32 %v3906_v43, %v2062_v38 }
 0x294   : > { %v1650_v45 = vpop.f32.mrf.mxu1  ;;  %v2064_v37 = vpop.f32.mrf.mxu0 }
 0x295   : > { %v1788_v61 = vmax.f32 %v1647_v27, 0.0  ;;  %v2390_v10 = vunpack.c.h.bf16 %v2352_v62  ;;  %v2389_v8 = vunpack.c.l.bf16 %v2352_v62  ;;  %v1855_v57 = vpack.c.bf16 %v1787_v55, %v1785_v40 }
 0x296   : > { %v1652_v35 = vpop.f32.mrf.mxu1  ;;  %v2065_v12 = vpop.f32.mrf.mxu0  ;;  %v2293_v56 = vmax.f32 %v2063_v9, 0.0  ;;  %v1651_v33 = vadd.f32 %v1650_v45, %v3754_v49 }
 0x297   : > { %v1856_v7 = vpack.c.bf16 %v1788_v61, %v1786_v34  ;;  %v2066_v47 = vadd.f32 %v3906_v43, %v2065_v12  ;;  %v2458_v63 = vmul.f32 %v3919_v16, %v2390_v10  ;;  %v2457_v23 = vmul.f32 %v3919_v16, %v2389_v8 }
 0x298   : > { %v1654_v28 = vpop.f32.mrf.mxu1  ;;  %v2067_v22 = vpop.f32.mrf.mxu0  ;;  %v1653_v51 = vadd.f32 %v1652_v35, %v3751_v46  ;;  %v1789_v36 = vmax.f32 %v1651_v33, 0.0 }
 0x299   : > { %v2294_v26 = vmax.f32 %v2066_v47, 0.0  ;;  %v1655_v18 = vadd.f32 %v1654_v28, %v3754_v49  ;;  %2260 = vmatprep.mubr.bf16.mxu0 %v1856_v7  ;;  %2529 = vadd.xlane.f32.xlu1 %v2458_v63 }
 0x29a   : > { %2527 = vadd.xlane.f32.xlu0 %v2457_v23  ;;  %v1656_v58 = vpop.f32.mrf.mxu1  ;;  %v2070_v48 = vpop.f32.mrf.mxu0  ;;  %2261 = vmatmul.mubr.bf16.gmra.mxu0 %v1855_v57  ;;  %v1790_v11 = vmax.f32 %v1653_v51, 0.0 }
 0x29b   : > { %v2353_v17 = vpack.c.bf16 %v2294_v26, %v2293_v56  ;;  %v1657_v5 = vadd.f32 %v1656_v58, %v3751_v46  ;;  %v1791_v39 = vmax.f32 %v1655_v18, 0.0  ;;  %v2071_v2 = vadd.f32 %v3906_v43, %v2070_v48 }
 0x29c   : > { %v1660_v60 = vpop.f32.mrf.mxu1  ;;  %v2072_v0 = vpop.f32.mrf.mxu0 }
 0x29d   : > { %v1792_v32 = vmax.f32 %v1657_v5, 0.0  ;;  %v2392_v25 = vunpack.c.h.bf16 %v2353_v17  ;;  %v2391_v50 = vunpack.c.l.bf16 %v2353_v17  ;;  %v1857_v24 = vpack.c.bf16 %v1791_v39, %v1789_v36 }
 0x29e   : > { %v1662_v59 = vpop.f32.mrf.mxu1  ;;  %v2073_v30 = vpop.f32.mrf.mxu0  ;;  %v2295_v31 = vmax.f32 %v2071_v2, 0.0  ;;  %v1661_v13 = vadd.f32 %v1660_v60, %v3754_v49 }
 0x29f   : > { %v1858_v4 = vpack.c.bf16 %v1792_v32, %v1790_v11  ;;  %v2074_v3 = vadd.f32 %v3906_v43, %v2073_v30  ;;  %v1663_v52 = vadd.f32 %v1662_v59, %v3751_v46  ;;  %v2460_v19 = vmul.f32 %v3919_v16, %v2392_v25 }
 0x2a0   : > { %v1664_v20 = vpop.f32.mrf.mxu1  ;;  %v2075_v15 = vpop.f32.mrf.mxu0  ;;  %v2459_v1 = vmul.f32 %v3919_v16, %v2391_v50  ;;  %v1793_v37 = vmax.f32 %v1661_v13, 0.0 }
 0x2a1   : > { %v2296_v44 = vmax.f32 %v2074_v3, 0.0  ;;  %v1665_v29 = vadd.f32 %v1664_v20, %v3754_v49  ;;  %2268 = vmatprep.mubr.bf16.mxu0 %v1858_v4  ;;  %2533 = vadd.xlane.f32.xlu1 %v2460_v19  ;;  %v1794_v53 = vmax.f32 %v1663_v52, 0.0 }
 0x2a2   : > { %2531 = vadd.xlane.f32.xlu0 %v2459_v1  ;;  %v1666_v6 = vpop.f32.mrf.mxu1  ;;  %v2078_v54 = vpop.f32.mrf.mxu0  ;;  %2269 = vmatmul.mubr.bf16.gmra.mxu0 %v1857_v24 }
 0x2a3   : > { %v2354_v21 = vpack.c.bf16 %v2296_v44, %v2295_v31  ;;  %v1667_v42 = vadd.f32 %v1666_v6, %v3751_v46  ;;  %v1795_v14 = vmax.f32 %v1665_v29, 0.0  ;;  %v2079_v62 = vadd.f32 %v3906_v43, %v2078_v54 }
 0x2a4   : > { %v2080_v41 = vpop.f32.mrf.mxu0 }
 0x2a5   : > { %v1796_v38 = vmax.f32 %v1667_v42, 0.0  ;;  %v2394_v27 = vunpack.c.h.bf16 %v2354_v21  ;;  %v2393_v45 = vunpack.c.l.bf16 %v2354_v21  ;;  %v1859_v46 = vpack.c.bf16 %v1795_v14, %v1793_v37 }
 0x2a6   : > { %v2081_v55 = vpop.f32.mrf.mxu0  ;;  %v2297_v35 = vmax.f32 %v2079_v62, 0.0 }
 0x2a7   : > { %v1860_v34 = vpack.c.bf16 %v1796_v38, %v1794_v53  ;;  %v2082_v61 = vadd.f32 %v3906_v43, %v2081_v55  ;;  %v2462_v9 = vmul.f32 %v3919_v16, %v2394_v27  ;;  %v2461_v40 = vmul.f32 %v3919_v16, %v2393_v45 }
 0x2a8   : > { %v2083_v49 = vpop.f32.mrf.mxu0 }
 0x2a9   : > { %v2298_v12 = vmax.f32 %v2082_v61, 0.0  ;;  %2276 = vmatprep.mubr.bf16.mxu0 %v1860_v34  ;;  %2537 = vadd.xlane.f32.xlu1 %v2462_v9 }
 0x2aa   : > { %2535 = vadd.xlane.f32.xlu0 %v2461_v40  ;;  %v2086_v10 = vpop.f32.mrf.mxu0  ;;  %2277 = vmatmul.mubr.bf16.gmra.mxu0 %v1859_v46 }
 0x2ab   : > { %v2355_v8 = vpack.c.bf16 %v2298_v12, %v2297_v35  ;;  %v2087_v47 = vadd.f32 %v3906_v43, %v2086_v10 }
 0x2ac   : > { %v2088_v7 = vpop.f32.mrf.mxu0 }
 0x2ad   : > { %v2396_v57 = vunpack.c.h.bf16 %v2355_v8  ;;  %v2395_v28 = vunpack.c.l.bf16 %v2355_v8  ;;  %v2299_v26 = vmax.f32 %v2087_v47, 0.0 }
 0x2ae   : > { %v2089_v22 = vpop.f32.mrf.mxu0 }
 0x2af   : > { %v2090_v63 = vadd.f32 %v3906_v43, %v2089_v22  ;;  %v2464_v23 = vmul.f32 %v3919_v16, %v2396_v57  ;;  %v2463_v56 = vmul.f32 %v3919_v16, %v2395_v28 }
 0x2b0   : > { %v2091_v51 = vpop.f32.mrf.mxu0 }
 0x2b1   : > { %v2300_v18 = vmax.f32 %v2090_v63, 0.0  ;;  %2541 = vadd.xlane.f32.xlu1 %v2464_v23  ;;  %2539 = vadd.xlane.f32.xlu0 %v2463_v56 }
 0x2b2   : > { %v2094_v58 = vpop.f32.mrf.mxu0 }
 0x2b3   : > { %v2356_v48 = vpack.c.bf16 %v2300_v18, %v2299_v26  ;;  %v2095_v17 = vadd.f32 %v3906_v43, %v2094_v58 }
 0x2b4   : > { %v2096_v33 = vpop.f32.mrf.mxu0 }
 0x2b5   : > { %v2398_v5 = vunpack.c.h.bf16 %v2356_v48  ;;  %v2397_v60 = vunpack.c.l.bf16 %v2356_v48  ;;  %v2301_v59 = vmax.f32 %v2095_v17, 0.0 }
 0x2b6   : > { %v2097_v0 = vpop.f32.mrf.mxu0 }
 0x2b7   : > { %v2098_v11 = vadd.f32 %v3906_v43, %v2097_v0  ;;  %v2466_v39 = vmul.f32 %v3919_v16, %v2398_v5  ;;  %v2465_v32 = vmul.f32 %v3919_v16, %v2397_v60 }
 0x2b8   : > { %v2099_v2 = vpop.f32.mrf.mxu0 }
 0x2b9   : > { %v2302_v30 = vmax.f32 %v2098_v11, 0.0  ;;  %2545 = vadd.xlane.f32.xlu1 %v2466_v39  ;;  %2543 = vadd.xlane.f32.xlu0 %v2465_v32 }
 0x2ba   : > { %v2102_v25 = vpop.f32.mrf.mxu0 }
 0x2bb   : > { %v2357_v50 = vpack.c.bf16 %v2302_v30, %v2301_v59  ;;  %v2103_v4 = vadd.f32 %v3906_v43, %v2102_v25 }
 0x2bc   : > { %v2104_v36 = vpop.f32.mrf.mxu0 }
 0x2bd   : > { %v2400_v3 = vunpack.c.h.bf16 %v2357_v50  ;;  %v2399_v52 = vunpack.c.l.bf16 %v2357_v50  ;;  %v2303_v31 = vmax.f32 %v2103_v4, 0.0 }
 0x2be   : > { %v2105_v20 = vpop.f32.mrf.mxu0 }
 0x2bf   : > { %v2106_v15 = vadd.f32 %v3906_v43, %v2105_v20  ;;  %v2468_v19 = vmul.f32 %v3919_v16, %v2400_v3  ;;  %v2467_v1 = vmul.f32 %v3919_v16, %v2399_v52 }
 0x2c0   : > { %v2107_v24 = vpop.f32.mrf.mxu0 }
 0x2c1   : > { %v2304_v44 = vmax.f32 %v2106_v15, 0.0  ;;  %2549 = vadd.xlane.f32.xlu1 %v2468_v19  ;;  %2547 = vadd.xlane.f32.xlu0 %v2467_v1 }
 0x2c2   : > { %v2110_v29 = vpop.f32.mrf.mxu0 }
 0x2c3   : > { %v2358_v6 = vpack.c.bf16 %v2304_v44, %v2303_v31  ;;  %v2111_v13 = vadd.f32 %v3906_v43, %v2110_v29 }
 0x2c4   : > { %v2112_v54 = vpop.f32.mrf.mxu0 }
 0x2c5   : > { %v2402_v21 = vunpack.c.h.bf16 %v2358_v6  ;;  %v2401_v42 = vunpack.c.l.bf16 %v2358_v6  ;;  %v2305_v27 = vmax.f32 %v2111_v13, 0.0 }
 0x2c6   : > { %v2113_v53 = vpop.f32.mrf.mxu0 }
 0x2c7   : > { %v2114_v41 = vadd.f32 %v3906_v43, %v2113_v53  ;;  %v2470_v14 = vmul.f32 %v3919_v16, %v2402_v21  ;;  %v2469_v38 = vmul.f32 %v3919_v16, %v2401_v42 }
 0x2c8   : > { %v2115_v62 = vpop.f32.mrf.mxu0 }
 0x2c9   : > { %v2306_v55 = vmax.f32 %v2114_v41, 0.0  ;;  %2553 = vadd.xlane.f32.xlu1 %v2470_v14  ;;  %2551 = vadd.xlane.f32.xlu0 %v2469_v38 }
 0x2ca   : > { %v2118_v45 = vpop.f32.mrf.mxu0 }
 0x2cb   : > { %v2359_v37 = vpack.c.bf16 %v2306_v55, %v2305_v27  ;;  %v2119_v61 = vadd.f32 %v3906_v43, %v2118_v45 }
 0x2cc   : > { %v2120_v34 = vpop.f32.mrf.mxu0 }
 0x2cd   : > { %v2404_v9 = vunpack.c.h.bf16 %v2359_v37  ;;  %v2403_v49 = vunpack.c.l.bf16 %v2359_v37  ;;  %v2307_v8 = vmax.f32 %v2119_v61, 0.0 }
 0x2ce   : > { %v2121_v40 = vpop.f32.mrf.mxu0 }
 0x2cf   : > { %v2122_v46 = vadd.f32 %v3906_v43, %v2121_v40  ;;  %v2472_v35 = vmul.f32 %v3919_v16, %v2404_v9  ;;  %v2471_v12 = vmul.f32 %v3919_v16, %v2403_v49 }
 0x2d0   : > { %v2123_v10 = vpop.f32.mrf.mxu0 }
 0x2d1   : > { %v2308_v7 = vmax.f32 %v2122_v46, 0.0  ;;  %2557 = vadd.xlane.f32.xlu1 %v2472_v35  ;;  %2555 = vadd.xlane.f32.xlu0 %v2471_v12 }
 0x2d2   : > { %v2126_v47 = vpop.f32.mrf.mxu0 }
 0x2d3   : > { %v2360_v57 = vpack.c.bf16 %v2308_v7, %v2307_v8  ;;  %v2127_v22 = vadd.f32 %v3906_v43, %v2126_v47 }
 0x2d4   : > { %v2128_v28 = vpop.f32.mrf.mxu0 }
 0x2d5   : > { %v2406_v63 = vunpack.c.h.bf16 %v2360_v57  ;;  %v2405_v23 = vunpack.c.l.bf16 %v2360_v57  ;;  %v2309_v48 = vmax.f32 %v2127_v22, 0.0 }
 0x2d6   : > { %v2129_v56 = vpop.f32.mrf.mxu0 }
 0x2d7   : > { %v2130_v51 = vadd.f32 %v3906_v43, %v2129_v56  ;;  %v2474_v26 = vmul.f32 %v3919_v16, %v2406_v63  ;;  %v2473_v18 = vmul.f32 %v3919_v16, %v2405_v23 }
 0x2d8   : > { %v2131_v58 = vpop.f32.mrf.mxu0 }
 0x2d9   : > { %v2310_v33 = vmax.f32 %v2130_v51, 0.0  ;;  %2561 = vadd.xlane.f32.xlu1 %v2474_v26  ;;  %2559 = vadd.xlane.f32.xlu0 %v2473_v18 }
 0x2da   : > { %v2134_v17 = vpop.f32.mrf.mxu0 }
 0x2db   : > { %v2361_v5 = vpack.c.bf16 %v2310_v33, %v2309_v48  ;;  %v2135_v0 = vadd.f32 %v3906_v43, %v2134_v17 }
 0x2dc   : > { %v2136_v60 = vpop.f32.mrf.mxu0 }
 0x2dd   : > { %v2408_v11 = vunpack.c.h.bf16 %v2361_v5  ;;  %v2407_v39 = vunpack.c.l.bf16 %v2361_v5  ;;  %v2311_v50 = vmax.f32 %v2135_v0, 0.0 }
 0x2de   : > { %v2137_v32 = vpop.f32.mrf.mxu0 }
 0x2df   : > { %v2138_v2 = vadd.f32 %v3906_v43, %v2137_v32  ;;  %v2476_v59 = vmul.f32 %v3919_v16, %v2408_v11  ;;  %v2475_v30 = vmul.f32 %v3919_v16, %v2407_v39 }
 0x2e0   : > { %v2139_v25 = vpop.f32.mrf.mxu0 }
 0x2e1   : > { %v2312_v36 = vmax.f32 %v2138_v2, 0.0  ;;  %2565 = vadd.xlane.f32.xlu1 %v2476_v59  ;;  %2563 = vadd.xlane.f32.xlu0 %v2475_v30 }
 0x2e2   : > { %v2142_v4 = vpop.f32.mrf.mxu0 }
 0x2e3   : > { %v2362_v3 = vpack.c.bf16 %v2312_v36, %v2311_v50  ;;  %v2143_v20 = vadd.f32 %v3906_v43, %v2142_v4 }
 0x2e4   : > { %v2144_v52 = vpop.f32.mrf.mxu0 }
 0x2e5   : > { %v2410_v15 = vunpack.c.h.bf16 %v2362_v3  ;;  %v2409_v19 = vunpack.c.l.bf16 %v2362_v3  ;;  %v2313_v6 = vmax.f32 %v2143_v20, 0.0  ;;  %v4013_v20 = vstv %s2643_s17 }
 0x2e6   : > { %v2145_v1 = vpop.f32.mrf.mxu0 }
 0x2e7   : > { %v2146_v24 = vadd.f32 %v3906_v43, %v2145_v1  ;;  %v2478_v31 = vmul.f32 %v3919_v16, %v2410_v15  ;;  %v2477_v44 = vmul.f32 %v3919_v16, %v2409_v19 }
 0x2e8   : > { %v2147_v29 = vpop.f32.mrf.mxu0 }
 0x2e9   : > { %v2314_v54 = vmax.f32 %v2146_v24, 0.0  ;;  %2569 = vadd.xlane.f32.xlu1 %v2478_v31  ;;  %2567 = vadd.xlane.f32.xlu0 %v2477_v44 }
 0x2ea   : > { %v2150_v13 = vpop.f32.mrf.mxu0 }
 0x2eb   : > { %v2363_v21 = vpack.c.bf16 %v2314_v54, %v2313_v6  ;;  %v2151_v53 = vadd.f32 %v3906_v43, %v2150_v13 }
 0x2ec   : > { %v2152_v42 = vpop.f32.mrf.mxu0 }
 0x2ed   : > { %v2412_v41 = vunpack.c.h.bf16 %v2363_v21  ;;  %v2411_v14 = vunpack.c.l.bf16 %v2363_v21  ;;  %v2315_v37 = vmax.f32 %v2151_v53, 0.0 }
 0x2ee   : > { %v2153_v38 = vpop.f32.mrf.mxu0 }
 0x2ef   : > { %v2154_v62 = vadd.f32 %v3906_v43, %v2153_v38  ;;  %v2480_v27 = vmul.f32 %v3919_v16, %v2412_v41  ;;  %v2479_v55 = vmul.f32 %v3919_v16, %v2411_v14 }
 0x2f0   : > { %v2155_v45 = vpop.f32.mrf.mxu0 }
 0x2f1   : > { %v2316_v34 = vmax.f32 %v2154_v62, 0.0  ;;  %2573 = vadd.xlane.f32.xlu1 %v2480_v27  ;;  %2571 = vadd.xlane.f32.xlu0 %v2479_v55 }
 0x2f2   : > { %v2158_v61 = vpop.f32.mrf.mxu0 }
 0x2f3   : > { %v2364_v9 = vpack.c.bf16 %v2316_v34, %v2315_v37  ;;  %v2159_v40 = vadd.f32 %v3906_v43, %v2158_v61 }
 0x2f4   : > { %v2160_v49 = vpop.f32.mrf.mxu0 }
 0x2f5   : > { %v2414_v46 = vunpack.c.h.bf16 %v2364_v9  ;;  %v2413_v35 = vunpack.c.l.bf16 %v2364_v9  ;;  %v2317_v57 = vmax.f32 %v2159_v40, 0.0 }
 0x2f6   : > { %v2161_v12 = vpop.f32.mrf.mxu0 }
 0x2f7   : > { %v2162_v10 = vadd.f32 %v3906_v43, %v2161_v12  ;;  %v2482_v8 = vmul.f32 %v3919_v16, %v2414_v46  ;;  %v2481_v7 = vmul.f32 %v3919_v16, %v2413_v35 }
 0x2f8   : > { %v2163_v47 = vpop.f32.mrf.mxu0 }
 0x2f9   : > { %v2318_v28 = vmax.f32 %v2162_v10, 0.0  ;;  %2577 = vadd.xlane.f32.xlu1 %v2482_v8  ;;  %2575 = vadd.xlane.f32.xlu0 %v2481_v7 }
 0x2fa   : > { %v2166_v22 = vpop.f32.mrf.mxu0 }
 0x2fb   : > { %v2365_v63 = vpack.c.bf16 %v2318_v28, %v2317_v57  ;;  %v2167_v56 = vadd.f32 %v3906_v43, %v2166_v22 }
 0x2fc   : > { %v2168_v23 = vpop.f32.mrf.mxu0 }
 0x2fd   : > { %v2416_v51 = vunpack.c.h.bf16 %v2365_v63  ;;  %v2415_v26 = vunpack.c.l.bf16 %v2365_v63  ;;  %v2319_v5 = vmax.f32 %v2167_v56, 0.0 }
 0x2fe   : > { %v2169_v18 = vpop.f32.mrf.mxu0 }
 0x2ff   : > { %v2170_v58 = vadd.f32 %v3906_v43, %v2169_v18  ;;  %v2484_v48 = vmul.f32 %v3919_v16, %v2416_v51  ;;  %v2483_v33 = vmul.f32 %v3919_v16, %v2415_v26 }
 0x300   : > { %v2171_v17 = vpop.f32.mrf.mxu0 }
 0x301   : > { %v2320_v60 = vmax.f32 %v2170_v58, 0.0  ;;  %2581 = vadd.xlane.f32.xlu1 %v2484_v48  ;;  %2579 = vadd.xlane.f32.xlu0 %v2483_v33 }
 0x302   : > { %v2174_v0 = vpop.f32.mrf.mxu0 }
 0x303   : > { %v2366_v11 = vpack.c.bf16 %v2320_v60, %v2319_v5  ;;  %v2175_v32 = vadd.f32 %v3906_v43, %v2174_v0 }
 0x304   : > { %v2176_v39 = vpop.f32.mrf.mxu0 }
 0x305   : > { %v2418_v2 = vunpack.c.h.bf16 %v2366_v11  ;;  %v2417_v59 = vunpack.c.l.bf16 %v2366_v11  ;;  %v2321_v3 = vmax.f32 %v2175_v32, 0.0 }
 0x306   : > { %v2177_v30 = vpop.f32.mrf.mxu0 }
 0x307   : > { %v2178_v25 = vadd.f32 %v3906_v43, %v2177_v30  ;;  %v2486_v50 = vmul.f32 %v3919_v16, %v2418_v2  ;;  %v2485_v36 = vmul.f32 %v3919_v16, %v2417_v59 }
 0x308   : > { %v2179_v4 = vpop.f32.mrf.mxu0 }
 0x309   : > { %v2322_v52 = vmax.f32 %v2178_v25, 0.0  ;;  %2585 = vadd.xlane.f32.xlu1 %v2486_v50  ;;  %2583 = vadd.xlane.f32.xlu0 %v2485_v36 }
 0x30a   : > { %v2182_v15 = vpop.f32.mrf.mxu0  ;;  %v2516_v1 = vpop.xlane.xlu0 %2515 }
 0x30b   : > { %v2367_v19 = vpack.c.bf16 %v2322_v52, %v2321_v3  ;;  %v2645_v24 = vadd.f32 %v4013_v20, %v2516_v1  ;;  %v2183_v44 = vadd.f32 %v3906_v43, %v2182_v15 }
 0x30c   : > { %v2184_v31 = vpop.f32.mrf.mxu0 }
 0x30d   : > { %v2420_v29 = vunpack.c.h.bf16 %v2367_v19  ;;  %v2419_v6 = vunpack.c.l.bf16 %v2367_v19  ;;  %v2709_v54 = vmax.f32 %v2645_v24, 0.0  ;;  %v2323_v62 = vmax.f32 %v2183_v44, 0.0 }
 0x30e   : > { %v2185_v13 = vpop.f32.mrf.mxu0  ;;  %v2518_v42 = vpop.xlane.xlu0 %2517 }
 0x30f   : > { %v2186_v21 = vadd.f32 %v3906_v43, %v2185_v13  ;;  %v2488_v53 = vmul.f32 %v3919_v16, %v2420_v29  ;;  %v2487_v41 = vmul.f32 %v3919_v16, %v2419_v6  ;;  %2774 = vst.msk [vmem:[%s4022_s20] sm:$0xff] %vm2773_vm1, %v2709_v54  ;;  %v2646_v14 = vadd.f32 %v4013_v20, %v2518_v42 }
 0x310   : > { %v2187_v38 = vpop.f32.mrf.mxu0 }
 0x311   : > { %v2324_v27 = vmax.f32 %v2186_v21, 0.0  ;;  %2589 = vadd.xlane.f32.xlu1 %v2488_v53  ;;  %2587 = vadd.xlane.f32.xlu0 %v2487_v41  ;;  %v2710_v55 = vmax.f32 %v2646_v14, 0.0 }
 0x312   : > { %v2190_v45 = vpop.f32.mrf.mxu0  ;;  %v2520_v34 = vpop.xlane.xlu1 %2519 }
 0x313   : > { %v2368_v37 = vpack.c.bf16 %v2324_v27, %v2323_v62  ;;  %2775 = vst.msk [vmem:[%s4022_s20 + $0x8] sm:$0xff] %vm2773_vm1, %v2710_v55  ;;  %v2647_v61 = vadd.f32 %v4013_v20, %v2520_v34  ;;  %v2191_v49 = vadd.f32 %v3906_v43, %v2190_v45 }
 0x314   : > { %v2192_v9 = vpop.f32.mrf.mxu0 }
 0x315   : > { %v2422_v40 = vunpack.c.h.bf16 %v2368_v37  ;;  %v2421_v46 = vunpack.c.l.bf16 %v2368_v37  ;;  %v2711_v35 = vmax.f32 %v2647_v61, 0.0  ;;  %v2325_v22 = vmax.f32 %v2191_v49, 0.0 }
 0x316   : > { %v2193_v12 = vpop.f32.mrf.mxu0  ;;  %v2522_v8 = vpop.xlane.xlu1 %2521 }
 0x317   : > { %v2194_v10 = vadd.f32 %v3906_v43, %v2193_v12  ;;  %v2490_v7 = vmul.f32 %v3919_v16, %v2422_v40  ;;  %v2489_v47 = vmul.f32 %v3919_v16, %v2421_v46  ;;  %2776 = vst.msk [vmem:[%s4022_s20 + $0x10] sm:$0xff] %vm2773_vm1, %v2711_v35  ;;  %v2648_v57 = vadd.f32 %v4013_v20, %v2522_v8 }
 0x318   : > { %v2195_v28 = vpop.f32.mrf.mxu0 }
 0x319   : > { %v2326_v63 = vmax.f32 %v2194_v10, 0.0  ;;  %2593 = vadd.xlane.f32.xlu1 %v2490_v7  ;;  %2591 = vadd.xlane.f32.xlu0 %v2489_v47  ;;  %v2712_v23 = vmax.f32 %v2648_v57, 0.0 }
 0x31a   : > { %v2198_v56 = vpop.f32.mrf.mxu0  ;;  %v2526_v26 = vpop.xlane.xlu1 %2525 }
 0x31b   : > { %v2369_v51 = vpack.c.bf16 %v2326_v63, %v2325_v22  ;;  %v2524_v18 = vpop.xlane.xlu0 %2523  ;;  %2777 = vst.msk [vmem:[%s4022_s20 + $0x18] sm:$0xff] %vm2773_vm1, %v2712_v23  ;;  %v2650_v58 = vadd.f32 %v4013_v20, %v2526_v26  ;;  %v2199_v17 = vadd.f32 %v3906_v43, %v2198_v56  ;;  %v4077_v26 = vld [vmem:[%s4282_s6] ss:$0 sm:$0xff] }
 0x31c   : > { %v2649_v48 = vadd.f32 %v4013_v20, %v2524_v18  ;;  %v2200_v33 = vpop.f32.mrf.mxu0 }
 0x31d   : > { %v2424_v5 = vunpack.c.h.bf16 %v2369_v51  ;;  %v2423_v60 = vunpack.c.l.bf16 %v2369_v51  ;;  %v2714_v0 = vmax.f32 %v2650_v58, 0.0  ;;  %v2327_v25 = vmax.f32 %v2199_v17, 0.0 }
 0x31e   : > { %v2713_v11 = vmax.f32 %v2649_v48, 0.0  ;;  %v2201_v39 = vpop.f32.mrf.mxu0 }
 0x31f   : > { %v2202_v32 = vadd.f32 %v3906_v43, %v2201_v39  ;;  %v2492_v2 = vmul.f32 %v3919_v16, %v2424_v5  ;;  %v2491_v59 = vmul.f32 %v3919_v16, %v2423_v60  ;;  %2779 = vst.msk [vmem:[%s4022_s20 + $0x28] sm:$0xff] %vm2773_vm1, %v2714_v0 }
 0x320   : > { %2778 = vst.msk [vmem:[%s4022_s20 + $0x20] sm:$0xff] %vm2773_vm1, %v2713_v11  ;;  %v2203_v30 = vpop.f32.mrf.mxu0 }
 0x321   : > { %v2328_v50 = vmax.f32 %v2202_v32, 0.0  ;;  %2597 = vadd.xlane.f32.xlu1 %v2492_v2  ;;  %2595 = vadd.xlane.f32.xlu0 %v2491_v59 }
 0x322   : > { %v2206_v36 = vpop.f32.mrf.mxu0  ;;  %v2530_v3 = vpop.xlane.xlu1 %2529 }
 0x323   : > { %v2370_v4 = vpack.c.bf16 %v2328_v50, %v2327_v25  ;;  %v2528_v52 = vpop.xlane.xlu0 %2527  ;;  %v2652_v15 = vadd.f32 %v4013_v20, %v2530_v3  ;;  %v2207_v24 = vadd.f32 %v3906_v43, %v2206_v36 }
 0x324   : > { %v2651_v19 = vadd.f32 %v4013_v20, %v2528_v52  ;;  %v2208_v1 = vpop.f32.mrf.mxu0 }
 0x325   : > { %v2426_v31 = vunpack.c.h.bf16 %v2370_v4  ;;  %v2425_v44 = vunpack.c.l.bf16 %v2370_v4  ;;  %v2716_v29 = vmax.f32 %v2652_v15, 0.0  ;;  %v2329_v41 = vmax.f32 %v2207_v24, 0.0 }
 0x326   : > { %v2715_v6 = vmax.f32 %v2651_v19, 0.0  ;;  %v2209_v54 = vpop.f32.mrf.mxu0 }
 0x327   : > { %v2210_v13 = vadd.f32 %v3906_v43, %v2209_v54  ;;  %v2494_v21 = vmul.f32 %v3919_v16, %v2426_v31  ;;  %v2493_v42 = vmul.f32 %v3919_v16, %v2425_v44  ;;  %2781 = vst.msk [vmem:[%s4022_s20 + $0x38] sm:$0xff] %vm2773_vm1, %v2716_v29 }
 0x328   : > { %2780 = vst.msk [vmem:[%s4022_s20 + $0x30] sm:$0xff] %vm2773_vm1, %v2715_v6  ;;  %v2211_v53 = vpop.f32.mrf.mxu0 }
 0x329   : > { %v2330_v14 = vmax.f32 %v2210_v13, 0.0  ;;  %2601 = vadd.xlane.f32.xlu1 %v2494_v21  ;;  %2599 = vadd.xlane.f32.xlu0 %v2493_v42 }
 0x32a   : > { %v2214_v38 = vpop.f32.mrf.mxu0  ;;  %v2534_v27 = vpop.xlane.xlu1 %2533 }
 0x32b   : > { %v2371_v62 = vpack.c.bf16 %v2330_v14, %v2329_v41  ;;  %v2532_v55 = vpop.xlane.xlu0 %2531  ;;  %v2654_v45 = vadd.f32 %v4013_v20, %v2534_v27  ;;  %v2215_v61 = vadd.f32 %v3906_v43, %v2214_v38 }
 0x32c   : > { %v2653_v37 = vadd.f32 %v4013_v20, %v2532_v55  ;;  %v2216_v34 = vpop.f32.mrf.mxu0 }
 0x32d   : > { %v2428_v9 = vunpack.c.h.bf16 %v2371_v62  ;;  %v2427_v49 = vunpack.c.l.bf16 %v2371_v62  ;;  %v2718_v40 = vmax.f32 %v2654_v45, 0.0  ;;  %v2331_v47 = vmax.f32 %v2215_v61, 0.0 }
 0x32e   : > { %v2717_v46 = vmax.f32 %v2653_v37, 0.0  ;;  %v2217_v35 = vpop.f32.mrf.mxu0 }
 0x32f   : > { %v2218_v12 = vadd.f32 %v3906_v43, %v2217_v35  ;;  %v2496_v10 = vmul.f32 %v3919_v16, %v2428_v9  ;;  %v2495_v8 = vmul.f32 %v3919_v16, %v2427_v49  ;;  %2783 = vst.msk [vmem:[%s4022_s20 + $0x48] sm:$0xff] %vm2773_vm1, %v2718_v40 }
 0x330   : > { %2782 = vst.msk [vmem:[%s4022_s20 + $0x40] sm:$0xff] %vm2773_vm1, %v2717_v46  ;;  %v2219_v7 = vpop.f32.mrf.mxu0 }
 0x331   : > { %v2332_v57 = vmax.f32 %v2218_v12, 0.0  ;;  %2605 = vadd.xlane.f32.xlu1 %v2496_v10  ;;  %2603 = vadd.xlane.f32.xlu0 %v2495_v8 }
 0x332   : > { %v2222_v28 = vpop.f32.mrf.mxu0  ;;  %v2538_v22 = vpop.xlane.xlu1 %2537 }
 0x333   : > { %v2372_v63 = vpack.c.bf16 %v2332_v57, %v2331_v47  ;;  %v2656_v43 = vadd.f32 %v4013_v20, %v2538_v22  ;;  %v2536_v23 = vpop.xlane.xlu0 %2535  ;;  %v2223_v18 = vadd.f32 %v4077_v26, %v2222_v28 }
 0x334   : > { %v2655_v56 = vadd.f32 %v4013_v20, %v2536_v23  ;;  %v2224_v51 = vpop.f32.mrf.mxu0 }
 0x335   : > { %v2720_v58 = vmax.f32 %v2656_v43, 0.0  ;;  %v2430_v48 = vunpack.c.h.bf16 %v2372_v63  ;;  %v2429_v33 = vunpack.c.l.bf16 %v2372_v63  ;;  %v2333_v32 = vmax.f32 %v2223_v18, 0.0 }
 0x336   : > { %v2719_v17 = vmax.f32 %v2655_v56, 0.0  ;;  %v2225_v5 = vpop.f32.mrf.mxu0 }
 0x337   : > { %2785 = vst.msk [vmem:[%s4022_s20 + $0x58] sm:$0xff] %vm2773_vm1, %v2720_v58  ;;  %v2226_v60 = vadd.f32 %v4077_v26, %v2225_v5  ;;  %v2498_v0 = vmul.f32 %v3919_v16, %v2430_v48  ;;  %v2497_v11 = vmul.f32 %v3919_v16, %v2429_v33 }
 0x338   : > { %2784 = vst.msk [vmem:[%s4022_s20 + $0x50] sm:$0xff] %vm2773_vm1, %v2719_v17  ;;  %v2227_v39 = vpop.f32.mrf.mxu0 }
 0x339   : > { %v2334_v2 = vmax.f32 %v2226_v60, 0.0  ;;  %2609 = vadd.xlane.f32.xlu1 %v2498_v0  ;;  %2607 = vadd.xlane.f32.xlu0 %v2497_v11 }
 0x33a   : > { %v2230_v59 = vpop.f32.mrf.mxu0  ;;  %v2542_v30 = vpop.xlane.xlu1 %2541 }
 0x33b   : > { %v2373_v25 = vpack.c.bf16 %v2334_v2, %v2333_v32  ;;  %v2658_v50 = vadd.f32 %v4013_v20, %v2542_v30  ;;  %v2540_v36 = vpop.xlane.xlu0 %2539  ;;  %v2231_v52 = vadd.f32 %v4077_v26, %v2230_v59 }
 0x33c   : > { %v2657_v4 = vadd.f32 %v4013_v20, %v2540_v36  ;;  %v2232_v3 = vpop.f32.mrf.mxu0 }
 0x33d   : > { %v2722_v15 = vmax.f32 %v2658_v50, 0.0  ;;  %v2432_v19 = vunpack.c.h.bf16 %v2373_v25  ;;  %v2431_v1 = vunpack.c.l.bf16 %v2373_v25  ;;  %v2335_v13 = vmax.f32 %v2231_v52, 0.0 }
 0x33e   : > { %v2721_v24 = vmax.f32 %v2657_v4, 0.0  ;;  %v2233_v31 = vpop.f32.mrf.mxu0 }
 0x33f   : > { %2787 = vst.msk [vmem:[%s4022_s20 + $0x68] sm:$0xff] %vm2773_vm1, %v2722_v15  ;;  %v2234_v44 = vadd.f32 %v4077_v26, %v2233_v31  ;;  %v2500_v29 = vmul.f32 %v3919_v16, %v2432_v19  ;;  %v2499_v6 = vmul.f32 %v3919_v16, %v2431_v1 }
 0x340   : > { %2786 = vst.msk [vmem:[%s4022_s20 + $0x60] sm:$0xff] %vm2773_vm1, %v2721_v24  ;;  %v2235_v54 = vpop.f32.mrf.mxu0 }
 0x341   : > { %v2336_v21 = vmax.f32 %v2234_v44, 0.0  ;;  %2613 = vadd.xlane.f32.xlu1 %v2500_v29  ;;  %2611 = vadd.xlane.f32.xlu0 %v2499_v6 }
 0x342   : > { %v2238_v42 = vpop.f32.mrf.mxu0  ;;  %v2546_v53 = vpop.xlane.xlu1 %2545 }
 0x343   : > { %v2374_v41 = vpack.c.bf16 %v2336_v21, %v2335_v13  ;;  %v2660_v14 = vadd.f32 %v4013_v20, %v2546_v53  ;;  %v2544_v38 = vpop.xlane.xlu0 %2543  ;;  %v2239_v55 = vadd.f32 %v4077_v26, %v2238_v42 }
 0x344   : > { %v2659_v62 = vadd.f32 %v4013_v20, %v2544_v38  ;;  %v2240_v27 = vpop.f32.mrf.mxu0 }
 0x345   : > { %v2724_v45 = vmax.f32 %v2660_v14, 0.0  ;;  %v2434_v37 = vunpack.c.h.bf16 %v2374_v41  ;;  %v2433_v34 = vunpack.c.l.bf16 %v2374_v41  ;;  %v2337_v12 = vmax.f32 %v2239_v55, 0.0 }
 0x346   : > { %v2723_v61 = vmax.f32 %v2659_v62, 0.0  ;;  %v2241_v9 = vpop.f32.mrf.mxu0 }
 0x347   : > { %2789 = vst.msk [vmem:[%s4022_s20 + $0x78] sm:$0xff] %vm2773_vm1, %v2724_v45  ;;  %v2242_v49 = vadd.f32 %v4077_v26, %v2241_v9  ;;  %v2502_v40 = vmul.f32 %v3919_v16, %v2434_v37  ;;  %v2501_v46 = vmul.f32 %v3919_v16, %v2433_v34 }
 0x348   : > { %2788 = vst.msk [vmem:[%s4022_s20 + $0x70] sm:$0xff] %vm2773_vm1, %v2723_v61  ;;  %v2243_v35 = vpop.f32.mrf.mxu0 }
 0x349   : > { %v2338_v10 = vmax.f32 %v2242_v49, 0.0  ;;  %2617 = vadd.xlane.f32.xlu1 %v2502_v40  ;;  %2615 = vadd.xlane.f32.xlu0 %v2501_v46 }
 0x34a   : > { %v2246_v8 = vpop.f32.mrf.mxu0  ;;  %v2550_v7 = vpop.xlane.xlu1 %2549 }
 0x34b   : > { %v2375_v47 = vpack.c.bf16 %v2338_v10, %v2337_v12  ;;  %v2662_v57 = vadd.f32 %v4013_v20, %v2550_v7  ;;  %v2548_v28 = vpop.xlane.xlu0 %2547  ;;  %v2247_v43 = vadd.f32 %v4077_v26, %v2246_v8 }
 0x34c   : > { %v2661_v22 = vadd.f32 %v4013_v20, %v2548_v28  ;;  %v2248_v63 = vpop.f32.mrf.mxu0 }
 0x34d   : > { %v2726_v23 = vmax.f32 %v2662_v57, 0.0  ;;  %v2436_v56 = vunpack.c.h.bf16 %v2375_v47  ;;  %v2435_v51 = vunpack.c.l.bf16 %v2375_v47  ;;  %v2339_v60 = vmax.f32 %v2247_v43, 0.0 }
 0x34e   : > { %v2725_v18 = vmax.f32 %v2661_v22, 0.0  ;;  %v2249_v58 = vpop.f32.mrf.mxu0 }
 0x34f   : > { %2791 = vst.msk [vmem:[%s4022_s20 + $0x88] sm:$0xff] %vm2773_vm1, %v2726_v23  ;;  %v2250_v48 = vadd.f32 %v4077_v26, %v2249_v58  ;;  %v2504_v33 = vmul.f32 %v3919_v16, %v2436_v56  ;;  %v2503_v17 = vmul.f32 %v3919_v16, %v2435_v51 }
 0x350   : > { %2790 = vst.msk [vmem:[%s4022_s20 + $0x80] sm:$0xff] %vm2773_vm1, %v2725_v18  ;;  %v2251_v5 = vpop.f32.mrf.mxu0 }
 0x351   : > { %v2340_v0 = vmax.f32 %v2250_v48, 0.0  ;;  %2621 = vadd.xlane.f32.xlu1 %v2504_v33  ;;  %2619 = vadd.xlane.f32.xlu0 %v2503_v17 }
 0x352   : > { %v2554_v11 = vpop.xlane.xlu1 %2553  ;;  %v2552_v39 = vpop.xlane.xlu0 %2551 }
 0x353   : > { %v2376_v32 = vpack.c.bf16 %v2340_v0, %v2339_v60  ;;  %v2254_v2 = vpop.f32.mrf.mxu0  ;;  %v2664_v59 = vadd.f32 %v4013_v20, %v2554_v11  ;;  %v2663_v30 = vadd.f32 %v4013_v20, %v2552_v39 }
 0x354   : > { %v2255_v52 = vadd.f32 %v4077_v26, %v2254_v2 }
 0x355   : > { %v2728_v25 = vmax.f32 %v2664_v59, 0.0  ;;  %v2727_v50 = vmax.f32 %v2663_v30, 0.0  ;;  %v2256_v36 = vpop.f32.mrf.mxu0  ;;  %v2438_v4 = vunpack.c.h.bf16 %v2376_v32  ;;  %v2437_v3 = vunpack.c.l.bf16 %v2376_v32 }
 0x356   : > { %v2341_v44 = vmax.f32 %v2255_v52, 0.0 }
 0x357   : > { %2793 = vst.msk [vmem:[%s4022_s20 + $0x98] sm:$0xff] %vm2773_vm1, %v2728_v25  ;;  %2792 = vst.msk [vmem:[%s4022_s20 + $0x90] sm:$0xff] %vm2773_vm1, %v2727_v50  ;;  %v2257_v15 = vpop.f32.mrf.mxu0  ;;  %v2506_v19 = vmul.f32 %v3919_v16, %v2438_v4  ;;  %v2505_v1 = vmul.f32 %v3919_v16, %v2437_v3 }
 0x358   : > { %v2258_v24 = vadd.f32 %v4077_v26, %v2257_v15 }
 0x359   : > { %v2259_v31 = vpop.f32.mrf.mxu0  ;;  %2625 = vadd.xlane.f32.xlu1 %v2506_v19  ;;  %2623 = vadd.xlane.f32.xlu0 %v2505_v1 }
 0x35a   : > { %v2342_v29 = vmax.f32 %v2258_v24, 0.0  ;;  %v2558_v6 = vpop.xlane.xlu1 %2557  ;;  %v2556_v54 = vpop.xlane.xlu0 %2555 }
 0x35b   : > { %v2262_v13 = vpop.f32.mrf.mxu0  ;;  %v2666_v21 = vadd.f32 %v4013_v20, %v2558_v6  ;;  %v2665_v42 = vadd.f32 %v4013_v20, %v2556_v54 }
 0x35c   : > { %v2377_v53 = vpack.c.bf16 %v2342_v29, %v2341_v44  ;;  %v2263_v62 = vadd.f32 %v4077_v26, %v2262_v13 }
 0x35d   : > { %v2730_v41 = vmax.f32 %v2666_v21, 0.0  ;;  %v2729_v14 = vmax.f32 %v2665_v42, 0.0  ;;  %v2264_v38 = vpop.f32.mrf.mxu0 }
 0x35e   : > { %v2440_v27 = vunpack.c.h.bf16 %v2377_v53  ;;  %v2439_v55 = vunpack.c.l.bf16 %v2377_v53  ;;  %v2343_v49 = vmax.f32 %v2263_v62, 0.0 }
 0x35f   : > { %2795 = vst.msk [vmem:[%s4022_s20 + $0xa8] sm:$0xff] %vm2773_vm1, %v2730_v41  ;;  %2794 = vst.msk [vmem:[%s4022_s20 + $0xa0] sm:$0xff] %vm2773_vm1, %v2729_v14  ;;  %v2265_v45 = vpop.f32.mrf.mxu0 }
 0x360   : > { %v2266_v37 = vadd.f32 %v4077_v26, %v2265_v45  ;;  %v2508_v34 = vmul.f32 %v3919_v16, %v2440_v27  ;;  %v2507_v61 = vmul.f32 %v3919_v16, %v2439_v55 }
 0x361   : > { %v2267_v9 = vpop.f32.mrf.mxu0 }
 0x362   : > { %v2344_v40 = vmax.f32 %v2266_v37, 0.0  ;;  %2629 = vadd.xlane.f32.xlu1 %v2508_v34  ;;  %2627 = vadd.xlane.f32.xlu0 %v2507_v61  ;;  %v2562_v46 = vpop.xlane.xlu1 %2561  ;;  %v2560_v35 = vpop.xlane.xlu0 %2559 }
 0x363   : > { %v2270_v12 = vpop.f32.mrf.mxu0  ;;  %v2668_v10 = vadd.f32 %v4013_v20, %v2562_v46  ;;  %v2667_v8 = vadd.f32 %v4013_v20, %v2560_v35 }
 0x364   : > { %v2378_v7 = vpack.c.bf16 %v2344_v40, %v2343_v49  ;;  %v2271_v22 = vadd.f32 %v4077_v26, %v2270_v12 }
 0x365   : > { %v2732_v47 = vmax.f32 %v2668_v10, 0.0  ;;  %v2731_v57 = vmax.f32 %v2667_v8, 0.0  ;;  %v2272_v28 = vpop.f32.mrf.mxu0 }
 0x366   : > { %v2442_v63 = vunpack.c.h.bf16 %v2378_v7  ;;  %v2441_v43 = vunpack.c.l.bf16 %v2378_v7  ;;  %v2345_v48 = vmax.f32 %v2271_v22, 0.0 }
 0x367   : > { %2797 = vst.msk [vmem:[%s4022_s20 + $0xb8] sm:$0xff] %vm2773_vm1, %v2732_v47  ;;  %2796 = vst.msk [vmem:[%s4022_s20 + $0xb0] sm:$0xff] %vm2773_vm1, %v2731_v57  ;;  %v2273_v23 = vpop.f32.mrf.mxu0 }
 0x368   : > { %v2274_v56 = vadd.f32 %v4077_v26, %v2273_v23  ;;  %v2510_v51 = vmul.f32 %v3919_v16, %v2442_v63  ;;  %v2509_v18 = vmul.f32 %v3919_v16, %v2441_v43 }
 0x369   : > { %v2275_v58 = vpop.f32.mrf.mxu0 }
 0x36a   : > { %v2346_v33 = vmax.f32 %v2274_v56, 0.0  ;;  %2633 = vadd.xlane.f32.xlu1 %v2510_v51  ;;  %2631 = vadd.xlane.f32.xlu0 %v2509_v18  ;;  %v2566_v17 = vpop.xlane.xlu1 %2565  ;;  %v2564_v5 = vpop.xlane.xlu0 %2563 }
 0x36b   : > { %v2278_v60 = vpop.f32.mrf.mxu0  ;;  %v2670_v0 = vadd.f32 %v4013_v20, %v2566_v17  ;;  %v2669_v11 = vadd.f32 %v4013_v20, %v2564_v5 }
 0x36c   : > { %v2379_v39 = vpack.c.bf16 %v2346_v33, %v2345_v48  ;;  %v2279_v30 = vadd.f32 %v4077_v26, %v2278_v60 }
 0x36d   : > { %v2734_v32 = vmax.f32 %v2670_v0, 0.0  ;;  %v2733_v2 = vmax.f32 %v2669_v11, 0.0  ;;  %v2280_v59 = vpop.f32.mrf.mxu0 }
 0x36e   : > { %v2444_v25 = vunpack.c.h.bf16 %v2379_v39  ;;  %v2443_v50 = vunpack.c.l.bf16 %v2379_v39  ;;  %v2347_v19 = vmax.f32 %v2279_v30, 0.0 }
 0x36f   : > { %2799 = vst.msk [vmem:[%s4022_s20 + $0xc8] sm:$0xff] %vm2773_vm1, %v2734_v32  ;;  %2798 = vst.msk [vmem:[%s4022_s20 + $0xc0] sm:$0xff] %vm2773_vm1, %v2733_v2  ;;  %v2281_v36 = vpop.f32.mrf.mxu0 }
 0x370   : > { %v2282_v4 = vadd.f32 %v4077_v26, %v2281_v36  ;;  %v2512_v3 = vmul.f32 %v3919_v16, %v2444_v25  ;;  %v2511_v52 = vmul.f32 %v3919_v16, %v2443_v50 }
 0x371   : > { %v2283_v15 = vpop.f32.mrf.mxu0 }
 0x372   : > { %v2348_v1 = vmax.f32 %v2282_v4, 0.0  ;;  %2637 = vadd.xlane.f32.xlu1 %v2512_v3  ;;  %2635 = vadd.xlane.f32.xlu0 %v2511_v52  ;;  %v2570_v24 = vpop.xlane.xlu1 %2569  ;;  %v2568_v31 = vpop.xlane.xlu0 %2567 }
 0x373   : > { %v2672_v44 = vadd.f32 %v4013_v20, %v2570_v24  ;;  %v2671_v29 = vadd.f32 %v4013_v20, %v2568_v31 }
 0x374   : > { %v2380_v6 = vpack.c.bf16 %v2348_v1, %v2347_v19 }
 0x375   : > { %v2736_v54 = vmax.f32 %v2672_v44, 0.0  ;;  %v2735_v26 = vmax.f32 %v2671_v29, 0.0 }
 0x376   : > { %v2446_v13 = vunpack.c.h.bf16 %v2380_v6  ;;  %v2445_v21 = vunpack.c.l.bf16 %v2380_v6 }
 0x377   : > { %2801 = vst.msk [vmem:[%s4022_s20 + $0xd8] sm:$0xff] %vm2773_vm1, %v2736_v54  ;;  %2800 = vst.msk [vmem:[%s4022_s20 + $0xd0] sm:$0xff] %vm2773_vm1, %v2735_v26 }
 0x378   : > { %v2514_v42 = vmul.f32 %v3919_v16, %v2446_v13  ;;  %v2513_v53 = vmul.f32 %v3919_v16, %v2445_v21 }
 0x37a   : > { %2641 = vadd.xlane.f32.xlu1 %v2514_v42  ;;  %2639 = vadd.xlane.f32.xlu0 %v2513_v53  ;;  %v2574_v41 = vpop.xlane.xlu1 %2573  ;;  %v2572_v14 = vpop.xlane.xlu0 %2571 }
 0x37b   : > { %v2674_v38 = vadd.f32 %v4013_v20, %v2574_v41  ;;  %v2673_v62 = vadd.f32 %v4013_v20, %v2572_v14 }
 0x37d   : > { %v2738_v27 = vmax.f32 %v2674_v38, 0.0  ;;  %v2737_v55 = vmax.f32 %v2673_v62, 0.0 }
 0x37f   : > { %2803 = vst.msk [vmem:[%s4022_s20 + $0xe8] sm:$0xff] %vm2773_vm1, %v2738_v27  ;;  %2802 = vst.msk [vmem:[%s4022_s20 + $0xe0] sm:$0xff] %vm2773_vm1, %v2737_v55 }
 0x382   : > { %v2578_v45 = vpop.xlane.xlu1 %2577  ;;  %v2576_v16 = vpop.xlane.xlu0 %2575 }
 0x383   : > { %v2676_v37 = vadd.f32 %v4013_v20, %v2578_v45  ;;  %v2675_v34 = vadd.f32 %v4013_v20, %v2576_v16 }
 0x385   : > { %v2740_v61 = vmax.f32 %v2676_v37, 0.0  ;;  %v2739_v9 = vmax.f32 %v2675_v34, 0.0 }
 0x387   : > { %2805 = vst.msk [vmem:[%s4022_s20 + $0xf8] sm:$0xff] %vm2773_vm1, %v2740_v61  ;;  %2804 = vst.msk [vmem:[%s4022_s20 + $0xf0] sm:$0xff] %vm2773_vm1, %v2739_v9 }
 0x38a   : > { %v2582_v49 = vpop.xlane.xlu1 %2581  ;;  %v2580_v40 = vpop.xlane.xlu0 %2579 }
 0x38b   : > { %v2678_v46 = vadd.f32 %v4013_v20, %v2582_v49  ;;  %v2677_v35 = vadd.f32 %v4013_v20, %v2580_v40 }
 0x38d   : > { %v2742_v12 = vmax.f32 %v2678_v46, 0.0  ;;  %v2741_v10 = vmax.f32 %v2677_v35, 0.0 }
 0x38f   : > { %2807 = vst.msk [vmem:[%s4022_s20 + $0x108] sm:$0xff] %vm2773_vm1, %v2742_v12  ;;  %2806 = vst.msk [vmem:[%s4022_s20 + $0x100] sm:$0xff] %vm2773_vm1, %v2741_v10 }
 0x392   : > { %v2586_v8 = vpop.xlane.xlu1 %2585  ;;  %v2584_v7 = vpop.xlane.xlu0 %2583 }
 0x393   : > { %v2680_v47 = vadd.f32 %v4013_v20, %v2586_v8  ;;  %v2679_v57 = vadd.f32 %v4013_v20, %v2584_v7 }
 0x395   : > { %v2744_v28 = vmax.f32 %v2680_v47, 0.0  ;;  %v2743_v22 = vmax.f32 %v2679_v57, 0.0 }
 0x397   : > { %2809 = vst.msk [vmem:[%s4022_s20 + $0x118] sm:$0xff] %vm2773_vm1, %v2744_v28  ;;  %2808 = vst.msk [vmem:[%s4022_s20 + $0x110] sm:$0xff] %vm2773_vm1, %v2743_v22 }
 0x39a   : > { %v2590_v63 = vpop.xlane.xlu1 %2589  ;;  %v2588_v43 = vpop.xlane.xlu0 %2587 }
 0x39b   : > { %v2682_v23 = vadd.f32 %v4013_v20, %v2590_v63  ;;  %v2681_v56 = vadd.f32 %v4013_v20, %v2588_v43 }
 0x39d   : > { %v2746_v51 = vmax.f32 %v2682_v23, 0.0  ;;  %v2745_v18 = vmax.f32 %v2681_v56, 0.0 }
 0x39f   : > { %2811 = vst.msk [vmem:[%s4022_s20 + $0x128] sm:$0xff] %vm2773_vm1, %v2746_v51  ;;  %2810 = vst.msk [vmem:[%s4022_s20 + $0x120] sm:$0xff] %vm2773_vm1, %v2745_v18 }
 0x3a2   : > { %v2594_v58 = vpop.xlane.xlu1 %2593  ;;  %v2592_v48 = vpop.xlane.xlu0 %2591 }
 0x3a3   : > { %v2684_v33 = vadd.f32 %v4013_v20, %v2594_v58  ;;  %v2683_v17 = vadd.f32 %v4013_v20, %v2592_v48 }
 0x3a5   : > { %v2748_v5 = vmax.f32 %v2684_v33, 0.0  ;;  %v2747_v60 = vmax.f32 %v2683_v17, 0.0 }
 0x3a7   : > { %2813 = vst.msk [vmem:[%s4022_s20 + $0x138] sm:$0xff] %vm2773_vm1, %v2748_v5  ;;  %2812 = vst.msk [vmem:[%s4022_s20 + $0x130] sm:$0xff] %vm2773_vm1, %v2747_v60 }
 0x3aa   : > { %v2598_v0 = vpop.xlane.xlu1 %2597  ;;  %v2596_v11 = vpop.xlane.xlu0 %2595 }
 0x3ab   : > { %v2686_v39 = vadd.f32 %v4013_v20, %v2598_v0  ;;  %v2685_v32 = vadd.f32 %v4013_v20, %v2596_v11 }
 0x3ad   : > { %v2750_v2 = vmax.f32 %v2686_v39, 0.0  ;;  %v2749_v59 = vmax.f32 %v2685_v32, 0.0 }
 0x3af   : > { %2815 = vst.msk [vmem:[%s4022_s20 + $0x148] sm:$0xff] %vm2773_vm1, %v2750_v2  ;;  %2814 = vst.msk [vmem:[%s4022_s20 + $0x140] sm:$0xff] %vm2773_vm1, %v2749_v59 }
 0x3b2   : > { %v2602_v30 = vpop.xlane.xlu1 %2601  ;;  %v2600_v25 = vpop.xlane.xlu0 %2599 }
 0x3b3   : > { %v2688_v50 = vadd.f32 %v4013_v20, %v2602_v30  ;;  %v2687_v36 = vadd.f32 %v4013_v20, %v2600_v25 }
 0x3b5   : > { %v2752_v4 = vmax.f32 %v2688_v50, 0.0  ;;  %v2751_v3 = vmax.f32 %v2687_v36, 0.0 }
 0x3b7   : > { %2817 = vst.msk [vmem:[%s4022_s20 + $0x158] sm:$0xff] %vm2773_vm1, %v2752_v4  ;;  %2816 = vst.msk [vmem:[%s4022_s20 + $0x150] sm:$0xff] %vm2773_vm1, %v2751_v3 }
 0x3ba   : > { %v2606_v52 = vpop.xlane.xlu1 %2605  ;;  %v2604_v15 = vpop.xlane.xlu0 %2603 }
 0x3bb   : > { %v2690_v19 = vadd.f32 %v4013_v20, %v2606_v52  ;;  %v2689_v1 = vadd.f32 %v4013_v20, %v2604_v15 }
 0x3bd   : > { %v2754_v24 = vmax.f32 %v2690_v19, 0.0  ;;  %v2753_v31 = vmax.f32 %v2689_v1, 0.0 }
 0x3bf   : > { %2819 = vst.msk [vmem:[%s4022_s20 + $0x168] sm:$0xff] %vm2773_vm1, %v2754_v24  ;;  %2818 = vst.msk [vmem:[%s4022_s20 + $0x160] sm:$0xff] %vm2773_vm1, %v2753_v31 }
 0x3c2   : > { %v2610_v44 = vpop.xlane.xlu1 %2609  ;;  %v2608_v29 = vpop.xlane.xlu0 %2607 }
 0x3c3   : > { %v2692_v6 = vadd.f32 %v4013_v20, %v2610_v44  ;;  %v2691_v54 = vadd.f32 %v4013_v20, %v2608_v29 }
 0x3c5   : > { %v2756_v26 = vmax.f32 %v2692_v6, 0.0  ;;  %v2755_v13 = vmax.f32 %v2691_v54, 0.0 }
 0x3c7   : > { %2821 = vst.msk [vmem:[%s4022_s20 + $0x178] sm:$0xff] %vm2773_vm1, %v2756_v26  ;;  %2820 = vst.msk [vmem:[%s4022_s20 + $0x170] sm:$0xff] %vm2773_vm1, %v2755_v13 }
 0x3ca   : > { %v2614_v21 = vpop.xlane.xlu1 %2613  ;;  %v2612_v42 = vpop.xlane.xlu0 %2611 }
 0x3cb   : > { %v2694_v53 = vadd.f32 %v4013_v20, %v2614_v21  ;;  %v2693_v41 = vadd.f32 %v4013_v20, %v2612_v42 }
 0x3cd   : > { %v2758_v14 = vmax.f32 %v2694_v53, 0.0  ;;  %v2757_v38 = vmax.f32 %v2693_v41, 0.0 }
 0x3cf   : > { %2823 = vst.msk [vmem:[%s4022_s20 + $0x188] sm:$0xff] %vm2773_vm1, %v2758_v14  ;;  %2822 = vst.msk [vmem:[%s4022_s20 + $0x180] sm:$0xff] %vm2773_vm1, %v2757_v38 }
 0x3d2   : > { %v2618_v62 = vpop.xlane.xlu1 %2617  ;;  %v2616_v27 = vpop.xlane.xlu0 %2615 }
 0x3d3   : > { %v2696_v55 = vadd.f32 %v4013_v20, %v2618_v62  ;;  %v2695_v45 = vadd.f32 %v4013_v20, %v2616_v27 }
 0x3d5   : > { %v2760_v16 = vmax.f32 %v2696_v55, 0.0  ;;  %v2759_v37 = vmax.f32 %v2695_v45, 0.0 }
 0x3d7   : > { %2825 = vst.msk [vmem:[%s4022_s20 + $0x198] sm:$0xff] %vm2773_vm1, %v2760_v16  ;;  %2824 = vst.msk [vmem:[%s4022_s20 + $0x190] sm:$0xff] %vm2773_vm1, %v2759_v37 }
 0x3da   : > { %v2622_v34 = vpop.xlane.xlu1 %2621  ;;  %v2620_v61 = vpop.xlane.xlu0 %2619 }
 0x3db   : > { %v2698_v9 = vadd.f32 %v4013_v20, %v2622_v34  ;;  %v2697_v49 = vadd.f32 %v4013_v20, %v2620_v61 }
 0x3dd   : > { %v2762_v40 = vmax.f32 %v2698_v9, 0.0  ;;  %v2761_v46 = vmax.f32 %v2697_v49, 0.0 }
 0x3df   : > { %2827 = vst.msk [vmem:[%s4022_s20 + $0x1a8] sm:$0xff] %vm2773_vm1, %v2762_v40  ;;  %2826 = vst.msk [vmem:[%s4022_s20 + $0x1a0] sm:$0xff] %vm2773_vm1, %v2761_v46 }
 0x3e2   : > { %v2626_v35 = vpop.xlane.xlu1 %2625  ;;  %v2624_v12 = vpop.xlane.xlu0 %2623 }
 0x3e3   : > { %v2700_v10 = vadd.f32 %v4013_v20, %v2626_v35  ;;  %v2699_v8 = vadd.f32 %v4013_v20, %v2624_v12 }
 0x3e5   : > { %v2764_v7 = vmax.f32 %v2700_v10, 0.0  ;;  %v2763_v47 = vmax.f32 %v2699_v8, 0.0 }
 0x3e7   : > { %2829 = vst.msk [vmem:[%s4022_s20 + $0x1b8] sm:$0xff] %vm2773_vm1, %v2764_v7  ;;  %2828 = vst.msk [vmem:[%s4022_s20 + $0x1b0] sm:$0xff] %vm2773_vm1, %v2763_v47 }
 0x3eb   : > { %v2630_v57 = vpop.xlane.xlu1 %2629  ;;  %v2628_v28 = vpop.xlane.xlu0 %2627 }
 0x3ec   : > { %v2702_v22 = vadd.f32 %v4013_v20, %v2630_v57  ;;  %v2701_v63 = vadd.f32 %v4013_v20, %v2628_v28 }
 0x3ee   : > { %v2766_v43 = vmax.f32 %v2702_v22, 0.0  ;;  %v2765_v23 = vmax.f32 %v2701_v63, 0.0 }
 0x3f0   : > { %2831 = vst.msk [vmem:[%s4022_s20 + $0x1c8] sm:$0xff] %vm2773_vm1, %v2766_v43  ;;  %2830 = vst.msk [vmem:[%s4022_s20 + $0x1c0] sm:$0xff] %vm2773_vm1, %v2765_v23 }
 0x3f3   : > { %v2634_v56 = vpop.xlane.xlu1 %2633  ;;  %v2632_v51 = vpop.xlane.xlu0 %2631 }
 0x3f4   : > { %v2704_v18 = vadd.f32 %v4013_v20, %v2634_v56  ;;  %v2703_v58 = vadd.f32 %v4013_v20, %v2632_v51 }
 0x3f6   : > { %v2768_v48 = vmax.f32 %v2704_v18, 0.0  ;;  %v2767_v33 = vmax.f32 %v2703_v58, 0.0 }
 0x3f8   : > { %2833 = vst.msk [vmem:[%s4022_s20 + $0x1d8] sm:$0xff] %vm2773_vm1, %v2768_v48  ;;  %2832 = vst.msk [vmem:[%s4022_s20 + $0x1d0] sm:$0xff] %vm2773_vm1, %v2767_v33 }
 0x3fb   : > { %v2638_v17 = vpop.xlane.xlu1 %2637  ;;  %v2636_v5 = vpop.xlane.xlu0 %2635 }
 0x3fc   : > { %v2706_v60 = vadd.f32 %v4013_v20, %v2638_v17  ;;  %v2705_v0 = vadd.f32 %v4013_v20, %v2636_v5 }
 0x3fe   : > { %v2770_v11 = vmax.f32 %v2706_v60, 0.0  ;;  %v2769_v39 = vmax.f32 %v2705_v0, 0.0 }
 0x400   : > { %2835 = vst.msk [vmem:[%s4022_s20 + $0x1e8] sm:$0xff] %vm2773_vm1, %v2770_v11  ;;  %2834 = vst.msk [vmem:[%s4022_s20 + $0x1e0] sm:$0xff] %vm2773_vm1, %v2769_v39 }
 0x403   : > { %v2642_v32 = vpop.xlane.xlu1 %2641  ;;  %v2640_v2 = vpop.xlane.xlu0 %2639 }
 0x404   : > { %v2708_v59 = vadd.f32 %v4013_v20, %v2642_v32  ;;  %v2707_v30 = vadd.f32 %v4013_v20, %v2640_v2 }
 0x406   : > { %v2772_v25 = vmax.f32 %v2708_v59, 0.0  ;;  %v2771_v50 = vmax.f32 %v2707_v30, 0.0 }
 0x408   : > { %2837 = vst.msk [vmem:[%s4022_s20 + $0x1f8] sm:$0xff] %vm2773_vm1, %v2772_v25  ;;  %2836 = vst.msk [vmem:[%s4022_s20 + $0x1f0] sm:$0xff] %vm2773_vm1, %v2771_v50 }
 0x409 PF: > { %s20_s11 = sadd.s32 1, %s3080_s11  }
 0x40a   : > { %p17_p4 = scmp.ge.s32.totalorder %s20_s11, 4  }
 0x40c   :  { %19 = sbr.rel (!%p17_p4) target bundleno = 2 (0x2), region = 86 }

</bundles_post_ra>
